<compile_context>
chip_gen: v5e
topology: v5e:2x2
jax: 0.10.0
libtpu: 0.0.40
codegen_flags: <defaults>
</compile_context>

<pallas_src>
import functools

import jax
import jax.numpy as jnp
import numpy as np
from jax.experimental import pallas as pl
from jax.experimental.pallas import tpu as pltpu


LANE = 128                       # embedding dim padded to lane-dense multiple
TILE_TARGET = 512                # preferred adjacency tile (sweep 512-1024 on big graphs)
TILE_BASE = 256                  # minimum MXU-friendly tile
E_RESIDENT_MAX_BYTES = 12 * 1024 * 1024   # keep resident E_l small enough for v7x (64 MiB/TC)
VMEM_LIMIT_FLOOR = 32 * 1024 * 1024
VMEM_LIMIT_CAP = 48 * 1024 * 1024          # <= v7x physical per-TC VMEM with headroom


def _round_up(x, m):
    return ((x + m - 1) // m) * m


def _choose_tile(num_user, num_item, target=TILE_TARGET, base=TILE_BASE):
    """Single tile size for both the row and contraction axes of both bipartite
    halves (keeps the user/item paddings mutually consistent: user rows are the
    item half's contraction dim and vice versa).  Prefer `target` for HBM-BW
    amortization; fall back to `base` for small graphs."""
    smallest = _round_up(min(num_user, num_item), base)
    return target if smallest >= 2 * target else base


def _vmem_budget(tm, tk, k_p, dp, e_resident, emit_e_next):
    """Scoped-VMEM request from the actual buffer footprint (pipelined blocks
    counted double-buffered), clamped to a cross-generation-safe window."""
    adj_buf = 2 * tm * tk * 2                                  # bf16 adj tile, double-buffered
    e_buf = (2 * k_p * dp * 2) if e_resident else (2 * tk * dp * 2)
    w_buf = 2 * dp * dp * 2                                    # bf16 resident weight
    sum_in = 2 * tm * dp * 4
    sum_out = 2 * tm * dp * 4
    e_out = (2 * tm * dp * 2) if emit_e_next else 0
    acc = tm * dp * 4
    need = adj_buf + e_buf + w_buf + sum_in + sum_out + e_out + acc
    return int(min(max(2 * need, VMEM_LIMIT_FLOOR), VMEM_LIMIT_CAP))


def _make_layer_kernel(*, e_resident, emit_e_next, tk):
    """One bipartite half of one NGCF propagation layer, one (row, k) grid step.

    adj_ref : (TM, TK) bf16   normalized adjacency tile (R_norm or R_norm^T)
    e_ref   : (Kp, Dp) bf16   full resident E_l  (e_resident)    -- or --
              (TK, Dp) bf16   streamed strip of E_l
    w_ref   : (Dp, Dp) bf16   layer weight, pre-transposed to (D_in, D_out)
    sum_ref : (TM, Dp) f32    running sum of relu'd layer outputs (aliased)
    e_out   : (TM, Dp) bf16   E_{l+1} row tile (omitted on the last layer)
    sum_out : (TM, Dp) f32    running sum + E_{l+1}
    acc_ref : (TM, Dp) f32    VMEM scratch accumulator for A @ E_l
    """

    def kernel(adj_ref, e_ref, w_ref, sum_ref, *rest):
        if emit_e_next:
            e_out_ref, sum_out_ref, acc_ref = rest
        else:
            sum_out_ref, acc_ref = rest
            e_out_ref = None

        k = pl.program_id(1)

        @pl.when(k == 0)
        def _():
            acc_ref[...] = jnp.zeros_like(acc_ref)

        if e_resident:
            off = pl.multiple_of(k * tk, tk)
            e_blk = e_ref[pl.ds(off, tk), :]
        else:
            e_blk = e_ref[...]

        # Sparse spmm realized as dense bf16 MXU matmul with f32 accumulation.
        acc_ref[...] += jnp.dot(adj_ref[...], e_blk,
                                preferred_element_type=jnp.float32)

        @pl.when(k == pl.num_programs(1) - 1)
        def _():
            # (A @ E_l) @ W_l epilogue -- bf16 x bf16 MXU feed, f32 accumulate.
            transformed = jnp.dot(acc_ref[...].astype(jnp.bfloat16), w_ref[...],
                                  preferred_element_type=jnp.float32)
            e_new = jnp.maximum(transformed, 0.0)                 # ReLU
            if emit_e_next:
                e_out_ref[...] = e_new.astype(e_out_ref.dtype)
            sum_out_ref[...] = sum_ref[...] + e_new

    return kernel


def _half_layer(adj_p, e_src_p, w_p, sum_p, *, tm, tk, e_resident, emit_e_next):
    """Run one bipartite half of one propagation layer.

    Returns (E_{l+1} bf16 or None, new running sum f32) for that half."""
    m_p, k_p = adj_p.shape
    _, dp = sum_p.shape
    grid = (m_p // tm, k_p // tk)

    kernel = _make_layer_kernel(e_resident=e_resident,
                                emit_e_next=emit_e_next, tk=tk)

    if e_resident:
        e_spec = pl.BlockSpec((k_p, dp), lambda i, k: (0, 0))      # loaded once, resident
    else:
        e_spec = pl.BlockSpec((tk, dp), lambda i, k: (k, 0))       # streamed strip

    out_shapes = []
    out_specs = []
    if emit_e_next:
        out_shapes.append(jax.ShapeDtypeStruct((m_p, dp), jnp.bfloat16))
        out_specs.append(pl.BlockSpec((tm, dp), lambda i, k: (i, 0)))
    out_shapes.append(jax.ShapeDtypeStruct((m_p, dp), jnp.float32))
    out_specs.append(pl.BlockSpec((tm, dp), lambda i, k: (i, 0)))
    sum_out_idx = len(out_shapes) - 1

    e_stream_factor = 1 if e_resident else (m_p // tm)
    bytes_accessed = (adj_p.size * 2
                      + e_stream_factor * e_src_p.size * 2
                      + w_p.size * 2
                      + 2 * sum_p.size * 4
                      + (m_p * dp * 2 if emit_e_next else 0))
    cost = pl.CostEstimate(
        flops=2 * m_p * k_p * dp + 2 * m_p * dp * dp,
        transcendentals=0,
        bytes_accessed=int(bytes_accessed),
    )

    outs = pl.pallas_call(
        kernel,
        out_shape=tuple(out_shapes),
        grid_spec=pltpu.PrefetchScalarGridSpec(
            num_scalar_prefetch=0,
            grid=grid,
            in_specs=[
                pl.BlockSpec((tm, tk), lambda i, k: (i, k)),   # adjacency tile
                e_spec,                                        # E_l (resident or strip)
                pl.BlockSpec((dp, dp), lambda i, k: (0, 0)),   # W_l (resident, bf16)
                pl.BlockSpec((tm, dp), lambda i, k: (i, 0)),   # running sum (in)
            ],
            out_specs=out_specs,
            scratch_shapes=[pltpu.VMEM((tm, dp), jnp.float32)],
        ),
        input_output_aliases={3: sum_out_idx},   # carry the running sum in place
        compiler_params=pltpu.CompilerParams(
            dimension_semantics=("parallel", "arbitrary"),
            vmem_limit_bytes=_vmem_budget(tm, tk, k_p, dp, e_resident, emit_e_next),
        ),
        cost_estimate=cost,
    )(adj_p, e_src_p, w_p, sum_p)

    if emit_e_next:
        return outs[0], outs[1]
    return None, outs[0]


@functools.partial(jax.jit, static_argnames=("tile", "e_resident_max_bytes"))
def ngcf_forward_padded(rn_p, rnt_p, e0_user_p, e0_item_p, w_p, *,
                        tile, e_resident_max_bytes):
    """Jitted forward over pre-padded / pre-cast inputs.  Returns the padded
    mean (over E_0..E_L) embeddings for the user and item halves."""
    up, dp = e0_user_p.shape
    ip = e0_item_p.shape[0]
    n_layers = w_p.shape[0]

    # Keep E_l fully VMEM-resident (no per-row-tile re-stream) when it fits.
    item_e_resident = (ip * dp * 2) <= e_resident_max_bytes   # E_item used by the user half
    user_e_resident = (up * dp * 2) <= e_resident_max_bytes   # E_user used by the item half

    e_user = e0_user_p.astype(jnp.bfloat16)
    e_item = e0_item_p.astype(jnp.bfloat16)
    sum_user = jnp.zeros_like(e0_user_p)    # running sum of relu'd layer outputs (f32)
    sum_item = jnp.zeros_like(e0_item_p)

    for layer in range(n_layers):
        emit_e = layer + 1 < n_layers        # E_L is dead: do not materialize it
        new_e_user, sum_user = _half_layer(
            rn_p, e_item, w_p[layer], sum_user,
            tm=tile, tk=tile, e_resident=item_e_resident, emit_e_next=emit_e)
        new_e_item, sum_item = _half_layer(
            rnt_p, e_user, w_p[layer], sum_item,
            tm=tile, tk=tile, e_resident=user_e_resident, emit_e_next=emit_e)
        e_user, e_item = new_e_user, new_e_item

    inv = jnp.float32(1.0 / (n_layers + 1))   # mean over L+1 stacked embeddings
    return (e0_user_p + sum_user) * inv, (e0_item_p + sum_item) * inv


def ngcf_forward(params, *, e_resident_max_bytes=E_RESIDENT_MAX_BYTES):
    """Full NGCF forward: returns (user_final (U, D), item_final (I, D))."""
    su, si = ngcf_forward_padded(
        params["rn"], params["rnt"], params["e0_user"], params["e0_item"],
        params["w"], tile=params["tile"],
        e_resident_max_bytes=e_resident_max_bytes)
    u, i, d = params["num_user"], params["num_item"], params["dim"]
    return su[:u, :d], si[:i, :d]


def prepare_ngcf(R, user_embeds, item_embeds, weights):
    """One-time host-side prep (hoisted out of the per-forward jit): bipartite
    symmetric normalization, padding to tile multiples, bf16 casts, weight
    transpose.  Matches the module's __init__ normalization exactly.

    R           : (num_user, num_item) binary interaction matrix
    user_embeds : (num_user, D) f32
    item_embeds : (num_item, D) f32
    weights     : (L, D, D) f32 in PyTorch nn.Linear (out_features, in_features) layout
    """
    R = np.asarray(R, dtype=np.float32)
    user_embeds = np.asarray(user_embeds, dtype=np.float32)
    item_embeds = np.asarray(item_embeds, dtype=np.float32)
    weights = np.asarray(weights, dtype=np.float32)

    num_user, num_item = R.shape
    d = user_embeds.shape[1]
    n_layers = weights.shape[0]

    tile = _choose_tile(num_user, num_item)
    up = _round_up(num_user, tile)
    ip = _round_up(num_item, tile)
    dp = _round_up(d, LANE)

    # rn = D_u^{-1/2} R D_i^{-1/2}; the user-user / item-item blocks of A_norm
    # are structurally zero and never materialized.
    eps = 1e-10
    deg_u = R.sum(axis=1)
    deg_i = R.sum(axis=0)
    du = np.power(deg_u + eps, -0.5).astype(np.float32)
    di = np.power(deg_i + eps, -0.5).astype(np.float32)
    rn = (R * du[:, None]) * di[None, :]

    rn_p = np.zeros((up, ip), np.float32)
    rn_p[:num_user, :num_item] = rn
    rnt_p = np.ascontiguousarray(rn_p.T)          # pre-transposed: no in-kernel transpose

    e0_user_p = np.zeros((up, dp), np.float32)
    e0_user_p[:num_user, :d] = user_embeds
    e0_item_p = np.zeros((ip, dp), np.float32)
    e0_item_p[:num_item, :d] = item_embeds

    # nn.Linear weight is (out, in): pre-transpose to (in, out), zero-pad, bf16.
    w_t = np.transpose(weights, (0, 2, 1))
    w_p = np.zeros((n_layers, dp, dp), np.float32)
    w_p[:, :d, :d] = w_t

    return {
        "rn": jnp.asarray(rn_p, dtype=jnp.bfloat16),
        "rnt": jnp.asarray(rnt_p, dtype=jnp.bfloat16),
        "e0_user": jnp.asarray(e0_user_p),
        "e0_item": jnp.asarray(e0_item_p),
        "w": jnp.asarray(w_p, dtype=jnp.bfloat16),
        "tile": tile,
        "num_user": num_user,
        "num_item": num_item,
        "dim": d,
    }


def xavier_uniform(key, shape):
    """nn.init.xavier_uniform_ for a 2-D (fan_out, fan_in) tensor."""
    fan_out, fan_in = shape
    bound = float(np.sqrt(6.0 / (fan_in + fan_out)))
    return jax.random.uniform(key, shape, jnp.float32, minval=-bound, maxval=bound)


if __name__ == "__main__":
    # Small, module-consistent shapes.  With TILE_BASE=256: user half pads to
    # 256 rows, item half to 512 rows (2 row tiles -> exercises the parallel
    # axis), contraction extents of 2 and 1 blocks exercise the accumulator.
    num_user, num_item = 192, 320
    embedding_dim = 32                     # padded to 128 lanes internally
    n_layers = 2

    key = jax.random.PRNGKey(0)
    k_adj, k_user, k_item, k_w = jax.random.split(key, 4)

    # Synthetic interaction matrix R (num_user, num_item), ~10% density.
    R = (jax.random.uniform(k_adj, (num_user, num_item)) < 0.1).astype(jnp.float32)
    R_np = np.asarray(R)

    user_embeds = xavier_uniform(k_user, (num_user, embedding_dim))
    item_embeds = xavier_uniform(k_item, (num_item, embedding_dim))
    w_keys = jax.random.split(k_w, n_layers)
    weights = jnp.stack(
        [xavier_uniform(wk, (embedding_dim, embedding_dim)) for wk in w_keys], axis=0
    )  # (L, D_out, D_in) -- PyTorch nn.Linear layout

    params = prepare_ngcf(R_np, np.asarray(user_embeds), np.asarray(item_embeds),
                          np.asarray(weights))

    # Default path: E_l is VMEM-resident at these sizes.
    user_final, item_final = ngcf_forward(params)
    user_final = jax.block_until_ready(user_final)
    item_final = jax.block_until_ready(item_final)

    # Also exercise the streamed-E fallback (used when E_l exceeds the budget).
    user_final_s, item_final_s = ngcf_forward(params, e_resident_max_bytes=0)
    user_final_s = jax.block_until_ready(user_final_s)
    item_final_s = jax.block_until_ready(item_final_s)

    # Reference 1: precision-matched (bf16 adj/E/W feed, f32 accumulate, bf16
    # epilogue operands) -> tight check of the kernel math.
    eps = 1e-10
    deg_u = R_np.sum(axis=1)
    deg_i = R_np.sum(axis=0)
    du = np.power(deg_u + eps, -0.5).astype(np.float32)
    di = np.power(deg_i + eps, -0.5).astype(np.float32)
    rn = (R_np * du[:, None]) * di[None, :]

    rn_bf = jnp.asarray(rn).astype(jnp.bfloat16)
    rnt_bf = jnp.asarray(np.ascontiguousarray(rn.T)).astype(jnp.bfloat16)
    w_t_bf = jnp.transpose(weights, (0, 2, 1)).astype(jnp.bfloat16)

    e_u = user_embeds.astype(jnp.bfloat16)
    e_i = item_embeds.astype(jnp.bfloat16)
    s_u = jnp.zeros_like(user_embeds)
    s_i = jnp.zeros_like(item_embeds)
    for l in range(n_layers):
        agg_u = jnp.dot(rn_bf, e_i, preferred_element_type=jnp.float32)
        agg_i = jnp.dot(rnt_bf, e_u, preferred_element_type=jnp.float32)
        t_u = jnp.maximum(jnp.dot(agg_u.astype(jnp.bfloat16), w_t_bf[l],
                                  preferred_element_type=jnp.float32), 0.0)
        t_i = jnp.maximum(jnp.dot(agg_i.astype(jnp.bfloat16), w_t_bf[l],
                                  preferred_element_type=jnp.float32), 0.0)
        s_u = s_u + t_u
        s_i = s_i + t_i
        e_u = t_u.astype(jnp.bfloat16)
        e_i = t_i.astype(jnp.bfloat16)
    ref_u_matched = (user_embeds + s_u) / (n_layers + 1)
    ref_i_matched = (item_embeds + s_i) / (n_layers + 1)

    # Reference 2: exact f32 module semantics (dense A_norm) -> loose sanity
    # check (validates the bipartite split and bounds bf16 drift).
    N = num_user + num_item
    A = np.zeros((N, N), np.float32)
    A[:num_user, num_user:] = R_np
    A[num_user:, :num_user] = R_np.T
    deg = A.sum(axis=1)
    dinv = np.power(deg + eps, -0.5).astype(np.float32)
    A_norm = (A * dinv[:, None]) * dinv[None, :]
    e0 = np.concatenate([np.asarray(user_embeds), np.asarray(item_embeds)], axis=0)
    w_np = np.asarray(weights)
    e = e0.copy()
    acc = e0.copy()
    for l in range(n_layers):
        agg = A_norm @ e
        e = np.maximum(agg @ w_np[l].T, 0.0)
        acc = acc + e
    ref_f32 = acc / (n_layers + 1)
    ref_u_f32 = ref_f32[:num_user]
    ref_i_f32 = ref_f32[num_user:]

    for name, (uf, itf) in {"resident": (user_final, item_final),
                            "streamed": (user_final_s, item_final_s)}.items():
        assert uf.shape == (num_user, embedding_dim)
        assert itf.shape == (num_item, embedding_dim)
        assert jnp.allclose(uf, ref_u_matched, atol=1e-2, rtol=1e-2), \
            f"user mismatch vs matched-precision reference ({name})"
        assert jnp.allclose(itf, ref_i_matched, atol=1e-2, rtol=1e-2), \
            f"item mismatch vs matched-precision reference ({name})"
        assert jnp.allclose(uf, jnp.asarray(ref_u_f32), atol=3e-2, rtol=3e-2), \
            f"user mismatch vs f32 reference ({name})"
        assert jnp.allclose(itf, jnp.asarray(ref_i_f32), atol=3e-2, rtol=3e-2), \
            f"item mismatch vs f32 reference ({name})"

    print("KERNEL_OK")
</pallas_src>

<mosaic_0001>
module attributes {stable_mosaic.version = 11 : i64} {
  func.func @kernel(%arg0: i32, %arg1: i32, %arg2: memref<256x256xbf16, #tpu.memory_space<vmem>>, %arg3: memref<256x128xbf16, #tpu.memory_space<vmem>>, %arg4: memref<128x128xbf16, #tpu.memory_space<vmem>>, %arg5: memref<256x128xf32, #tpu.memory_space<vmem>>, %arg6: memref<256x128xbf16, #tpu.memory_space<vmem>>, %arg7: memref<256x128xf32, #tpu.memory_space<vmem>>, %arg8: memref<256x128xf32, #tpu.memory_space<vmem>>) attributes {dimension_semantics = [#tpu.dimension_semantics<parallel>, #tpu.dimension_semantics<arbitrary>], iteration_bounds = array<i64: 2, 1>, scalar_prefetch = 0 : i64, scratch_operands = 1 : i64, tpu.core_type = #tpu.core_type<tc>, window_params = [{transform_indices = @transform_0, window_bounds = array<i64: 256, 256>}, {pipeline_mode = #tpu.pipeline_mode<synchronous>, transform_indices = @transform_1, window_bounds = array<i64: 256, 128>}, {pipeline_mode = #tpu.pipeline_mode<synchronous>, transform_indices = @transform_2, window_bounds = array<i64: 128, 128>}, {transform_indices = @transform_3, window_bounds = array<i64: 256, 128>}, {transform_indices = @transform_4, window_bounds = array<i64: 256, 128>}, {transform_indices = @transform_5, window_bounds = array<i64: 256, 128>}]} {
    %c0_i32 = arith.constant 0 : i32
    %0 = arith.cmpi eq, %arg1, %c0_i32 : i32
    %1 = arith.extui %0 : i1 to i32
    %c0_i32_0 = arith.constant 0 : i32
    %2 = arith.cmpi ne, %1, %c0_i32_0 : i32
    scf.if %2 {
      %cst_9 = arith.constant 0.000000e+00 : f32
      %15 = vector.broadcast %cst_9 : f32 to vector<256x128xf32>
      %c0_10 = arith.constant 0 : index
      %c0_11 = arith.constant 0 : index
      %16 = vector.load %arg8[%c0_10, %c0_11] : memref<256x128xf32, #tpu.memory_space<vmem>>, vector<256x128xf32>
      tpu.vector_store %arg8[%c0_10, %c0_11], %15 {strides = array<i32>} : memref<256x128xf32, #tpu.memory_space<vmem>>, vector<256x128xf32>,
    } else {
    }
    %c256_i32 = arith.constant 256 : i32
    %3 = arith.muli %arg1, %c256_i32 : i32
    %4 = tpu.assume_multiple %3, 256 : i32
    %5 = arith.index_cast %4 : i32 to index
    %c0 = arith.constant 0 : index
    %6 = vector.load %arg3[%5, %c0] : memref<256x128xbf16, #tpu.memory_space<vmem>>, vector<256x128xbf16>
    %c0_1 = arith.constant 0 : index
    %c0_2 = arith.constant 0 : index
    %7 = vector.load %arg8[%c0_1, %c0_2] : memref<256x128xf32, #tpu.memory_space<vmem>>, vector<256x128xf32>
    %c0_3 = arith.constant 0 : index
    %c0_4 = arith.constant 0 : index
    %8 = vector.load %arg2[%c0_3, %c0_4] : memref<256x256xbf16, #tpu.memory_space<vmem>>, vector<256x256xbf16>
    %cst = arith.constant dense<0.000000e+00> : vector<256x128xf32>
    %9 = tpu.matmul %8, %6, %cst {dimension_numbers = #tpu.dot_dimension_numbers<[1], [0], [0], [1], [0, 0, 1, 1], [], []>} : vector<256x256xbf16>, vector<256x128xbf16>, vector<256x128xf32> -> vector<256x128xf32>
    %10 = arith.addf %7, %9 : vector<256x128xf32>
    %c0_5 = arith.constant 0 : index
    %c0_6 = arith.constant 0 : index
    %11 = vector.load %arg8[%c0_5, %c0_6] : memref<256x128xf32, #tpu.memory_space<vmem>>, vector<256x128xf32>
    tpu.vector_store %arg8[%c0_5, %c0_6], %10 {strides = array<i32>} : memref<256x128xf32, #tpu.memory_space<vmem>>, vector<256x128xf32>,
    %c0_i32_7 = arith.constant 0 : i32
    %12 = arith.cmpi eq, %arg1, %c0_i32_7 : i32
    %13 = arith.extui %12 : i1 to i32
    %c0_i32_8 = arith.constant 0 : i32
    %14 = arith.cmpi ne, %13, %c0_i32_8 : i32
    scf.if %14 {
      %c0_9 = arith.constant 0 : index
      %c0_10 = arith.constant 0 : index
      %15 = vector.load %arg8[%c0_9, %c0_10] : memref<256x128xf32, #tpu.memory_space<vmem>>, vector<256x128xf32>
      %16 = arith.truncf %15 : vector<256x128xf32> to vector<256x128xbf16>
      %c0_11 = arith.constant 0 : index
      %c0_12 = arith.constant 0 : index
      %17 = vector.load %arg4[%c0_11, %c0_12] : memref<128x128xbf16, #tpu.memory_space<vmem>>, vector<128x128xbf16>
      %cst_13 = arith.constant dense<0.000000e+00> : vector<256x128xf32>
      %18 = tpu.matmul %16, %17, %cst_13 {dimension_numbers = #tpu.dot_dimension_numbers<[1], [0], [0], [1], [0, 0, 1, 1], [], []>} : vector<256x128xbf16>, vector<128x128xbf16>, vector<256x128xf32> -> vector<256x128xf32>
      %cst_14 = arith.constant 0.000000e+00 : f32
      %19 = vector.broadcast %cst_14 : f32 to vector<256x128xf32>
      %20 = arith.maximumf %18, %19 : vector<256x128xf32>
      %21 = arith.truncf %20 : vector<256x128xf32> to vector<256x128xbf16>
      %c0_15 = arith.constant 0 : index
      %c0_16 = arith.constant 0 : index
      %22 = vector.load %arg6[%c0_15, %c0_16] : memref<256x128xbf16, #tpu.memory_space<vmem>>, vector<256x128xbf16>
      tpu.vector_store %arg6[%c0_15, %c0_16], %21 {strides = array<i32>} : memref<256x128xbf16, #tpu.memory_space<vmem>>, vector<256x128xbf16>,
      %c0_17 = arith.constant 0 : index
      %c0_18 = arith.constant 0 : index
      %23 = vector.load %arg5[%c0_17, %c0_18] : memref<256x128xf32, #tpu.memory_space<vmem>>, vector<256x128xf32>
      %24 = arith.addf %23, %20 : vector<256x128xf32>
      %c0_19 = arith.constant 0 : index
      %c0_20 = arith.constant 0 : index
      %25 = vector.load %arg7[%c0_19, %c0_20] : memref<256x128xf32, #tpu.memory_space<vmem>>, vector<256x128xf32>
      tpu.vector_store %arg7[%c0_19, %c0_20], %24 {strides = array<i32>} : memref<256x128xf32, #tpu.memory_space<vmem>>, vector<256x128xf32>,
    } else {
    }
    return
  }
  func.func @transform_0(%arg0: i32, %arg1: i32) -> (i32, i32) {
    %c0_i32 = arith.constant 0 : i32
    return %arg0, %arg1 : i32, i32
  }
  func.func @transform_1(%arg0: i32, %arg1: i32) -> (i32, i32) {
    %c0_i32 = arith.constant 0 : i32
    %c0_i32_0 = arith.constant 0 : i32
    %c0_i32_1 = arith.constant 0 : i32
    return %c0_i32, %c0_i32_0 : i32, i32
  }
  func.func @transform_2(%arg0: i32, %arg1: i32) -> (i32, i32) {
    %c0_i32 = arith.constant 0 : i32
    %c0_i32_0 = arith.constant 0 : i32
    %c0_i32_1 = arith.constant 0 : i32
    return %c0_i32, %c0_i32_0 : i32, i32
  }
  func.func @transform_3(%arg0: i32, %arg1: i32) -> (i32, i32) {
    %c0_i32 = arith.constant 0 : i32
    %c0_i32_0 = arith.constant 0 : i32
    return %arg0, %c0_i32 : i32, i32
  }
  func.func @transform_4(%arg0: i32, %arg1: i32) -> (i32, i32) {
    %c0_i32 = arith.constant 0 : i32
    %c0_i32_0 = arith.constant 0 : i32
    return %arg0, %c0_i32 : i32, i32
  }
  func.func @transform_5(%arg0: i32, %arg1: i32) -> (i32, i32) {
    %c0_i32 = arith.constant 0 : i32
    %c0_i32_0 = arith.constant 0 : i32
    return %arg0, %c0_i32 : i32, i32
  }
}

module attributes {stable_mosaic.version = 11 : i64} {
  func.func @kernel(%arg0: i32, %arg1: i32, %arg2: memref<256x256xbf16, #tpu.memory_space<vmem>>, %arg3: memref<512x128xbf16, #tpu.memory_space<vmem>>, %arg4: memref<128x128xbf16, #tpu.memory_space<vmem>>, %arg5: memref<256x128xf32, #tpu.memory_space<vmem>>, %arg6: memref<256x128xbf16, #tpu.memory_space<vmem>>, %arg7: memref<256x128xf32, #tpu.memory_space<vmem>>, %arg8: memref<256x128xf32, #tpu.memory_space<vmem>>) attributes {dimension_semantics = [#tpu.dimension_semantics<parallel>, #tpu.dimension_semantics<arbitrary>], iteration_bounds = array<i64: 1, 2>, scalar_prefetch = 0 : i64, scratch_operands = 1 : i64, tpu.core_type = #tpu.core_type<tc>, window_params = [{transform_indices = @transform_0, window_bounds = array<i64: 256, 256>}, {pipeline_mode = #tpu.pipeline_mode<synchronous>, transform_indices = @transform_1, window_bounds = array<i64: 512, 128>}, {pipeline_mode = #tpu.pipeline_mode<synchronous>, transform_indices = @transform_2, window_bounds = array<i64: 128, 128>}, {transform_indices = @transform_3, window_bounds = array<i64: 256, 128>}, {transform_indices = @transform_4, window_bounds = array<i64: 256, 128>}, {transform_indices = @transform_5, window_bounds = array<i64: 256, 128>}]} {
    %c0_i32 = arith.constant 0 : i32
    %0 = arith.cmpi eq, %arg1, %c0_i32 : i32
    %1 = arith.extui %0 : i1 to i32
    %c0_i32_0 = arith.constant 0 : i32
    %2 = arith.cmpi ne, %1, %c0_i32_0 : i32
    scf.if %2 {
      %cst_8 = arith.constant 0.000000e+00 : f32
      %15 = vector.broadcast %cst_8 : f32 to vector<256x128xf32>
      %c0_9 = arith.constant 0 : index
      %c0_10 = arith.constant 0 : index
      %16 = vector.load %arg8[%c0_9, %c0_10] : memref<256x128xf32, #tpu.memory_space<vmem>>, vector<256x128xf32>
      tpu.vector_store %arg8[%c0_9, %c0_10], %15 {strides = array<i32>} : memref<256x128xf32, #tpu.memory_space<vmem>>, vector<256x128xf32>,
    } else {
    }
    %c256_i32 = arith.constant 256 : i32
    %3 = arith.muli %arg1, %c256_i32 : i32
    %4 = tpu.assume_multiple %3, 256 : i32
    %5 = arith.index_cast %4 : i32 to index
    %c0 = arith.constant 0 : index
    %6 = vector.load %arg3[%5, %c0] : memref<512x128xbf16, #tpu.memory_space<vmem>>, vector<256x128xbf16>
    %c0_1 = arith.constant 0 : index
    %c0_2 = arith.constant 0 : index
    %7 = vector.load %arg8[%c0_1, %c0_2] : memref<256x128xf32, #tpu.memory_space<vmem>>, vector<256x128xf32>
    %c0_3 = arith.constant 0 : index
    %c0_4 = arith.constant 0 : index
    %8 = vector.load %arg2[%c0_3, %c0_4] : memref<256x256xbf16, #tpu.memory_space<vmem>>, vector<256x256xbf16>
    %cst = arith.constant dense<0.000000e+00> : vector<256x128xf32>
    %9 = tpu.matmul %8, %6, %cst {dimension_numbers = #tpu.dot_dimension_numbers<[1], [0], [0], [1], [0, 0, 1, 1], [], []>} : vector<256x256xbf16>, vector<256x128xbf16>, vector<256x128xf32> -> vector<256x128xf32>
    %10 = arith.addf %7, %9 : vector<256x128xf32>
    %c0_5 = arith.constant 0 : index
    %c0_6 = arith.constant 0 : index
    %11 = vector.load %arg8[%c0_5, %c0_6] : memref<256x128xf32, #tpu.memory_space<vmem>>, vector<256x128xf32>
    tpu.vector_store %arg8[%c0_5, %c0_6], %10 {strides = array<i32>} : memref<256x128xf32, #tpu.memory_space<vmem>>, vector<256x128xf32>,
    %c1_i32 = arith.constant 1 : i32
    %12 = arith.cmpi eq, %arg1, %c1_i32 : i32
    %13 = arith.extui %12 : i1 to i32
    %c0_i32_7 = arith.constant 0 : i32
    %14 = arith.cmpi ne, %13, %c0_i32_7 : i32
    scf.if %14 {
      %c0_8 = arith.constant 0 : index
      %c0_9 = arith.constant 0 : index
      %15 = vector.load %arg8[%c0_8, %c0_9] : memref<256x128xf32, #tpu.memory_space<vmem>>, vector<256x128xf32>
      %16 = arith.truncf %15 : vector<256x128xf32> to vector<256x128xbf16>
      %c0_10 = arith.constant 0 : index
      %c0_11 = arith.constant 0 : index
      %17 = vector.load %arg4[%c0_10, %c0_11] : memref<128x128xbf16, #tpu.memory_space<vmem>>, vector<128x128xbf16>
      %cst_12 = arith.constant dense<0.000000e+00> : vector<256x128xf32>
      %18 = tpu.matmul %16, %17, %cst_12 {dimension_numbers = #tpu.dot_dimension_numbers<[1], [0], [0], [1], [0, 0, 1, 1], [], []>} : vector<256x128xbf16>, vector<128x128xbf16>, vector<256x128xf32> -> vector<256x128xf32>
      %cst_13 = arith.constant 0.000000e+00 : f32
      %19 = vector.broadcast %cst_13 : f32 to vector<256x128xf32>
      %20 = arith.maximumf %18, %19 : vector<256x128xf32>
      %21 = arith.truncf %20 : vector<256x128xf32> to vector<256x128xbf16>
      %c0_14 = arith.constant 0 : index
      %c0_15 = arith.constant 0 : index
      %22 = vector.load %arg6[%c0_14, %c0_15] : memref<256x128xbf16, #tpu.memory_space<vmem>>, vector<256x128xbf16>
      tpu.vector_store %arg6[%c0_14, %c0_15], %21 {strides = array<i32>} : memref<256x128xbf16, #tpu.memory_space<vmem>>, vector<256x128xbf16>,
      %c0_16 = arith.constant 0 : index
      %c0_17 = arith.constant 0 : index
      %23 = vector.load %arg5[%c0_16, %c0_17] : memref<256x128xf32, #tpu.memory_space<vmem>>, vector<256x128xf32>
      %24 = arith.addf %23, %20 : vector<256x128xf32>
      %c0_18 = arith.constant 0 : index
      %c0_19 = arith.constant 0 : index
      %25 = vector.load %arg7[%c0_18, %c0_19] : memref<256x128xf32, #tpu.memory_space<vmem>>, vector<256x128xf32>
      tpu.vector_store %arg7[%c0_18, %c0_19], %24 {strides = array<i32>} : memref<256x128xf32, #tpu.memory_space<vmem>>, vector<256x128xf32>,
    } else {
    }
    return
  }
  func.func @transform_0(%arg0: i32, %arg1: i32) -> (i32, i32) {
    %c0_i32 = arith.constant 0 : i32
    return %arg0, %arg1 : i32, i32
  }
  func.func @transform_1(%arg0: i32, %arg1: i32) -> (i32, i32) {
    %c0_i32 = arith.constant 0 : i32
    %c0_i32_0 = arith.constant 0 : i32
    %c0_i32_1 = arith.constant 0 : i32
    return %c0_i32, %c0_i32_0 : i32, i32
  }
  func.func @transform_2(%arg0: i32, %arg1: i32) -> (i32, i32) {
    %c0_i32 = arith.constant 0 : i32
    %c0_i32_0 = arith.constant 0 : i32
    %c0_i32_1 = arith.constant 0 : i32
    return %c0_i32, %c0_i32_0 : i32, i32
  }
  func.func @transform_3(%arg0: i32, %arg1: i32) -> (i32, i32) {
    %c0_i32 = arith.constant 0 : i32
    %c0_i32_0 = arith.constant 0 : i32
    return %arg0, %c0_i32 : i32, i32
  }
  func.func @transform_4(%arg0: i32, %arg1: i32) -> (i32, i32) {
    %c0_i32 = arith.constant 0 : i32
    %c0_i32_0 = arith.constant 0 : i32
    return %arg0, %c0_i32 : i32, i32
  }
  func.func @transform_5(%arg0: i32, %arg1: i32) -> (i32, i32) {
    %c0_i32 = arith.constant 0 : i32
    %c0_i32_0 = arith.constant 0 : i32
    return %arg0, %c0_i32 : i32, i32
  }
}

module attributes {stable_mosaic.version = 11 : i64} {
  func.func @kernel(%arg0: i32, %arg1: i32, %arg2: memref<256x256xbf16, #tpu.memory_space<vmem>>, %arg3: memref<512x128xbf16, #tpu.memory_space<vmem>>, %arg4: memref<128x128xbf16, #tpu.memory_space<vmem>>, %arg5: memref<256x128xf32, #tpu.memory_space<vmem>>, %arg6: memref<256x128xf32, #tpu.memory_space<vmem>>, %arg7: memref<256x128xf32, #tpu.memory_space<vmem>>) attributes {dimension_semantics = [#tpu.dimension_semantics<parallel>, #tpu.dimension_semantics<arbitrary>], iteration_bounds = array<i64: 1, 2>, scalar_prefetch = 0 : i64, scratch_operands = 1 : i64, tpu.core_type = #tpu.core_type<tc>, window_params = [{transform_indices = @transform_0, window_bounds = array<i64: 256, 256>}, {pipeline_mode = #tpu.pipeline_mode<synchronous>, transform_indices = @transform_1, window_bounds = array<i64: 512, 128>}, {pipeline_mode = #tpu.pipeline_mode<synchronous>, transform_indices = @transform_2, window_bounds = array<i64: 128, 128>}, {transform_indices = @transform_3, window_bounds = array<i64: 256, 128>}, {transform_indices = @transform_4, window_bounds = array<i64: 256, 128>}]} {
    %c0_i32 = arith.constant 0 : i32
    %0 = arith.cmpi eq, %arg1, %c0_i32 : i32
    %1 = arith.extui %0 : i1 to i32
    %c0_i32_0 = arith.constant 0 : i32
    %2 = arith.cmpi ne, %1, %c0_i32_0 : i32
    scf.if %2 {
      %cst_8 = arith.constant 0.000000e+00 : f32
      %15 = vector.broadcast %cst_8 : f32 to vector<256x128xf32>
      %c0_9 = arith.constant 0 : index
      %c0_10 = arith.constant 0 : index
      %16 = vector.load %arg7[%c0_9, %c0_10] : memref<256x128xf32, #tpu.memory_space<vmem>>, vector<256x128xf32>
      tpu.vector_store %arg7[%c0_9, %c0_10], %15 {strides = array<i32>} : memref<256x128xf32, #tpu.memory_space<vmem>>, vector<256x128xf32>,
    } else {
    }
    %c256_i32 = arith.constant 256 : i32
    %3 = arith.muli %arg1, %c256_i32 : i32
    %4 = tpu.assume_multiple %3, 256 : i32
    %5 = arith.index_cast %4 : i32 to index
    %c0 = arith.constant 0 : index
    %6 = vector.load %arg3[%5, %c0] : memref<512x128xbf16, #tpu.memory_space<vmem>>, vector<256x128xbf16>
    %c0_1 = arith.constant 0 : index
    %c0_2 = arith.constant 0 : index
    %7 = vector.load %arg7[%c0_1, %c0_2] : memref<256x128xf32, #tpu.memory_space<vmem>>, vector<256x128xf32>
    %c0_3 = arith.constant 0 : index
    %c0_4 = arith.constant 0 : index
    %8 = vector.load %arg2[%c0_3, %c0_4] : memref<256x256xbf16, #tpu.memory_space<vmem>>, vector<256x256xbf16>
    %cst = arith.constant dense<0.000000e+00> : vector<256x128xf32>
    %9 = tpu.matmul %8, %6, %cst {dimension_numbers = #tpu.dot_dimension_numbers<[1], [0], [0], [1], [0, 0, 1, 1], [], []>} : vector<256x256xbf16>, vector<256x128xbf16>, vector<256x128xf32> -> vector<256x128xf32>
    %10 = arith.addf %7, %9 : vector<256x128xf32>
    %c0_5 = arith.constant 0 : index
    %c0_6 = arith.constant 0 : index
    %11 = vector.load %arg7[%c0_5, %c0_6] : memref<256x128xf32, #tpu.memory_space<vmem>>, vector<256x128xf32>
    tpu.vector_store %arg7[%c0_5, %c0_6], %10 {strides = array<i32>} : memref<256x128xf32, #tpu.memory_space<vmem>>, vector<256x128xf32>,
    %c1_i32 = arith.constant 1 : i32
    %12 = arith.cmpi eq, %arg1, %c1_i32 : i32
    %13 = arith.extui %12 : i1 to i32
    %c0_i32_7 = arith.constant 0 : i32
    %14 = arith.cmpi ne, %13, %c0_i32_7 : i32
    scf.if %14 {
      %c0_8 = arith.constant 0 : index
      %c0_9 = arith.constant 0 : index
      %15 = vector.load %arg7[%c0_8, %c0_9] : memref<256x128xf32, #tpu.memory_space<vmem>>, vector<256x128xf32>
      %16 = arith.truncf %15 : vector<256x128xf32> to vector<256x128xbf16>
      %c0_10 = arith.constant 0 : index
      %c0_11 = arith.constant 0 : index
      %17 = vector.load %arg4[%c0_10, %c0_11] : memref<128x128xbf16, #tpu.memory_space<vmem>>, vector<128x128xbf16>
      %cst_12 = arith.constant dense<0.000000e+00> : vector<256x128xf32>
      %18 = tpu.matmul %16, %17, %cst_12 {dimension_numbers = #tpu.dot_dimension_numbers<[1], [0], [0], [1], [0, 0, 1, 1], [], []>} : vector<256x128xbf16>, vector<128x128xbf16>, vector<256x128xf32> -> vector<256x128xf32>
      %cst_13 = arith.constant 0.000000e+00 : f32
      %19 = vector.broadcast %cst_13 : f32 to vector<256x128xf32>
      %20 = arith.maximumf %18, %19 : vector<256x128xf32>
      %c0_14 = arith.constant 0 : index
      %c0_15 = arith.constant 0 : index
      %21 = vector.load %arg5[%c0_14, %c0_15] : memref<256x128xf32, #tpu.memory_space<vmem>>, vector<256x128xf32>
      %22 = arith.addf %21, %20 : vector<256x128xf32>
      %c0_16 = arith.constant 0 : index
      %c0_17 = arith.constant 0 : index
      %23 = vector.load %arg6[%c0_16, %c0_17] : memref<256x128xf32, #tpu.memory_space<vmem>>, vector<256x128xf32>
      tpu.vector_store %arg6[%c0_16, %c0_17], %22 {strides = array<i32>} : memref<256x128xf32, #tpu.memory_space<vmem>>, vector<256x128xf32>,
    } else {
    }
    return
  }
  func.func @transform_0(%arg0: i32, %arg1: i32) -> (i32, i32) {
    %c0_i32 = arith.constant 0 : i32
    return %arg0, %arg1 : i32, i32
  }
  func.func @transform_1(%arg0: i32, %arg1: i32) -> (i32, i32) {
    %c0_i32 = arith.constant 0 : i32
    %c0_i32_0 = arith.constant 0 : i32
    %c0_i32_1 = arith.constant 0 : i32
    return %c0_i32, %c0_i32_0 : i32, i32
  }
  func.func @transform_2(%arg0: i32, %arg1: i32) -> (i32, i32) {
    %c0_i32 = arith.constant 0 : i32
    %c0_i32_0 = arith.constant 0 : i32
    %c0_i32_1 = arith.constant 0 : i32
    return %c0_i32, %c0_i32_0 : i32, i32
  }
  func.func @transform_3(%arg0: i32, %arg1: i32) -> (i32, i32) {
    %c0_i32 = arith.constant 0 : i32
    %c0_i32_0 = arith.constant 0 : i32
    return %arg0, %c0_i32 : i32, i32
  }
  func.func @transform_4(%arg0: i32, %arg1: i32) -> (i32, i32) {
    %c0_i32 = arith.constant 0 : i32
    %c0_i32_0 = arith.constant 0 : i32
    return %arg0, %c0_i32 : i32, i32
  }
}

module attributes {stable_mosaic.version = 11 : i64} {
  func.func @kernel(%arg0: i32, %arg1: i32, %arg2: memref<256x256xbf16, #tpu.memory_space<vmem>>, %arg3: memref<256x128xbf16, #tpu.memory_space<vmem>>, %arg4: memref<128x128xbf16, #tpu.memory_space<vmem>>, %arg5: memref<256x128xf32, #tpu.memory_space<vmem>>, %arg6: memref<256x128xf32, #tpu.memory_space<vmem>>, %arg7: memref<256x128xf32, #tpu.memory_space<vmem>>) attributes {dimension_semantics = [#tpu.dimension_semantics<parallel>, #tpu.dimension_semantics<arbitrary>], iteration_bounds = array<i64: 2, 1>, scalar_prefetch = 0 : i64, scratch_operands = 1 : i64, tpu.core_type = #tpu.core_type<tc>, window_params = [{transform_indices = @transform_0, window_bounds = array<i64: 256, 256>}, {pipeline_mode = #tpu.pipeline_mode<synchronous>, transform_indices = @transform_1, window_bounds = array<i64: 256, 128>}, {pipeline_mode = #tpu.pipeline_mode<synchronous>, transform_indices = @transform_2, window_bounds = array<i64: 128, 128>}, {transform_indices = @transform_3, window_bounds = array<i64: 256, 128>}, {transform_indices = @transform_4, window_bounds = array<i64: 256, 128>}]} {
    %c0_i32 = arith.constant 0 : i32
    %0 = arith.cmpi eq, %arg1, %c0_i32 : i32
    %1 = arith.extui %0 : i1 to i32
    %c0_i32_0 = arith.constant 0 : i32
    %2 = arith.cmpi ne, %1, %c0_i32_0 : i32
    scf.if %2 {
      %cst_9 = arith.constant 0.000000e+00 : f32
      %15 = vector.broadcast %cst_9 : f32 to vector<256x128xf32>
      %c0_10 = arith.constant 0 : index
      %c0_11 = arith.constant 0 : index
      %16 = vector.load %arg7[%c0_10, %c0_11] : memref<256x128xf32, #tpu.memory_space<vmem>>, vector<256x128xf32>
      tpu.vector_store %arg7[%c0_10, %c0_11], %15 {strides = array<i32>} : memref<256x128xf32, #tpu.memory_space<vmem>>, vector<256x128xf32>,
    } else {
    }
    %c256_i32 = arith.constant 256 : i32
    %3 = arith.muli %arg1, %c256_i32 : i32
    %4 = tpu.assume_multiple %3, 256 : i32
    %5 = arith.index_cast %4 : i32 to index
    %c0 = arith.constant 0 : index
    %6 = vector.load %arg3[%5, %c0] : memref<256x128xbf16, #tpu.memory_space<vmem>>, vector<256x128xbf16>
    %c0_1 = arith.constant 0 : index
    %c0_2 = arith.constant 0 : index
    %7 = vector.load %arg7[%c0_1, %c0_2] : memref<256x128xf32, #tpu.memory_space<vmem>>, vector<256x128xf32>
    %c0_3 = arith.constant 0 : index
    %c0_4 = arith.constant 0 : index
    %8 = vector.load %arg2[%c0_3, %c0_4] : memref<256x256xbf16, #tpu.memory_space<vmem>>, vector<256x256xbf16>
    %cst = arith.constant dense<0.000000e+00> : vector<256x128xf32>
    %9 = tpu.matmul %8, %6, %cst {dimension_numbers = #tpu.dot_dimension_numbers<[1], [0], [0], [1], [0, 0, 1, 1], [], []>} : vector<256x256xbf16>, vector<256x128xbf16>, vector<256x128xf32> -> vector<256x128xf32>
    %10 = arith.addf %7, %9 : vector<256x128xf32>
    %c0_5 = arith.constant 0 : index
    %c0_6 = arith.constant 0 : index
    %11 = vector.load %arg7[%c0_5, %c0_6] : memref<256x128xf32, #tpu.memory_space<vmem>>, vector<256x128xf32>
    tpu.vector_store %arg7[%c0_5, %c0_6], %10 {strides = array<i32>} : memref<256x128xf32, #tpu.memory_space<vmem>>, vector<256x128xf32>,
    %c0_i32_7 = arith.constant 0 : i32
    %12 = arith.cmpi eq, %arg1, %c0_i32_7 : i32
    %13 = arith.extui %12 : i1 to i32
    %c0_i32_8 = arith.constant 0 : i32
    %14 = arith.cmpi ne, %13, %c0_i32_8 : i32
    scf.if %14 {
      %c0_9 = arith.constant 0 : index
      %c0_10 = arith.constant 0 : index
      %15 = vector.load %arg7[%c0_9, %c0_10] : memref<256x128xf32, #tpu.memory_space<vmem>>, vector<256x128xf32>
      %16 = arith.truncf %15 : vector<256x128xf32> to vector<256x128xbf16>
      %c0_11 = arith.constant 0 : index
      %c0_12 = arith.constant 0 : index
      %17 = vector.load %arg4[%c0_11, %c0_12] : memref<128x128xbf16, #tpu.memory_space<vmem>>, vector<128x128xbf16>
      %cst_13 = arith.constant dense<0.000000e+00> : vector<256x128xf32>
      %18 = tpu.matmul %16, %17, %cst_13 {dimension_numbers = #tpu.dot_dimension_numbers<[1], [0], [0], [1], [0, 0, 1, 1], [], []>} : vector<256x128xbf16>, vector<128x128xbf16>, vector<256x128xf32> -> vector<256x128xf32>
      %cst_14 = arith.constant 0.000000e+00 : f32
      %19 = vector.broadcast %cst_14 : f32 to vector<256x128xf32>
      %20 = arith.maximumf %18, %19 : vector<256x128xf32>
      %c0_15 = arith.constant 0 : index
      %c0_16 = arith.constant 0 : index
      %21 = vector.load %arg5[%c0_15, %c0_16] : memref<256x128xf32, #tpu.memory_space<vmem>>, vector<256x128xf32>
      %22 = arith.addf %21, %20 : vector<256x128xf32>
      %c0_17 = arith.constant 0 : index
      %c0_18 = arith.constant 0 : index
      %23 = vector.load %arg6[%c0_17, %c0_18] : memref<256x128xf32, #tpu.memory_space<vmem>>, vector<256x128xf32>
      tpu.vector_store %arg6[%c0_17, %c0_18], %22 {strides = array<i32>} : memref<256x128xf32, #tpu.memory_space<vmem>>, vector<256x128xf32>,
    } else {
    }
    return
  }
  func.func @transform_0(%arg0: i32, %arg1: i32) -> (i32, i32) {
    %c0_i32 = arith.constant 0 : i32
    return %arg0, %arg1 : i32, i32
  }
  func.func @transform_1(%arg0: i32, %arg1: i32) -> (i32, i32) {
    %c0_i32 = arith.constant 0 : i32
    %c0_i32_0 = arith.constant 0 : i32
    %c0_i32_1 = arith.constant 0 : i32
    return %c0_i32, %c0_i32_0 : i32, i32
  }
  func.func @transform_2(%arg0: i32, %arg1: i32) -> (i32, i32) {
    %c0_i32 = arith.constant 0 : i32
    %c0_i32_0 = arith.constant 0 : i32
    %c0_i32_1 = arith.constant 0 : i32
    return %c0_i32, %c0_i32_0 : i32, i32
  }
  func.func @transform_3(%arg0: i32, %arg1: i32) -> (i32, i32) {
    %c0_i32 = arith.constant 0 : i32
    %c0_i32_0 = arith.constant 0 : i32
    return %arg0, %c0_i32 : i32, i32
  }
  func.func @transform_4(%arg0: i32, %arg1: i32) -> (i32, i32) {
    %c0_i32 = arith.constant 0 : i32
    %c0_i32_0 = arith.constant 0 : i32
    return %arg0, %c0_i32 : i32, i32
  }
}

</mosaic_0001>

<bundles_post_ra>
// kernel: ngcf_forward_padded.5
= control target key start
LH: loop header
LB: loop body
LE: loop exit
PB: predicated region body
PF: predicated region fallthrough
CT: control target
= control target key end

     0   :  { %s1939_s18 = smov 0   ;;  %s1941_s19 = smov 0   ;;  %s2307_s0 = inlined_call_operand.vmem [shape: bf16[512,256], index: 0, kind: input, shape index: {}]   ;;  %s2308_s1 = inlined_call_operand.vmem [shape: bf16[256,128], index: 1, kind: input, shape index: {}]   ;;  %s2309_s2 = inlined_call_operand.vmem [shape: bf16[128,128], index: 2, kind: input, shape index: {}]   ;;  %s2310_s3 = inlined_call_operand.vmem [shape: f32[512,128], index: 3, kind: input, shape index: {}, may-alias: {3,5}]   ;;  %s2311_s4 = inlined_call_operand.vmem [shape: bf16[512,128], index: 4, kind: output, shape index: {0}]   ;;  %s2312_s5 = inlined_call_operand.vmem [shape: f32[512,128], index: 5, kind: output, shape index: {1}, may-alias: {3,5}]  }
   0x1   :  { %s1943_s20 = smov 0  }
   0x2 LB: > { %s28_s21 = sadd.s32 1, %s1903_s19  ;;  %p1449_p0 = scmp.ge.s32.totalorder %s1907_s20, 1  ;;  %s1907_s20 = sphi %s1943_s20, %s16_s20   ;;  %s1903_s19 = sphi %s1941_s19, %s2314_s19   ;;  %s1899_s18 = sphi %s1939_s18, %s2313_s18  }
   0x3   : > { %p30_p1 = scmp.ge.s32.totalorder %s28_s21, 2  ;;  %p222_p2 = scmp.lt.s32.totalorder %s1907_s20, 3 }
   0x5   : > { %s2316_s21 = smov (%p30_p1, %s28_s21), 0  ;;  %p223_p3 = pnand %p1449_p0, %p222_p2 }
   0x6   : > { %s1450_s9 = sshll.u32 (!%p223_p3), %s1899_s18, 5 }
   0x7   : > { %226 = sbr.rel (%p223_p3) target bundleno = 505 (0x1f9), region = 36  ;;  %p267_p4 = scmp.lt.s32.totalorder (!%p223_p3), %s1450_s9, 63 }
   0xc   : > { %v1693_v0 = vld [vmem:[%s2308_s1 + $0x38] sm:$0xff]  ;;  %v1692_v2 = vld [vmem:[%s2308_s1 + $0x30] sm:$0xff]  ;;  %v1691_v4 = vld [vmem:[%s2308_s1 + $0x28] sm:$0xff]  ;;  %s2318_s9 = smov (!%p267_p4, %s1450_s9), 63 }
   0xd   : > { %v1701_v1 = vld [vmem:[%s2308_s1 + $0x78] sm:$0xff]  ;;  %688 = vmatpush.bf16.msra.mxu0 %v1693_v0  ;;  %1837 = vmatpush.bf16.msra.mxu3 %v1693_v0  ;;  %v1700_v3 = vld [vmem:[%s2308_s1 + $0x70] sm:$0xff]  ;;  %v1699_v5 = vld [vmem:[%s2308_s1 + $0x68] sm:$0xff]  ;;  %s1999_s25 = sshll.u32 %s2318_s9, 3  ;;  %s1456_s15 = sshll.u32 %s2318_s9, 2 }
   0xe   : > { %777 = vmatpush.bf16.msra.mxu1 %v1701_v1  ;;  %v1690_v6 = vld [vmem:[%s2308_s1 + $0x20] sm:$0xff]  ;;  %v1689_v8 = vld [vmem:[%s2308_s1 + $0x18] sm:$0xff]  ;;  %v1688_v10 = vld [vmem:[%s2308_s1 + $0x10] sm:$0xff]  ;;  %s2008_s30 = scalar_lea.vmem %s2307_s0, %s1999_s25  ;;  %s2120_s11 = scalar_lea.vmem %s2310_s3, %s1999_s25 }
   0xf   : > { %v1698_v7 = vld [vmem:[%s2308_s1 + $0x60] sm:$0xff]  ;;  %v1697_v9 = vld [vmem:[%s2308_s1 + $0x58] sm:$0xff]  ;;  %v1696_v11 = vld [vmem:[%s2308_s1 + $0x50] sm:$0xff]  ;;  %s2205_s14 = scalar_lea.vmem %s2312_s5, %s1999_s25  ;;  %s2221_s17 = scalar_lea.vmem %s2311_s4, %s1456_s15 }
  0x10   : > { %v1687_v12 = vld [vmem:[%s2308_s1 + $0x8] sm:$0xff]  ;;  %v1686_v14 = vld [vmem:[%s2308_s1] sm:$0xff]  ;;  %v1469_v25 = vld [vmem:[%s2008_s30 + $0x10] sm:$0xf] }
  0x11   : > { %689 = vmatpush.bf16.msra.mxu0 %v1692_v2  ;;  %1838 = vmatpush.bf16.msra.mxu3 %v1692_v2  ;;  %v1695_v13 = vld [vmem:[%s2308_s1 + $0x48] sm:$0xff]  ;;  %v1461_v15 = vld [vmem:[%s2008_s30] sm:$0xf]  ;;  %v1702_v20 = vld [vmem:[%s2008_s30 + $0x4] sm:$0xf] }
  0x12   : > { %778 = vmatpush.bf16.msra.mxu1 %v1700_v3  ;;  %v1703_v16 = vld [vmem:[%s2008_s30 + $0x4] sm:$0xf0]  ;;  %v1557_v17 = vld [vmem:[%s2008_s30 + $0xc0] sm:$0xf]  ;;  %v1463_v21 = vld [vmem:[%s2008_s30 + $0x8] sm:$0xf0] }
  0x13   : > { %v1727_v18 = vld [vmem:[%s2008_s30 + $0xc4] sm:$0xf0]  ;;  %v1694_v19 = vld [vmem:[%s2308_s1 + $0x40] sm:$0xff]  ;;  %v1462_v22 = vor.u32 %v1703_v16, %v1461_v15  ;;  %v1466_v24 = vor.u32 %v1702_v20, %v1463_v21  ;;  %v1705_v26 = vld [vmem:[%s2008_s30 + $0x14] sm:$0xf0] }
  0x14   : > { %v1558_v23 = vor.u32 %v1727_v18, %v1557_v17  ;;  %v1565_v27 = vld [vmem:[%s2008_s30 + $0xd0] sm:$0xf]  ;;  %v1729_v28 = vld [vmem:[%s2008_s30 + $0xd4] sm:$0xf0]  ;;  %v1704_v29 = vld [vmem:[%s2008_s30 + $0x14] sm:$0xf]  ;;  %v1470_v31 = vor.u32 %v1705_v26, %v1469_v25 }
  0x15   : > { %690 = vmatpush.bf16.msra.mxu0 %v1691_v4  ;;  %1839 = vmatpush.bf16.msra.mxu3 %v1691_v4  ;;  %v1471_v30 = vld [vmem:[%s2008_s30 + $0x18] sm:$0xf0]  ;;  %v1566_v32 = vor.u32 %v1729_v28, %v1565_v27  ;;  %v1477_v34 = vld [vmem:[%s2008_s30 + $0x20] sm:$0xf]  ;;  %v1707_v35 = vld [vmem:[%s2008_s30 + $0x24] sm:$0xf0] }
  0x16   : > { %779 = vmatpush.bf16.msra.mxu1 %v1699_v5  ;;  %v1474_v33 = vor.u32 %v1704_v29, %v1471_v30  ;;  %v1573_v36 = vld [vmem:[%s2008_s30 + $0xe0] sm:$0xf]  ;;  %v1731_v37 = vld [vmem:[%s2008_s30 + $0xe4] sm:$0xf0]  ;;  %v1706_v38 = vld [vmem:[%s2008_s30 + $0x24] sm:$0xf]  ;;  %v1478_v40 = vor.u32 %v1707_v35, %v1477_v34 }
  0x17   : > { %v1479_v39 = vld [vmem:[%s2008_s30 + $0x28] sm:$0xf0]  ;;  %v1574_v41 = vor.u32 %v1731_v37, %v1573_v36  ;;  %v1485_v43 = vld [vmem:[%s2008_s30 + $0x30] sm:$0xf]  ;;  %v1709_v44 = vld [vmem:[%s2008_s30 + $0x34] sm:$0xf0] }
  0x18   : > { %v1482_v42 = vor.u32 %v1706_v38, %v1479_v39  ;;  %v1581_v45 = vld [vmem:[%s2008_s30 + $0xf0] sm:$0xf]  ;;  %v1733_v46 = vld [vmem:[%s2008_s30 + $0xf4] sm:$0xf0]  ;;  %v1708_v47 = vld [vmem:[%s2008_s30 + $0x34] sm:$0xf]  ;;  %v1486_v49 = vor.u32 %v1709_v44, %v1485_v43 }
  0x19   : > { %691 = vmatpush.bf16.msra.mxu0 %v1690_v6  ;;  %1840 = vmatpush.bf16.msra.mxu3 %v1690_v6  ;;  %v1487_v48 = vld [vmem:[%s2008_s30 + $0x38] sm:$0xf0]  ;;  %v1582_v50 = vor.u32 %v1733_v46, %v1581_v45  ;;  %v1493_v52 = vld [vmem:[%s2008_s30 + $0x40] sm:$0xf]  ;;  %v1711_v53 = vld [vmem:[%s2008_s30 + $0x44] sm:$0xf0] }
  0x1a   : > { %780 = vmatpush.bf16.msra.mxu1 %v1698_v7  ;;  %v1490_v51 = vor.u32 %v1708_v47, %v1487_v48  ;;  %v1726_v54 = vld [vmem:[%s2008_s30 + $0xc4] sm:$0xf]  ;;  %v1559_v55 = vld [vmem:[%s2008_s30 + $0xc8] sm:$0xf0]  ;;  %v1494_v58 = vor.u32 %v1711_v53, %v1493_v52  ;;  %v1741_v61 = vld [vmem:[%s2309_s2 + $0x38] sm:$0xff] }
  0x1b   : > { %v1710_v56 = vld [vmem:[%s2008_s30 + $0x44] sm:$0xf]  ;;  %v1495_v57 = vld [vmem:[%s2008_s30 + $0x48] sm:$0xf0]  ;;  %v1562_v59 = vor.u32 %v1726_v54, %v1559_v55  ;;  %1045 = vmatpush.bf16.msra.mxu2 %v1741_v61  ;;  %v1740_v62 = vld [vmem:[%s2309_s2 + $0x30] sm:$0xff] }
  0x1c   : > { %v1498_v60 = vor.u32 %v1710_v56, %v1495_v57  ;;  %v1501_v63 = vld [vmem:[%s2008_s30 + $0x50] sm:$0xf]  ;;  %v1713_v0 = vld [vmem:[%s2008_s30 + $0x54] sm:$0xf0]  ;;  %v1567_v2 = vld [vmem:[%s2008_s30 + $0xd8] sm:$0xf0] }
  0x1d   : > { %692 = vmatpush.bf16.msra.mxu0 %v1689_v8  ;;  %1841 = vmatpush.bf16.msra.mxu3 %v1689_v8  ;;  %v1503_v4 = vld [vmem:[%s2008_s30 + $0x58] sm:$0xf0]  ;;  %v1739_v8 = vld [vmem:[%s2309_s2 + $0x28] sm:$0xff]  ;;  %v1714_v15 = vld [vmem:[%s2008_s30 + $0x64] sm:$0xf] }
  0x1e   : > { %781 = vmatpush.bf16.msra.mxu1 %v1697_v9  ;;  %v1511_v16 = vld [vmem:[%s2008_s30 + $0x68] sm:$0xf0]  ;;  %v1736_v20 = vld [vmem:[%s2309_s2 + $0x10] sm:$0xff]  ;;  %v1583_v26 = vld [vmem:[%s2008_s30 + $0xf8] sm:$0xf0] }
  0x1f   : > { %1046 = vmatpush.bf16.msra.mxu2 %v1740_v62  ;;  %v1735_v21 = vld [vmem:[%s2309_s2 + $0x8] sm:$0xff]  ;;  %v1732_v25 = vld [vmem:[%s2008_s30 + $0xf4] sm:$0xf]  ;;  %v1519_v28 = vld [vmem:[%s2008_s30 + $0x78] sm:$0xf0] }
  0x20   : > { %v1716_v27 = vld [vmem:[%s2008_s30 + $0x74] sm:$0xf]  ;;  %v1586_v30 = vor.u32 %v1732_v25, %v1583_v26  ;;  %v1718_v34 = vld [vmem:[%s2008_s30 + $0x84] sm:$0xf]  ;;  %v1527_v35 = vld [vmem:[%s2008_s30 + $0x88] sm:$0xf0] }
  0x21   : > { %693 = vmatpush.bf16.msra.mxu0 %v1688_v10  ;;  %1842 = vmatpush.bf16.msra.mxu3 %v1688_v10  ;;  %v1737_v10 = vld [vmem:[%s2309_s2 + $0x18] sm:$0xff]  ;;  %v1530_v38 = vor.u32 %v1718_v34, %v1527_v35  ;;  %v1533_v46 = vld [vmem:[%s2008_s30 + $0x90] sm:$0xf]  ;;  %v1720_v48 = vld [vmem:[%s2008_s30 + $0x94] sm:$0xf] }
  0x22   : > { %782 = vmatpush.bf16.msra.mxu1 %v1696_v11  ;;  %v1721_v47 = vld [vmem:[%s2008_s30 + $0x94] sm:$0xf0] }
  0x23   : > { %1047 = vmatpush.bf16.msra.mxu2 %v1739_v8 }
  0x25   : > { %694 = vmatpush.bf16.msra.mxu0 %v1687_v12  ;;  %1843 = vmatpush.bf16.msra.mxu3 %v1687_v12  ;;  %v1715_v12 = vld [vmem:[%s2008_s30 + $0x64] sm:$0xf0] }
  0x26   : > { %783 = vmatpush.bf16.msra.mxu1 %v1695_v13 }
  0x29   : > { %695 = vmatpush.bf16.msra.mxu0 %v1686_v14  ;;  %1844 = vmatpush.bf16.msra.mxu3 %v1686_v14  ;;  %v1575_v14 = vld [vmem:[%s2008_s30 + $0xe8] sm:$0xf0] }
  0x2a   : > { %784 = vmatpush.bf16.msra.mxu1 %v1694_v19 }
  0x2c   : > { %696 = vmatmul.bf16.vlgmr.msra.gmra.mxu0 %v1462_v22  ;;  %756 = vmatmul.bf16.vlgmr.msra.gmra.mxu3 %v1558_v23  ;;  %v1734_v22 = vld [vmem:[%s2309_s2] sm:$0xff]  ;;  %v1517_v23 = vld [vmem:[%s2008_s30 + $0x70] sm:$0xf] }
  0x2d   : > { %1845 = vmatpush.bf16.msrb.mxu3 %v1701_v1  ;;  %785 = vmatmul.bf16.vlgmr.msra.gmra.mxu1 %v1466_v24  ;;  %v1728_v1 = vld [vmem:[%s2008_s30 + $0xd4] sm:$0xf]  ;;  %v1717_v24 = vld [vmem:[%s2008_s30 + $0x74] sm:$0xf0] }
  0x2e   : > { %v1570_v6 = vor.u32 %v1728_v1, %v1567_v2  ;;  %v1518_v29 = vor.u32 %v1717_v24, %v1517_v23 }
  0x31   : > { %1846 = vmatpush.bf16.msrb.mxu3 %v1700_v3  ;;  %v1712_v3 = vld [vmem:[%s2008_s30 + $0x54] sm:$0xf] }
  0x35   : > { %1847 = vmatpush.bf16.msrb.mxu3 %v1699_v5  ;;  %v1502_v5 = vor.u32 %v1713_v0, %v1501_v63  ;;  %v1722_v63 = vld [vmem:[%s2008_s30 + $0xa4] sm:$0xf]  ;;  %v1543_v0 = vld [vmem:[%s2008_s30 + $0xa8] sm:$0xf0] }
  0x39   : > { %1848 = vmatpush.bf16.msrb.mxu3 %v1698_v7  ;;  %v1506_v7 = vor.u32 %v1712_v3, %v1503_v4  ;;  %v1546_v4 = vor.u32 %v1722_v63, %v1543_v0 }
  0x3c   : > { %701 = vmatmul.bf16.gmra.mxu0 %v1470_v31  ;;  %761 = vmatmul.bf16.gmra.mxu3 %v1566_v32  ;;  %v1522_v31 = vor.u32 %v1716_v27, %v1519_v28  ;;  %v1525_v32 = vld [vmem:[%s2008_s30 + $0x80] sm:$0xf] }
  0x3d   : > { %1849 = vmatpush.bf16.msrb.mxu3 %v1697_v9  ;;  %790 = vmatmul.bf16.gmra.mxu1 %v1474_v33  ;;  %v1738_v9 = vld [vmem:[%s2309_s2 + $0x20] sm:$0xff]  ;;  %v1719_v33 = vld [vmem:[%s2008_s30 + $0x84] sm:$0xf0] }
  0x3e   : > { %1048 = vmatpush.bf16.msra.mxu2 %v1738_v9  ;;  %v1526_v36 = vor.u32 %v1719_v33, %v1525_v32 }
  0x41   : > { %1850 = vmatpush.bf16.msrb.mxu3 %v1696_v11  ;;  %v1509_v11 = vld [vmem:[%s2008_s30 + $0x60] sm:$0xf] }
  0x42   : > { %1049 = vmatpush.bf16.msra.mxu2 %v1737_v10  ;;  %v1510_v17 = vor.u32 %v1715_v12, %v1509_v11  ;;  %v1549_v12 = vld [vmem:[%s2008_s30 + $0xb0] sm:$0xf] }
  0x45   : > { %1851 = vmatpush.bf16.msrb.mxu3 %v1695_v13  ;;  %v1730_v13 = vld [vmem:[%s2008_s30 + $0xe4] sm:$0xf] }
  0x46   : > { %v1578_v18 = vor.u32 %v1730_v13, %v1575_v14  ;;  %1050 = vmatpush.bf16.msra.mxu2 %v1736_v20  ;;  %v1725_v13 = vld [vmem:[%s2008_s30 + $0xb4] sm:$0xf0]  ;;  %v1724_v14 = vld [vmem:[%s2008_s30 + $0xb4] sm:$0xf] }
  0x49   : > { %1852 = vmatpush.bf16.msrb.mxu3 %v1694_v19  ;;  %v1514_v19 = vor.u32 %v1714_v15, %v1511_v16  ;;  %v1551_v15 = vld [vmem:[%s2008_s30 + $0xb8] sm:$0xf0] }
  0x4a   : > { %1051 = vmatpush.bf16.msra.mxu2 %v1735_v21 }
  0x4c   : > { %706 = vmatmul.bf16.gmra.mxu0 %v1478_v40  ;;  %766 = vmatmul.bf16.gmra.mxu3 %v1574_v41 }
  0x4d   : > { %795 = vmatmul.bf16.gmra.mxu1 %v1482_v42  ;;  %1853 = vmatpush.bf16.msra.mxu3 %v1741_v61  ;;  %v1541_v61 = vld [vmem:[%s2008_s30 + $0xa0] sm:$0xf] }
  0x4e   : > { %1052 = vmatpush.bf16.msra.mxu2 %v1734_v22 }
  0x51   : > { %1854 = vmatpush.bf16.msra.mxu3 %v1740_v62  ;;  %v1723_v62 = vld [vmem:[%s2008_s30 + $0xa4] sm:$0xf0] }
  0x52   : > { %v1542_v2 = vor.u32 %v1723_v62, %v1541_v61 }
  0x55   : > { %1855 = vmatpush.bf16.msra.mxu3 %v1739_v8 }
  0x59   : > { %1856 = vmatpush.bf16.msra.mxu3 %v1738_v9 }
  0x5c   : > { %711 = vmatmul.bf16.gmra.mxu0 %v1486_v49  ;;  %771 = vmatmul.bf16.gmra.mxu3 %v1582_v50  ;;  %v1535_v49 = vld [vmem:[%s2008_s30 + $0x98] sm:$0xf0] }
  0x5d   : > { %800 = vmatmul.bf16.gmra.mxu1 %v1490_v51  ;;  %1857 = vmatpush.bf16.msra.mxu3 %v1737_v10  ;;  %v1534_v51 = vor.u32 %v1721_v47, %v1533_v46  ;;  %v1538_v53 = vor.u32 %v1720_v48, %v1535_v49 }
  0x61   : > { %1858 = vmatpush.bf16.msra.mxu3 %v1736_v20 }
  0x65   : > { %1859 = vmatpush.bf16.msra.mxu3 %v1735_v21 }
  0x69   : > { %1860 = vmatpush.bf16.msra.mxu3 %v1734_v22 }
  0x6c   : > { %716 = vmatmul.bf16.gmra.mxu0 %v1494_v58  ;;  %845 = vmatmul.bf16.vlgmr.msrb.gmra.mxu3 %v1562_v59 }
  0x6d   : > { %805 = vmatmul.bf16.gmra.mxu1 %v1498_v60 }
  0x7c   : > { %721 = vmatmul.bf16.gmra.mxu0 %v1502_v5  ;;  %850 = vmatmul.bf16.gmra.mxu3 %v1570_v6 }
  0x7d   : > { %810 = vmatmul.bf16.gmra.mxu1 %v1506_v7 }
  0x8c   : > { %726 = vmatmul.bf16.gmra.mxu0 %v1510_v17  ;;  %855 = vmatmul.bf16.gmra.mxu3 %v1578_v18  ;;  %v1550_v17 = vor.u32 %v1725_v13, %v1549_v12 }
  0x8d   : > { %815 = vmatmul.bf16.gmra.mxu1 %v1514_v19  ;;  %v1554_v19 = vor.u32 %v1724_v14, %v1551_v15 }
  0x9c   : > { %731 = vmatmul.bf16.gmra.mxu0 %v1518_v29  ;;  %860 = vmatmul.bf16.gmra.mxu3 %v1586_v30 }
  0x9d   : > { %820 = vmatmul.bf16.gmra.mxu1 %v1522_v31 }
  0xa9   : > { %v697_v37 = vpop.f32.mrf.mxu0 }
  0xaa   : > { %v786_v39 = vpop.f32.mrf.mxu1 }
  0xab   : > { %v787_v43 = vadd.f32 %v786_v39, %v697_v37 }
  0xac   : > { %736 = vmatmul.bf16.gmra.mxu0 %v1526_v36 }
  0xad   : > { %825 = vmatmul.bf16.gmra.mxu1 %v1530_v38 }
  0xaf   : > { %v2095_v40 = vpop.f32.mrf.mxu3 }
  0xb1   : > { %v699_v41 = vpop.f32.mrf.mxu0 }
  0xb2   : > { %v788_v42 = vpop.f32.mrf.mxu1 }
  0xb3   : > { %v789_v44 = vadd.f32 %v788_v42, %v699_v41 }
  0xb5   : > { %v965_v45 = vpack.c.bf16 %v789_v44, %v787_v43 }
  0xb7   : > { %1053 = vmatmul.bf16.vlgmr.msra.gmra.mxu2 %v965_v45  ;;  %v759_v50 = vpop.f32.mrf.mxu3 }
  0xb9   : > { %v702_v52 = vpop.f32.mrf.mxu0 }
  0xba   : > { %v791_v54 = vpop.f32.mrf.mxu1 }
  0xbb   : > { %v792_v58 = vadd.f32 %v791_v54, %v702_v52 }
  0xbc   : > { %741 = vmatmul.bf16.gmra.mxu0 %v1534_v51 }
  0xbd   : > { %830 = vmatmul.bf16.gmra.mxu1 %v1538_v53 }
  0xbf   : > { %v2101_v55 = vpop.f32.mrf.mxu3 }
  0xc1   : > { %v704_v56 = vpop.f32.mrf.mxu0 }
  0xc2   : > { %v793_v57 = vpop.f32.mrf.mxu1 }
  0xc3   : > { %v794_v59 = vadd.f32 %v793_v57, %v704_v56 }
  0xc5   : > { %v966_v60 = vpack.c.bf16 %v794_v59, %v792_v58 }
  0xc7   : > { %1058 = vmatmul.bf16.gmra.mxu2 %v966_v60  ;;  %v764_v1 = vpop.f32.mrf.mxu3 }
  0xc9   : > { %v707_v3 = vpop.f32.mrf.mxu0 }
  0xca   : > { %v796_v5 = vpop.f32.mrf.mxu1 }
  0xcb   : > { %v797_v9 = vadd.f32 %v796_v5, %v707_v3 }
  0xcc   : > { %746 = vmatmul.bf16.gmra.mxu0 %v1542_v2 }
  0xcd   : > { %835 = vmatmul.bf16.gmra.mxu1 %v1546_v4 }
  0xcf   : > { %v2107_v6 = vpop.f32.mrf.mxu3 }
  0xd1   : > { %v709_v7 = vpop.f32.mrf.mxu0 }
  0xd2   : > { %v798_v8 = vpop.f32.mrf.mxu1 }
  0xd3   : > { %v799_v10 = vadd.f32 %v798_v8, %v709_v7 }
  0xd5   : > { %v967_v11 = vpack.c.bf16 %v799_v10, %v797_v9 }
  0xd7   : > { %1063 = vmatmul.bf16.gmra.mxu2 %v967_v11  ;;  %v769_v16 = vpop.f32.mrf.mxu3 }
  0xd9   : > { %v712_v18 = vpop.f32.mrf.mxu0 }
  0xda   : > { %v801_v20 = vpop.f32.mrf.mxu1 }
  0xdb   : > { %v802_v24 = vadd.f32 %v801_v20, %v712_v18  ;;  %v1230_v20 = vld [vmem:[%s2120_s11] sm:$0xff] }
  0xdc   : > { %751 = vmatmul.bf16.gmra.mxu0 %v1550_v17 }
  0xdd   : > { %840 = vmatmul.bf16.gmra.mxu1 %v1554_v19 }
  0xdf   : > { %v772_v21 = vpop.f32.mrf.mxu3 }
  0xe1   : > { %v714_v22 = vpop.f32.mrf.mxu0 }
  0xe2   : > { %v803_v23 = vpop.f32.mrf.mxu1 }
  0xe3   : > { %v804_v25 = vadd.f32 %v803_v23, %v714_v22  ;;  %v1231_v23 = vld [vmem:[%s2120_s11 + $0x8] sm:$0xff] }
  0xe5   : > { %v968_v26 = vpack.c.bf16 %v804_v25, %v802_v24  ;;  %v1232_v24 = vld [vmem:[%s2120_s11 + $0x10] sm:$0xff]  ;;  %v1233_v25 = vld [vmem:[%s2120_s11 + $0x18] sm:$0xff] }
  0xe7   : > { %1068 = vmatmul.bf16.gmra.mxu2 %v968_v26  ;;  %v774_v27 = vpop.f32.mrf.mxu3  ;;  %v2127_v26 = vld [vmem:[%s2120_s11 + $0x20] sm:$0xff] }
  0xe9   : > { %v717_v28 = vpop.f32.mrf.mxu0 }
  0xea   : > { %v806_v29 = vpop.f32.mrf.mxu1 }
  0xeb   : > { %v807_v33 = vadd.f32 %v806_v29, %v717_v28  ;;  %v2133_v28 = vld [vmem:[%s2120_s11 + $0x30] sm:$0xff]  ;;  %v2136_v29 = vld [vmem:[%s2120_s11 + $0x38] sm:$0xff] }
  0xef   : > { %v846_v30 = vpop.f32.mrf.mxu3 }
  0xf0   : > { %v847_v37 = vadd.f32 %v846_v30, %v2095_v40  ;;  %v2139_v30 = vld [vmem:[%s2120_s11 + $0x40] sm:$0xff] }
  0xf1   : > { %v719_v31 = vpop.f32.mrf.mxu0 }
  0xf2   : > { %v808_v32 = vpop.f32.mrf.mxu1 }
  0xf3   : > { %v809_v34 = vadd.f32 %v808_v32, %v719_v31  ;;  %v2142_v31 = vld [vmem:[%s2120_s11 + $0xc0] sm:$0xff]  ;;  %v2145_v32 = vld [vmem:[%s2120_s11 + $0x48] sm:$0xff] }
  0xf5   : > { %v969_v35 = vpack.c.bf16 %v809_v34, %v807_v33  ;;  %v2148_v33 = vld [vmem:[%s2120_s11 + $0xc8] sm:$0xff]  ;;  %v2151_v34 = vld [vmem:[%s2120_s11 + $0x50] sm:$0xff] }
  0xf7   : > { %1073 = vmatmul.bf16.gmra.mxu2 %v969_v35  ;;  %v848_v36 = vpop.f32.mrf.mxu3  ;;  %v2154_v35 = vld [vmem:[%s2120_s11 + $0xd0] sm:$0xff] }
  0xf8   : > { %v849_v38 = vadd.f32 %v848_v36, %v759_v50  ;;  %v2157_v36 = vld [vmem:[%s2120_s11 + $0x58] sm:$0xff] }
  0xf9   : > { %v722_v39 = vpop.f32.mrf.mxu0 }
  0xfa   : > { %v977_v41 = vpack.c.bf16 %v849_v38, %v847_v37  ;;  %v811_v42 = vpop.f32.mrf.mxu1  ;;  %v2160_v37 = vld [vmem:[%s2120_s11 + $0xd8] sm:$0xff]  ;;  %v2163_v38 = vld [vmem:[%s2120_s11 + $0x60] sm:$0xff] }
  0xfb   : > { %v812_v46 = vadd.f32 %v811_v42, %v722_v39  ;;  %v2166_v39 = vld [vmem:[%s2120_s11 + $0xe0] sm:$0xff]  ;;  %v2172_v42 = vld [vmem:[%s2120_s11 + $0xe8] sm:$0xff] }
  0xfc   : > { %1113 = vmatmul.bf16.vlgmr.msra.gmra.mxu3 %v977_v41  ;;  %v2169_v41 = vld [vmem:[%s2120_s11 + $0x68] sm:$0xff] }
  0xff   : > { %v851_v43 = vpop.f32.mrf.mxu3 }
 0x100   : > { %v852_v51 = vadd.f32 %v851_v43, %v2101_v55  ;;  %v2175_v43 = vld [vmem:[%s2120_s11 + $0x70] sm:$0xff] }
 0x101   : > { %v724_v44 = vpop.f32.mrf.mxu0 }
 0x102   : > { %v813_v45 = vpop.f32.mrf.mxu1 }
 0x103   : > { %v814_v47 = vadd.f32 %v813_v45, %v724_v44  ;;  %v2178_v44 = vld [vmem:[%s2120_s11 + $0xf0] sm:$0xff]  ;;  %v2181_v45 = vld [vmem:[%s2120_s11 + $0x78] sm:$0xff] }
 0x105   : > { %v970_v48 = vpack.c.bf16 %v814_v47, %v812_v46  ;;  %v2184_v46 = vld [vmem:[%s2120_s11 + $0xf8] sm:$0xff]  ;;  %v2187_v47 = vld [vmem:[%s2120_s11 + $0x80] sm:$0xff] }
 0x107   : > { %1078 = vmatmul.bf16.gmra.mxu2 %v970_v48  ;;  %v853_v49 = vpop.f32.mrf.mxu3  ;;  %v2190_v48 = vld [vmem:[%s2120_s11 + $0x88] sm:$0xff] }
 0x108   : > { %v854_v52 = vadd.f32 %v853_v49, %v764_v1 }
 0x109   : > { %v727_v53 = vpop.f32.mrf.mxu0 }
 0x10a   : > { %v816_v54 = vpop.f32.mrf.mxu1  ;;  %v978_v56 = vpack.c.bf16 %v854_v52, %v852_v51  ;;  %v2193_v51 = vld [vmem:[%s2120_s11 + $0x90] sm:$0xff]  ;;  %v2196_v52 = vld [vmem:[%s2120_s11 + $0x98] sm:$0xff] }
 0x10b   : > { %v817_v58 = vadd.f32 %v816_v54, %v727_v53  ;;  %v2199_v53 = vld [vmem:[%s2120_s11 + $0xa0] sm:$0xff]  ;;  %v2208_v54 = vld [vmem:[%s2120_s11 + $0xa8] sm:$0xff] }
 0x10c   : > { %1118 = vmatmul.bf16.gmra.mxu3 %v978_v56  ;;  %v2211_v56 = vld [vmem:[%s2120_s11 + $0xb0] sm:$0xff] }
 0x10f   : > { %v856_v40 = vpop.f32.mrf.mxu3 }
 0x110   : > { %v857_v62 = vadd.f32 %v856_v40, %v2107_v6  ;;  %v2214_v40 = vld [vmem:[%s2120_s11 + $0xb8] sm:$0xff] }
 0x111   : > { %v729_v50 = vpop.f32.mrf.mxu0 }
 0x112   : > { %v818_v57 = vpop.f32.mrf.mxu1 }
 0x113   : > { %v819_v59 = vadd.f32 %v818_v57, %v729_v50 }
 0x115   : > { %v971_v60 = vpack.c.bf16 %v819_v59, %v817_v58 }
 0x117   : > { %1083 = vmatmul.bf16.gmra.mxu2 %v971_v60  ;;  %v858_v61 = vpop.f32.mrf.mxu3 }
 0x118   : > { %v859_v63 = vadd.f32 %v858_v61, %v769_v16 }
 0x119   : > { %v732_v0 = vpop.f32.mrf.mxu0 }
 0x11a   : > { %v821_v2 = vpop.f32.mrf.mxu1  ;;  %v979_v3 = vpack.c.bf16 %v859_v63, %v857_v62 }
 0x11b   : > { %v822_v5 = vadd.f32 %v821_v2, %v732_v0 }
 0x11c   : > { %1123 = vmatmul.bf16.gmra.mxu3 %v979_v3 }
 0x11f   : > { %v861_v55 = vpop.f32.mrf.mxu3 }
 0x120   : > { %v862_v10 = vadd.f32 %v861_v55, %v772_v21 }
 0x121   : > { %v734_v1 = vpop.f32.mrf.mxu0 }
 0x122   : > { %v823_v4 = vpop.f32.mrf.mxu1 }
 0x123   : > { %v824_v7 = vadd.f32 %v823_v4, %v734_v1 }
 0x125   : > { %v972_v8 = vpack.c.bf16 %v824_v7, %v822_v5 }
 0x127   : > { %1088 = vmatmul.bf16.gmra.mxu2 %v972_v8  ;;  %v863_v9 = vpop.f32.mrf.mxu3 }
 0x128   : > { %v864_v11 = vadd.f32 %v863_v9, %v774_v27  ;;  %v2130_v27 = vld [vmem:[%s2120_s11 + $0x28] sm:$0xff] }
 0x129   : > { %v737_v12 = vpop.f32.mrf.mxu0 }
 0x12a   : > { %v826_v13 = vpop.f32.mrf.mxu1  ;;  %v980_v14 = vpack.c.bf16 %v864_v11, %v862_v10 }
 0x12b   : > { %v827_v16 = vadd.f32 %v826_v13, %v737_v12 }
 0x12c   : > { %1128 = vmatmul.bf16.gmra.mxu3 %v980_v14 }
 0x131   : > { %v739_v6 = vpop.f32.mrf.mxu0 }
 0x132   : > { %v828_v15 = vpop.f32.mrf.mxu1 }
 0x133   : > { %v829_v17 = vadd.f32 %v828_v15, %v739_v6 }
 0x135   : > { %v973_v18 = vpack.c.bf16 %v829_v17, %v827_v16 }
 0x137   : > { %1093 = vmatmul.bf16.gmra.mxu2 %v973_v18 }
 0x139   : > { %v742_v19 = vpop.f32.mrf.mxu0 }
 0x13a   : > { %v831_v21 = vpop.f32.mrf.mxu1  ;;  %v1054_v22 = vpop.f32.mrf.mxu2 }
 0x13b   : > { %v1134_v49 = vmax.f32 %v1054_v22, 0.0  ;;  %v832_v60 = vadd.f32 %v831_v21, %v742_v19 }
 0x13d   : > { %v1262_v50 = vadd.f32 %v1230_v20, %v1134_v49 }
 0x13f   : > { %1294 = vst [vmem:[%s2205_s14] sm:$0xff] %v1262_v50 }
 0x141   : > { %v744_v57 = vpop.f32.mrf.mxu0 }
 0x142   : > { %v833_v58 = vpop.f32.mrf.mxu1  ;;  %v1056_v59 = vpop.f32.mrf.mxu2 }
 0x143   : > { %v834_v61 = vadd.f32 %v833_v58, %v744_v57  ;;  %v1135_v62 = vmax.f32 %v1056_v59, 0.0 }
 0x145   : > { %v1745_v63 = vpack.c.bf16 %v1135_v62, %v1134_v49  ;;  %v1263_v0 = vadd.f32 %v1231_v23, %v1135_v62  ;;  %v974_v2 = vpack.c.bf16 %v834_v61, %v832_v60 }
 0x147   : > { %1746 = vst [vmem:[%s2221_s17] sm:$0xff] %v1745_v63   ;;  %1098 = vmatmul.bf16.gmra.mxu2 %v974_v2 }
 0x148   : > { %1295 = vst [vmem:[%s2205_s14 + $0x8] sm:$0xff] %v1263_v0 }
 0x149   : > { %v747_v3 = vpop.f32.mrf.mxu0 }
 0x14a   : > { %v836_v55 = vpop.f32.mrf.mxu1  ;;  %v1059_v1 = vpop.f32.mrf.mxu2 }
 0x14b   : > { %v1136_v4 = vmax.f32 %v1059_v1, 0.0  ;;  %v837_v10 = vadd.f32 %v836_v55, %v747_v3 }
 0x14d   : > { %v1264_v5 = vadd.f32 %v1232_v24, %v1136_v4 }
 0x14f   : > { %1296 = vst [vmem:[%s2205_s14 + $0x10] sm:$0xff] %v1264_v5 }
 0x151   : > { %v749_v7 = vpop.f32.mrf.mxu0 }
 0x152   : > { %v838_v8 = vpop.f32.mrf.mxu1  ;;  %v1061_v9 = vpop.f32.mrf.mxu2 }
 0x153   : > { %v839_v11 = vadd.f32 %v838_v8, %v749_v7  ;;  %v1137_v12 = vmax.f32 %v1061_v9, 0.0 }
 0x155   : > { %v1750_v13 = vpack.c.bf16 %v1137_v12, %v1136_v4  ;;  %v1265_v14 = vadd.f32 %v1233_v25, %v1137_v12  ;;  %v975_v6 = vpack.c.bf16 %v839_v11, %v837_v10 }
 0x157   : > { %1822 = vst [vmem:[%s2221_s17 + $0x8] sm:$0xff] %v1750_v13   ;;  %1103 = vmatmul.bf16.gmra.mxu2 %v975_v6 }
 0x158   : > { %1297 = vst [vmem:[%s2205_s14 + $0x18] sm:$0xff] %v1265_v14 }
 0x159   : > { %v752_v15 = vpop.f32.mrf.mxu0 }
 0x15a   : > { %v841_v16 = vpop.f32.mrf.mxu1  ;;  %v1064_v17 = vpop.f32.mrf.mxu2 }
 0x15b   : > { %v1138_v18 = vmax.f32 %v1064_v17, 0.0  ;;  %v842_v23 = vadd.f32 %v841_v16, %v752_v15 }
 0x15d   : > { %v1266_v19 = vadd.f32 %v2127_v26, %v1138_v18 }
 0x15f   : > { %1298 = vst [vmem:[%s2205_s14 + $0x20] sm:$0xff] %v1266_v19 }
 0x161   : > { %v754_v20 = vpop.f32.mrf.mxu0 }
 0x162   : > { %v843_v21 = vpop.f32.mrf.mxu1  ;;  %v1066_v22 = vpop.f32.mrf.mxu2 }
 0x163   : > { %v844_v24 = vadd.f32 %v843_v21, %v754_v20  ;;  %v1139_v25 = vmax.f32 %v1066_v22, 0.0 }
 0x165   : > { %v1755_v49 = vpack.c.bf16 %v1139_v25, %v1138_v18  ;;  %v1267_v50 = vadd.f32 %v2130_v27, %v1139_v25  ;;  %v976_v57 = vpack.c.bf16 %v844_v24, %v842_v23 }
 0x167   : > { %1823 = vst [vmem:[%s2221_s17 + $0x10] sm:$0xff] %v1755_v49   ;;  %1108 = vmatmul.bf16.gmra.mxu2 %v976_v57 }
 0x168   : > { %1299 = vst [vmem:[%s2205_s14 + $0x28] sm:$0xff] %v1267_v50 }
 0x16a   : > { %v1069_v58 = vpop.f32.mrf.mxu2 }
 0x16b   : > { %v1140_v26 = vmax.f32 %v1069_v58, 0.0 }
 0x16d   : > { %v1268_v59 = vadd.f32 %v2133_v28, %v1140_v26 }
 0x16f   : > { %1300 = vst [vmem:[%s2205_s14 + $0x30] sm:$0xff] %v1268_v59 }
 0x172   : > { %v1071_v60 = vpop.f32.mrf.mxu2 }
 0x173   : > { %v1141_v61 = vmax.f32 %v1071_v60, 0.0 }
 0x175   : > { %v1760_v62 = vpack.c.bf16 %v1141_v61, %v1140_v26  ;;  %v1269_v63 = vadd.f32 %v2136_v29, %v1141_v61 }
 0x177   : > { %1824 = vst [vmem:[%s2221_s17 + $0x18] sm:$0xff] %v1760_v62  }
 0x178   : > { %1301 = vst [vmem:[%s2205_s14 + $0x38] sm:$0xff] %v1269_v63 }
 0x17a   : > { %v1074_v27 = vpop.f32.mrf.mxu2 }
 0x17b   : > { %v1142_v0 = vmax.f32 %v1074_v27, 0.0 }
 0x17d   : > { %v1270_v2 = vadd.f32 %v2139_v30, %v1142_v0 }
 0x17f   : > { %v1114_v3 = vpop.f32.mrf.mxu3  ;;  %1302 = vst [vmem:[%s2205_s14 + $0x40] sm:$0xff] %v1270_v2 }
 0x180   : > { %v1158_v55 = vmax.f32 %v1114_v3, 0.0 }
 0x182   : > { %v1286_v28 = vadd.f32 %v2142_v31, %v1158_v55  ;;  %v1076_v1 = vpop.f32.mrf.mxu2 }
 0x183   : > { %v1143_v4 = vmax.f32 %v1076_v1, 0.0 }
 0x184   : > { %1318 = vst [vmem:[%s2205_s14 + $0xc0] sm:$0xff] %v1286_v28 }
 0x185   : > { %v1765_v5 = vpack.c.bf16 %v1143_v4, %v1142_v0  ;;  %v1271_v29 = vadd.f32 %v2145_v32, %v1143_v4 }
 0x187   : > { %1825 = vst [vmem:[%s2221_s17 + $0x20] sm:$0xff] %v1765_v5   ;;  %v1116_v7 = vpop.f32.mrf.mxu3 }
 0x188   : > { %v1159_v8 = vmax.f32 %v1116_v7, 0.0  ;;  %1303 = vst [vmem:[%s2205_s14 + $0x48] sm:$0xff] %v1271_v29 }
 0x18a   : > { %v1805_v30 = vpack.c.bf16 %v1159_v8, %v1158_v55  ;;  %v1287_v9 = vadd.f32 %v2148_v33, %v1159_v8  ;;  %v1079_v10 = vpop.f32.mrf.mxu2 }
 0x18b   : > { %v1144_v11 = vmax.f32 %v1079_v10, 0.0 }
 0x18c   : > { %1833 = vst [vmem:[%s2221_s17 + $0x60] sm:$0xff] %v1805_v30  }
 0x18d   : > { %v1272_v31 = vadd.f32 %v2151_v34, %v1144_v11  ;;  %1319 = vst [vmem:[%s2205_s14 + $0xc8] sm:$0xff] %v1287_v9 }
 0x18f   : > { %v1119_v12 = vpop.f32.mrf.mxu3  ;;  %1304 = vst [vmem:[%s2205_s14 + $0x50] sm:$0xff] %v1272_v31 }
 0x190   : > { %v1160_v32 = vmax.f32 %v1119_v12, 0.0 }
 0x192   : > { %v1288_v13 = vadd.f32 %v2154_v35, %v1160_v32  ;;  %v1081_v14 = vpop.f32.mrf.mxu2 }
 0x193   : > { %v1145_v6 = vmax.f32 %v1081_v14, 0.0 }
 0x194   : > { %1320 = vst [vmem:[%s2205_s14 + $0xd0] sm:$0xff] %v1288_v13 }
 0x195   : > { %v1770_v15 = vpack.c.bf16 %v1145_v6, %v1144_v11  ;;  %v1273_v33 = vadd.f32 %v2157_v36, %v1145_v6 }
 0x197   : > { %1826 = vst [vmem:[%s2221_s17 + $0x28] sm:$0xff] %v1770_v15   ;;  %v1121_v16 = vpop.f32.mrf.mxu3 }
 0x198   : > { %v1161_v17 = vmax.f32 %v1121_v16, 0.0  ;;  %1305 = vst [vmem:[%s2205_s14 + $0x58] sm:$0xff] %v1273_v33 }
 0x19a   : > { %v1810_v34 = vpack.c.bf16 %v1161_v17, %v1160_v32  ;;  %v1289_v18 = vadd.f32 %v2160_v37, %v1161_v17  ;;  %v1084_v19 = vpop.f32.mrf.mxu2 }
 0x19b   : > { %v1146_v20 = vmax.f32 %v1084_v19, 0.0 }
 0x19c   : > { %1834 = vst [vmem:[%s2221_s17 + $0x68] sm:$0xff] %v1810_v34  }
 0x19d   : > { %v1274_v35 = vadd.f32 %v2163_v38, %v1146_v20  ;;  %1321 = vst [vmem:[%s2205_s14 + $0xd8] sm:$0xff] %v1289_v18 }
 0x19f   : > { %v1124_v21 = vpop.f32.mrf.mxu3  ;;  %1306 = vst [vmem:[%s2205_s14 + $0x60] sm:$0xff] %v1274_v35 }
 0x1a0   : > { %v1162_v36 = vmax.f32 %v1124_v21, 0.0 }
 0x1a2   : > { %v1290_v22 = vadd.f32 %v2166_v39, %v1162_v36  ;;  %v1086_v23 = vpop.f32.mrf.mxu2 }
 0x1a3   : > { %v1147_v24 = vmax.f32 %v1086_v23, 0.0 }
 0x1a4   : > { %1322 = vst [vmem:[%s2205_s14 + $0xe0] sm:$0xff] %v1290_v22 }
 0x1a5   : > { %v1775_v25 = vpack.c.bf16 %v1147_v24, %v1146_v20  ;;  %v1275_v37 = vadd.f32 %v2169_v41, %v1147_v24 }
 0x1a7   : > { %1827 = vst [vmem:[%s2221_s17 + $0x30] sm:$0xff] %v1775_v25   ;;  %v1126_v49 = vpop.f32.mrf.mxu3 }
 0x1a8   : > { %v1163_v50 = vmax.f32 %v1126_v49, 0.0  ;;  %1307 = vst [vmem:[%s2205_s14 + $0x68] sm:$0xff] %v1275_v37 }
 0x1aa   : > { %v1815_v38 = vpack.c.bf16 %v1163_v50, %v1162_v36  ;;  %v1291_v57 = vadd.f32 %v2172_v42, %v1163_v50  ;;  %v1089_v58 = vpop.f32.mrf.mxu2 }
 0x1ab   : > { %v1148_v26 = vmax.f32 %v1089_v58, 0.0 }
 0x1ac   : > { %1835 = vst [vmem:[%s2221_s17 + $0x70] sm:$0xff] %v1815_v38  }
 0x1ad   : > { %v1276_v39 = vadd.f32 %v2175_v43, %v1148_v26  ;;  %1323 = vst [vmem:[%s2205_s14 + $0xe8] sm:$0xff] %v1291_v57 }
 0x1af   : > { %v1129_v59 = vpop.f32.mrf.mxu3  ;;  %1308 = vst [vmem:[%s2205_s14 + $0x70] sm:$0xff] %v1276_v39 }
 0x1b0   : > { %v1164_v41 = vmax.f32 %v1129_v59, 0.0 }
 0x1b2   : > { %v1292_v60 = vadd.f32 %v2178_v44, %v1164_v41  ;;  %v1091_v61 = vpop.f32.mrf.mxu2 }
 0x1b3   : > { %v1149_v62 = vmax.f32 %v1091_v61, 0.0 }
 0x1b4   : > { %1324 = vst [vmem:[%s2205_s14 + $0xf0] sm:$0xff] %v1292_v60 }
 0x1b5   : > { %v1780_v63 = vpack.c.bf16 %v1149_v62, %v1148_v26  ;;  %v1277_v42 = vadd.f32 %v2181_v45, %v1149_v62 }
 0x1b7   : > { %1828 = vst [vmem:[%s2221_s17 + $0x38] sm:$0xff] %v1780_v63   ;;  %v1131_v27 = vpop.f32.mrf.mxu3 }
 0x1b8   : > { %v1165_v43 = vmax.f32 %v1131_v27, 0.0  ;;  %1309 = vst [vmem:[%s2205_s14 + $0x78] sm:$0xff] %v1277_v42 }
 0x1ba   : > { %v1820_v0 = vpack.c.bf16 %v1165_v43, %v1164_v41  ;;  %v1293_v2 = vadd.f32 %v2184_v46, %v1165_v43  ;;  %v1094_v3 = vpop.f32.mrf.mxu2 }
 0x1bb   : > { %v1150_v44 = vmax.f32 %v1094_v3, 0.0 }
 0x1bc   : > { %1836 = vst [vmem:[%s2221_s17 + $0x78] sm:$0xff] %v1820_v0  }
 0x1bd   : > { %v1278_v55 = vadd.f32 %v2187_v47, %v1150_v44  ;;  %1325 = vst [vmem:[%s2205_s14 + $0xf8] sm:$0xff] %v1293_v2 }
 0x1bf   : > { %1310 = vst [vmem:[%s2205_s14 + $0x80] sm:$0xff] %v1278_v55 }
 0x1c2   : > { %v1096_v45 = vpop.f32.mrf.mxu2 }
 0x1c3   : > { %v1151_v28 = vmax.f32 %v1096_v45, 0.0 }
 0x1c5   : > { %v1785_v1 = vpack.c.bf16 %v1151_v28, %v1150_v44  ;;  %v1279_v4 = vadd.f32 %v2190_v48, %v1151_v28 }
 0x1c7   : > { %1829 = vst [vmem:[%s2221_s17 + $0x40] sm:$0xff] %v1785_v1  }
 0x1c8   : > { %1311 = vst [vmem:[%s2205_s14 + $0x88] sm:$0xff] %v1279_v4 }
 0x1ca   : > { %v1099_v5 = vpop.f32.mrf.mxu2 }
 0x1cb   : > { %v1152_v46 = vmax.f32 %v1099_v5, 0.0 }
 0x1cd   : > { %v1280_v29 = vadd.f32 %v2193_v51, %v1152_v46 }
 0x1cf   : > { %1312 = vst [vmem:[%s2205_s14 + $0x90] sm:$0xff] %v1280_v29 }
 0x1d2   : > { %v1101_v47 = vpop.f32.mrf.mxu2 }
 0x1d3   : > { %v1153_v7 = vmax.f32 %v1101_v47, 0.0 }
 0x1d5   : > { %v1790_v8 = vpack.c.bf16 %v1153_v7, %v1152_v46  ;;  %v1281_v30 = vadd.f32 %v2196_v52, %v1153_v7 }
 0x1d7   : > { %1830 = vst [vmem:[%s2221_s17 + $0x48] sm:$0xff] %v1790_v8  }
 0x1d8   : > { %1313 = vst [vmem:[%s2205_s14 + $0x98] sm:$0xff] %v1281_v30 }
 0x1da   : > { %v1104_v9 = vpop.f32.mrf.mxu2 }
 0x1db   : > { %v1154_v48 = vmax.f32 %v1104_v9, 0.0 }
 0x1dd   : > { %v1282_v10 = vadd.f32 %v2199_v53, %v1154_v48 }
 0x1df   : > { %1314 = vst [vmem:[%s2205_s14 + $0xa0] sm:$0xff] %v1282_v10 }
 0x1e2   : > { %v1106_v11 = vpop.f32.mrf.mxu2 }
 0x1e3   : > { %v1155_v51 = vmax.f32 %v1106_v11, 0.0 }
 0x1e5   : > { %v1795_v31 = vpack.c.bf16 %v1155_v51, %v1154_v48  ;;  %v1283_v12 = vadd.f32 %v2208_v54, %v1155_v51 }
 0x1e7   : > { %1831 = vst [vmem:[%s2221_s17 + $0x50] sm:$0xff] %v1795_v31  }
 0x1e8   : > { %1315 = vst [vmem:[%s2205_s14 + $0xa8] sm:$0xff] %v1283_v12 }
 0x1ea   : > { %v1109_v32 = vpop.f32.mrf.mxu2 }
 0x1eb   : > { %v1156_v13 = vmax.f32 %v1109_v32, 0.0 }
 0x1ed   : > { %v1284_v52 = vadd.f32 %v2211_v56, %v1156_v13 }
 0x1ef   : > { %1316 = vst [vmem:[%s2205_s14 + $0xb0] sm:$0xff] %v1284_v52 }
 0x1f2   : > { %v1111_v14 = vpop.f32.mrf.mxu2 }
 0x1f3   : > { %v1157_v6 = vmax.f32 %v1111_v14, 0.0 }
 0x1f5   : > { %v1800_v15 = vpack.c.bf16 %v1157_v6, %v1156_v13  ;;  %v1285_v53 = vadd.f32 %v2214_v40, %v1157_v6 }
 0x1f7   : > { %1832 = vst [vmem:[%s2221_s17 + $0x58] sm:$0xff] %v1800_v15  }
 0x1f8   : > { %1317 = vst [vmem:[%s2205_s14 + $0xb8] sm:$0xff] %v1285_v53 }
 0x1f9 PF: > { %s16_s20 = sadd.s32 1, %s1907_s20   ;;  %s2313_s18 = smov %s1903_s19 }
 0x1fa   : > { %p13_p5 = scmp.ge.s32.totalorder %s16_s20, 4   ;;  %s2314_s19 = smov %s2316_s21 }
 0x1fc   :  { %15 = sbr.rel (!%p13_p5) target bundleno = 2 (0x2), region = 90 }

// kernel: ngcf_forward_padded.6
= control target key start
LH: loop header
LB: loop body
LE: loop exit
PB: predicated region body
PF: predicated region fallthrough
CT: control target
= control target key end

     0   :  { %s1901_s15 = smov 0   ;;  %s1903_s16 = smov 0   ;;  %s2336_s0 = inlined_call_operand.vmem [shape: bf16[256,512], index: 0, kind: input, shape index: {}]   ;;  %s2337_s1 = inlined_call_operand.vmem [shape: bf16[512,128], index: 1, kind: input, shape index: {}]   ;;  %s2338_s2 = inlined_call_operand.vmem [shape: bf16[128,128], index: 2, kind: input, shape index: {}]   ;;  %s2339_s3 = inlined_call_operand.vmem [shape: f32[256,128], index: 3, kind: input, shape index: {}, may-alias: {3,4}]   ;;  %s2340_s4 = inlined_call_operand.vmem [shape: f32[256,128], index: 4, kind: output, shape index: {}, may-alias: {3,4}]  }
   0x1   :  { %s1905_s17 = smov 0   ;;  %s1907_s18 = smov 0  }
   0x2   :  { %s1909_s19 = smov 0  }
   0x3 LB: > { %s23_s20 = sadd.s32 1, %s1869_s18  ;;  %p42_p1 = scmp.ne.s32.totalorder %s1861_s16, %s1857_s15  ;;  %s1873_s19 = sphi %s1909_s19, %s14_s19   ;;  %s1869_s18 = sphi %s1907_s18, %s2344_s18   ;;  %s1865_s17 = sphi %s1905_s17, %s2343_s17   ;;  %s1861_s16 = sphi %s1903_s16, %s2342_s16   ;;  %s1857_s15 = sphi %s1901_s15, %s2341_s15  }
   0x4   : > { %p24_p0 = scmp.ge.s32.totalorder %s23_s20, 2  ;;  %p43_p2 = scmp.eq.s32.totalorder %s1873_s19, 0 }
   0x5   : > { %s35_s22 = sadd.s32 1, %s1861_s16  ;;  %p1459_p5 = scmp.ge.s32.totalorder %s1873_s19, 2 }
   0x6   : > { %s2346_s20 = smov (%p24_p0, %s23_s20), 0  ;;  %p44_p3 = por %p43_p2, %p42_p1 }
   0x7   : > { %s31_s21 = ssub.s32 %s1869_s18, %s2346_s20  ;;  %177 = sbr.rel (%p1459_p5) target bundleno = 48 (0x30), region = 28 }
   0x8   : > { %p33_p4 = scmp.eq.s32.totalorder %s31_s21, 0 }
   0xa   : > { %s1936_s23 = scalar_select %p33_p4, %s1861_s16, %s35_s22  }
   0xc   : > { %180 = sbr.rel (!%p44_p3) target bundleno = 48 (0x30), region = 32  ;;  %s182_s24 = sand.u32 (%p44_p3), 1, %s1861_s16  }
   0xd   : > { %s1697_s25 = sshll.u32 (%p44_p3), %s1869_s18, 3  ;;  %s1460_s26 = sshll.u32 (%p44_p3), %s182_s24, 8 }
   0xe   : > { %s1944_s29 = scalar_lea.vmem (%p44_p3), %s2336_s0, %s1697_s25  ;;  %s1949_s30 = scalar_lea.vmem (%p44_p3), [#allocation3], %s1460_s26 }
   0xf   : > { %v281_v0 = vld [vmem:[%s1944_s29] sm:$0xff] (%p44_p3)  ;;  %v283_v1 = vld [vmem:[%s1944_s29 + $0x10] sm:$0xff] (%p44_p3) }
  0x10   : > { %v285_v2 = vld [vmem:[%s1944_s29 + $0x20] sm:$0xff] (%p44_p3)  ;;  %282 = vst [vmem:[%s1949_s30] sm:$0xff] (%p44_p3), %v281_v0  ;;  %v287_v3 = vld [vmem:[%s1944_s29 + $0x30] sm:$0xff] (%p44_p3) }
  0x11   : > { %284 = vst [vmem:[%s1949_s30 + $0x8] sm:$0xff] %v283_v1  ;;  %v289_v4 = vld [vmem:[%s1944_s29 + $0x40] sm:$0xff]  ;;  %v291_v5 = vld [vmem:[%s1944_s29 + $0x50] sm:$0xff] }
  0x12   : > { %286 = vst [vmem:[%s1949_s30 + $0x10] sm:$0xff] %v285_v2  ;;  %v293_v6 = vld [vmem:[%s1944_s29 + $0x60] sm:$0xff]  ;;  %v295_v7 = vld [vmem:[%s1944_s29 + $0x70] sm:$0xff] }
  0x13   : > { %288 = vst [vmem:[%s1949_s30 + $0x18] sm:$0xff] %v287_v3  ;;  %v297_v8 = vld [vmem:[%s1944_s29 + $0x80] sm:$0xff]  ;;  %v299_v9 = vld [vmem:[%s1944_s29 + $0x90] sm:$0xff] }
  0x14   : > { %290 = vst [vmem:[%s1949_s30 + $0x20] sm:$0xff] %v289_v4  ;;  %v301_v10 = vld [vmem:[%s1944_s29 + $0xa0] sm:$0xff]  ;;  %v303_v11 = vld [vmem:[%s1944_s29 + $0xb0] sm:$0xff] }
  0x15   : > { %292 = vst [vmem:[%s1949_s30 + $0x28] sm:$0xff] %v291_v5  ;;  %v305_v12 = vld [vmem:[%s1944_s29 + $0xc0] sm:$0xff]  ;;  %v307_v13 = vld [vmem:[%s1944_s29 + $0xd0] sm:$0xff] }
  0x16   : > { %294 = vst [vmem:[%s1949_s30 + $0x30] sm:$0xff] %v293_v6  ;;  %v309_v14 = vld [vmem:[%s1944_s29 + $0xe0] sm:$0xff]  ;;  %v311_v15 = vld [vmem:[%s1944_s29 + $0xf0] sm:$0xff] }
  0x17   : > { %296 = vst [vmem:[%s1949_s30 + $0x38] sm:$0xff] %v295_v7  ;;  %v313_v16 = vld [vmem:[%s1944_s29 + $0x100] sm:$0xff]  ;;  %v315_v17 = vld [vmem:[%s1944_s29 + $0x110] sm:$0xff] }
  0x18   : > { %298 = vst [vmem:[%s1949_s30 + $0x40] sm:$0xff] %v297_v8  ;;  %v317_v18 = vld [vmem:[%s1944_s29 + $0x120] sm:$0xff]  ;;  %v319_v19 = vld [vmem:[%s1944_s29 + $0x130] sm:$0xff] }
  0x19   : > { %300 = vst [vmem:[%s1949_s30 + $0x48] sm:$0xff] %v299_v9  ;;  %v321_v20 = vld [vmem:[%s1944_s29 + $0x140] sm:$0xff]  ;;  %v323_v21 = vld [vmem:[%s1944_s29 + $0x150] sm:$0xff] }
  0x1a   : > { %302 = vst [vmem:[%s1949_s30 + $0x50] sm:$0xff] %v301_v10  ;;  %v325_v22 = vld [vmem:[%s1944_s29 + $0x160] sm:$0xff]  ;;  %v327_v23 = vld [vmem:[%s1944_s29 + $0x170] sm:$0xff] }
  0x1b   : > { %304 = vst [vmem:[%s1949_s30 + $0x58] sm:$0xff] %v303_v11  ;;  %v329_v24 = vld [vmem:[%s1944_s29 + $0x180] sm:$0xff]  ;;  %v331_v25 = vld [vmem:[%s1944_s29 + $0x190] sm:$0xff] }
  0x1c   : > { %306 = vst [vmem:[%s1949_s30 + $0x60] sm:$0xff] %v305_v12  ;;  %v333_v26 = vld [vmem:[%s1944_s29 + $0x1a0] sm:$0xff]  ;;  %v335_v27 = vld [vmem:[%s1944_s29 + $0x1b0] sm:$0xff] }
  0x1d   : > { %308 = vst [vmem:[%s1949_s30 + $0x68] sm:$0xff] %v307_v13  ;;  %v337_v28 = vld [vmem:[%s1944_s29 + $0x1c0] sm:$0xff]  ;;  %v339_v29 = vld [vmem:[%s1944_s29 + $0x1d0] sm:$0xff] }
  0x1e   : > { %310 = vst [vmem:[%s1949_s30 + $0x70] sm:$0xff] %v309_v14  ;;  %v341_v30 = vld [vmem:[%s1944_s29 + $0x1e0] sm:$0xff]  ;;  %v343_v31 = vld [vmem:[%s1944_s29 + $0x1f0] sm:$0xff] }
  0x1f   : > { %312 = vst [vmem:[%s1949_s30 + $0x78] sm:$0xff] %v311_v15 }
  0x20   : > { %314 = vst [vmem:[%s1949_s30 + $0x80] sm:$0xff] %v313_v16 }
  0x21   : > { %316 = vst [vmem:[%s1949_s30 + $0x88] sm:$0xff] %v315_v17 }
  0x22   : > { %318 = vst [vmem:[%s1949_s30 + $0x90] sm:$0xff] %v317_v18 }
  0x23   : > { %320 = vst [vmem:[%s1949_s30 + $0x98] sm:$0xff] %v319_v19 }
  0x24   : > { %322 = vst [vmem:[%s1949_s30 + $0xa0] sm:$0xff] %v321_v20 }
  0x25   : > { %324 = vst [vmem:[%s1949_s30 + $0xa8] sm:$0xff] %v323_v21 }
  0x26   : > { %326 = vst [vmem:[%s1949_s30 + $0xb0] sm:$0xff] %v325_v22 }
  0x27   : > { %328 = vst [vmem:[%s1949_s30 + $0xb8] sm:$0xff] %v327_v23 }
  0x28   : > { %330 = vst [vmem:[%s1949_s30 + $0xc0] sm:$0xff] %v329_v24 }
  0x29   : > { %332 = vst [vmem:[%s1949_s30 + $0xc8] sm:$0xff] %v331_v25 }
  0x2a   : > { %334 = vst [vmem:[%s1949_s30 + $0xd0] sm:$0xff] %v333_v26 }
  0x2b   : > { %336 = vst [vmem:[%s1949_s30 + $0xd8] sm:$0xff] %v335_v27 }
  0x2c   : > { %338 = vst [vmem:[%s1949_s30 + $0xe0] sm:$0xff] %v337_v28 }
  0x2d   : > { %340 = vst [vmem:[%s1949_s30 + $0xe8] sm:$0xff] %v339_v29 }
  0x2e   : > { %342 = vst [vmem:[%s1949_s30 + $0xf0] sm:$0xff] %v341_v30 }
  0x2f   : > { %344 = vst [vmem:[%s1949_s30 + $0xf8] sm:$0xff] %v343_v31 }
  0x30 PF: > { %p1463_p6 = scmp.ge.s32.totalorder %s1873_s19, 1  ;;  %p349_p7 = scmp.lt.s32.totalorder %s1873_s19, 3 }
  0x32   : > { %p350_p8 = pnand %p1463_p6, %p349_p7 }
  0x33   : > { %s356_s5 = sand.u32 (!%p350_p8), 1, %s1857_s15   ;;  %p1465_p9 = scmp.ne.s32.totalorder (!%p350_p8), %s1865_s17, 0 }
  0x34   : > { %353 = sbr.rel (%p350_p8) target bundleno = 655 (0x28f), region = 70  ;;  %s1464_s6 = sshll.u32 (!%p350_p8), %s356_s5, 8 }
  0x35   : > { %s2015_s7 = scalar_lea.vmem (!%p350_p8), [#allocation3], %s1464_s6 }
  0x39   : > { %403 = sbr.rel (%p1465_p9) target bundleno = 95 (0x5f), region = 78 }
  0x3e   : > { %v1875_v32 = vmov 0.0  }
  0x3f   : > { %404 = vst [vmem:[#allocation2 + $0xb0] sm:$0xff] %v1875_v32 }
  0x40   : > { %405 = vst [vmem:[#allocation2] sm:$0xff] %v1875_v32 }
  0x41   : > { %406 = vst [vmem:[#allocation2 + $0xd8] sm:$0xff] %v1875_v32 }
  0x42   : > { %407 = vst [vmem:[#allocation2 + $0x18] sm:$0xff] %v1875_v32 }
  0x43   : > { %408 = vst [vmem:[#allocation2 + $0x50] sm:$0xff] %v1875_v32 }
  0x44   : > { %409 = vst [vmem:[#allocation2 + $0x68] sm:$0xff] %v1875_v32 }
  0x45   : > { %410 = vst [vmem:[#allocation2 + $0x30] sm:$0xff] %v1875_v32 }
  0x46   : > { %411 = vst [vmem:[#allocation2 + $0x48] sm:$0xff] %v1875_v32 }
  0x47   : > { %412 = vst [vmem:[#allocation2 + $0x80] sm:$0xff] %v1875_v32 }
  0x48   : > { %413 = vst [vmem:[#allocation2 + $0x88] sm:$0xff] %v1875_v32 }
  0x49   : > { %414 = vst [vmem:[#allocation2 + $0xe8] sm:$0xff] %v1875_v32 }
  0x4a   : > { %415 = vst [vmem:[#allocation2 + $0xb8] sm:$0xff] %v1875_v32 }
  0x4b   : > { %416 = vst [vmem:[#allocation2 + $0x60] sm:$0xff] %v1875_v32 }
  0x4c   : > { %417 = vst [vmem:[#allocation2 + $0xf0] sm:$0xff] %v1875_v32 }
  0x4d   : > { %418 = vst [vmem:[#allocation2 + $0x8] sm:$0xff] %v1875_v32 }
  0x4e   : > { %419 = vst [vmem:[#allocation2 + $0x78] sm:$0xff] %v1875_v32 }
  0x4f   : > { %420 = vst [vmem:[#allocation2 + $0x38] sm:$0xff] %v1875_v32 }
  0x50   : > { %421 = vst [vmem:[#allocation2 + $0x58] sm:$0xff] %v1875_v32 }
  0x51   : > { %422 = vst [vmem:[#allocation2 + $0x40] sm:$0xff] %v1875_v32 }
  0x52   : > { %423 = vst [vmem:[#allocation2 + $0xc8] sm:$0xff] %v1875_v32 }
  0x53   : > { %424 = vst [vmem:[#allocation2 + $0xe0] sm:$0xff] %v1875_v32 }
  0x54   : > { %425 = vst [vmem:[#allocation2 + $0x90] sm:$0xff] %v1875_v32 }
  0x55   : > { %426 = vst [vmem:[#allocation2 + $0x70] sm:$0xff] %v1875_v32 }
  0x56   : > { %427 = vst [vmem:[#allocation2 + $0xc0] sm:$0xff] %v1875_v32 }
  0x57   : > { %428 = vst [vmem:[#allocation2 + $0xa8] sm:$0xff] %v1875_v32 }
  0x58   : > { %429 = vst [vmem:[#allocation2 + $0xd0] sm:$0xff] %v1875_v32 }
  0x59   : > { %430 = vst [vmem:[#allocation2 + $0x10] sm:$0xff] %v1875_v32 }
  0x5a   : > { %431 = vst [vmem:[#allocation2 + $0x28] sm:$0xff] %v1875_v32 }
  0x5b   : > { %432 = vst [vmem:[#allocation2 + $0xa0] sm:$0xff] %v1875_v32 }
  0x5c   : > { %433 = vst [vmem:[#allocation2 + $0xf8] sm:$0xff] %v1875_v32 }
  0x5d   : > { %434 = vst [vmem:[#allocation2 + $0x20] sm:$0xff] %v1875_v32 }
  0x5e   : > { %435 = vst [vmem:[#allocation2 + $0x98] sm:$0xff] %v1875_v32 }
  0x5f PF: > { %s1466_s8 = sshll.u32 %s1865_s17, 8  ;;  %v1470_v47 = vld [vmem:[%s2015_s7] sm:$0xf]  ;;  %v1715_v49 = vld [vmem:[%s2015_s7 + $0x4] sm:$0xf0]  ;;  %p1660_p10 = scmp.ne.s32.totalorder %s1865_s17, 1 }
  0x60   : > { %s437_s9 = sshra.s32 %s1466_s8, 3  ;;  %v1534_v50 = vld [vmem:[%s2015_s7 + $0x80] sm:$0xf]  ;;  %v1731_v52 = vld [vmem:[%s2015_s7 + $0x84] sm:$0xf0]  ;;  %v1471_v57 = vor.u32 %v1715_v49, %v1470_v47 }
  0x61   : > { %s1467_s10 = sshll.u32 %s437_s9, 2  ;;  %v1714_v53 = vld [vmem:[%s2015_s7 + $0x4] sm:$0xf]  ;;  %v1472_v54 = vld [vmem:[%s2015_s7 + $0x8] sm:$0xf0]  ;;  %v1535_v58 = vor.u32 %v1731_v52, %v1534_v50 }
  0x62   : > { %s2022_s13 = scalar_lea.vmem %s2337_s1, %s1467_s10  ;;  %v1730_v55 = vld [vmem:[%s2015_s7 + $0x84] sm:$0xf]  ;;  %v1536_v56 = vld [vmem:[%s2015_s7 + $0x88] sm:$0xf0]  ;;  %v1475_v59 = vor.u32 %v1714_v53, %v1472_v54  ;;  %v1478_v61 = vld [vmem:[%s2015_s7 + $0x10] sm:$0xf] }
  0x63   : > { %v1705_v33 = vld [vmem:[%s2022_s13 + $0x38] sm:$0xff]  ;;  %v1704_v35 = vld [vmem:[%s2022_s13 + $0x30] sm:$0xff]  ;;  %v1703_v37 = vld [vmem:[%s2022_s13 + $0x28] sm:$0xff]  ;;  %v1539_v60 = vor.u32 %v1730_v55, %v1536_v56 }
  0x64   : > { %v1713_v34 = vld [vmem:[%s2022_s13 + $0x78] sm:$0xff]  ;;  %793 = vmatpush.bf16.msra.mxu0 %v1705_v33  ;;  %1754 = vmatpush.bf16.msra.mxu2 %v1705_v33  ;;  %v1712_v36 = vld [vmem:[%s2022_s13 + $0x70] sm:$0xff]  ;;  %v1711_v38 = vld [vmem:[%s2022_s13 + $0x68] sm:$0xff] }
  0x65   : > { %882 = vmatpush.bf16.msra.mxu1 %v1713_v34  ;;  %1762 = vmatpush.bf16.msra.mxu3 %v1713_v34  ;;  %v1702_v39 = vld [vmem:[%s2022_s13 + $0x20] sm:$0xff]  ;;  %v1701_v41 = vld [vmem:[%s2022_s13 + $0x18] sm:$0xff]  ;;  %v1700_v43 = vld [vmem:[%s2022_s13 + $0x10] sm:$0xff] }
  0x66   : > { %v1710_v40 = vld [vmem:[%s2022_s13 + $0x60] sm:$0xff]  ;;  %v1709_v42 = vld [vmem:[%s2022_s13 + $0x58] sm:$0xff]  ;;  %v1708_v44 = vld [vmem:[%s2022_s13 + $0x50] sm:$0xff] }
  0x67   : > { %v1699_v45 = vld [vmem:[%s2022_s13 + $0x8] sm:$0xff]  ;;  %v1698_v48 = vld [vmem:[%s2022_s13] sm:$0xff]  ;;  %v1717_v62 = vld [vmem:[%s2015_s7 + $0x14] sm:$0xf0] }
  0x68   : > { %794 = vmatpush.bf16.msra.mxu0 %v1704_v35  ;;  %1755 = vmatpush.bf16.msra.mxu2 %v1704_v35  ;;  %v1707_v46 = vld [vmem:[%s2022_s13 + $0x48] sm:$0xff]  ;;  %v1706_v51 = vld [vmem:[%s2022_s13 + $0x40] sm:$0xff]  ;;  %v1542_v63 = vld [vmem:[%s2015_s7 + $0x90] sm:$0xf]  ;;  %v1479_v5 = vor.u32 %v1717_v62, %v1478_v61 }
  0x69   : > { %883 = vmatpush.bf16.msra.mxu1 %v1712_v36  ;;  %1763 = vmatpush.bf16.msra.mxu3 %v1712_v36  ;;  %v1733_v0 = vld [vmem:[%s2015_s7 + $0x94] sm:$0xf0]  ;;  %v1716_v1 = vld [vmem:[%s2015_s7 + $0x14] sm:$0xf]  ;;  %v1480_v2 = vld [vmem:[%s2015_s7 + $0x18] sm:$0xf0] }
  0x6a   : > { %v1732_v3 = vld [vmem:[%s2015_s7 + $0x94] sm:$0xf]  ;;  %v1544_v4 = vld [vmem:[%s2015_s7 + $0x98] sm:$0xf0]  ;;  %v1543_v6 = vor.u32 %v1733_v0, %v1542_v63  ;;  %v1483_v7 = vor.u32 %v1716_v1, %v1480_v2  ;;  %v1486_v9 = vld [vmem:[%s2015_s7 + $0x20] sm:$0xf] }
  0x6b   : > { %v1547_v8 = vor.u32 %v1732_v3, %v1544_v4  ;;  %v1719_v10 = vld [vmem:[%s2015_s7 + $0x24] sm:$0xf0]  ;;  %v1550_v11 = vld [vmem:[%s2015_s7 + $0xa0] sm:$0xf]  ;;  %v1718_v13 = vld [vmem:[%s2015_s7 + $0x24] sm:$0xf] }
  0x6c   : > { %795 = vmatpush.bf16.msra.mxu0 %v1703_v37  ;;  %1756 = vmatpush.bf16.msra.mxu2 %v1703_v37  ;;  %v1735_v12 = vld [vmem:[%s2015_s7 + $0xa4] sm:$0xf0]  ;;  %v1488_v14 = vld [vmem:[%s2015_s7 + $0x28] sm:$0xf0]  ;;  %v1734_v15 = vld [vmem:[%s2015_s7 + $0xa4] sm:$0xf]  ;;  %v1487_v17 = vor.u32 %v1719_v10, %v1486_v9 }
  0x6d   : > { %884 = vmatpush.bf16.msra.mxu1 %v1711_v38  ;;  %1764 = vmatpush.bf16.msra.mxu3 %v1711_v38  ;;  %v1552_v16 = vld [vmem:[%s2015_s7 + $0xa8] sm:$0xf0]  ;;  %v1551_v18 = vor.u32 %v1735_v12, %v1550_v11  ;;  %v1491_v19 = vor.u32 %v1718_v13, %v1488_v14  ;;  %v1494_v21 = vld [vmem:[%s2015_s7 + $0x30] sm:$0xf]  ;;  %v1721_v22 = vld [vmem:[%s2015_s7 + $0x34] sm:$0xf0] }
  0x6e   : > { %v1555_v20 = vor.u32 %v1734_v15, %v1552_v16  ;;  %v1558_v23 = vld [vmem:[%s2015_s7 + $0xb0] sm:$0xf]  ;;  %v1737_v24 = vld [vmem:[%s2015_s7 + $0xb4] sm:$0xf0]  ;;  %v1720_v25 = vld [vmem:[%s2015_s7 + $0x34] sm:$0xf]  ;;  %v1495_v29 = vor.u32 %v1721_v22, %v1494_v21 }
  0x6f   : > { %v1496_v26 = vld [vmem:[%s2015_s7 + $0x38] sm:$0xf0]  ;;  %v1736_v27 = vld [vmem:[%s2015_s7 + $0xb4] sm:$0xf]  ;;  %v1559_v30 = vor.u32 %v1737_v24, %v1558_v23  ;;  %v1502_v33 = vld [vmem:[%s2015_s7 + $0x40] sm:$0xf] }
  0x70   : > { %796 = vmatpush.bf16.msra.mxu0 %v1702_v39  ;;  %1757 = vmatpush.bf16.msra.mxu2 %v1702_v39  ;;  %v1560_v28 = vld [vmem:[%s2015_s7 + $0xb8] sm:$0xf0]  ;;  %v1499_v31 = vor.u32 %v1720_v25, %v1496_v26  ;;  %v1723_v34 = vld [vmem:[%s2015_s7 + $0x44] sm:$0xf0]  ;;  %v1566_v35 = vld [vmem:[%s2015_s7 + $0xc0] sm:$0xf] }
  0x71   : > { %885 = vmatpush.bf16.msra.mxu1 %v1710_v40  ;;  %1765 = vmatpush.bf16.msra.mxu3 %v1710_v40  ;;  %v1563_v32 = vor.u32 %v1736_v27, %v1560_v28  ;;  %v1739_v36 = vld [vmem:[%s2015_s7 + $0xc4] sm:$0xf0]  ;;  %v1722_v37 = vld [vmem:[%s2015_s7 + $0x44] sm:$0xf]  ;;  %v1504_v38 = vld [vmem:[%s2015_s7 + $0x48] sm:$0xf0] }
  0x72   : > { %v1738_v39 = vld [vmem:[%s2015_s7 + $0xc4] sm:$0xf]  ;;  %v1568_v40 = vld [vmem:[%s2015_s7 + $0xc8] sm:$0xf0]  ;;  %v1574_v47 = vld [vmem:[%s2015_s7 + $0xd0] sm:$0xf] }
  0x73   : > { %v1724_v49 = vld [vmem:[%s2015_s7 + $0x54] sm:$0xf]  ;;  %v1512_v50 = vld [vmem:[%s2015_s7 + $0x58] sm:$0xf0]  ;;  %v1726_v61 = vld [vmem:[%s2015_s7 + $0x64] sm:$0xf] }
  0x74   : > { %797 = vmatpush.bf16.msra.mxu0 %v1701_v41  ;;  %1758 = vmatpush.bf16.msra.mxu2 %v1701_v41  ;;  %v1503_v41 = vor.u32 %v1723_v34, %v1502_v33  ;;  %v1576_v52 = vld [vmem:[%s2015_s7 + $0xd8] sm:$0xf0]  ;;  %v1515_v55 = vor.u32 %v1724_v49, %v1512_v50  ;;  %v1520_v62 = vld [vmem:[%s2015_s7 + $0x68] sm:$0xf0]  ;;  %v1742_v63 = vld [vmem:[%s2015_s7 + $0xe4] sm:$0xf] }
  0x75   : > { %886 = vmatpush.bf16.msra.mxu1 %v1709_v42  ;;  %1766 = vmatpush.bf16.msra.mxu3 %v1709_v42  ;;  %v1567_v42 = vor.u32 %v1739_v36, %v1566_v35  ;;  %v1584_v0 = vld [vmem:[%s2015_s7 + $0xe8] sm:$0xf0]  ;;  %v1523_v3 = vor.u32 %v1726_v61, %v1520_v62  ;;  %v1728_v9 = vld [vmem:[%s2015_s7 + $0x74] sm:$0xf]  ;;  %v1528_v10 = vld [vmem:[%s2015_s7 + $0x78] sm:$0xf0] }
  0x76   : > { %v1587_v4 = vor.u32 %v1742_v63, %v1584_v0  ;;  %v1744_v11 = vld [vmem:[%s2015_s7 + $0xf4] sm:$0xf]  ;;  %v1592_v12 = vld [vmem:[%s2015_s7 + $0xf8] sm:$0xf0]  ;;  %v1531_v15 = vor.u32 %v1728_v9, %v1528_v10  ;;  %v474_v27 = vld [vmem:[#allocation2] sm:$0xff] }
  0x77   : > { %v1595_v16 = vor.u32 %v1744_v11, %v1592_v12  ;;  %v489_v23 = vld [vmem:[#allocation2 + $0x38] sm:$0xff]  ;;  %v493_v63 = vld [vmem:[#allocation2 + $0xe0] sm:$0xff]  ;;  %v494_v9 = vld [vmem:[#allocation2 + $0x90] sm:$0xff] }
  0x78   : > { %798 = vmatpush.bf16.msra.mxu0 %v1700_v43  ;;  %1759 = vmatpush.bf16.msra.mxu2 %v1700_v43  ;;  %v1507_v43 = vor.u32 %v1722_v37, %v1504_v38  ;;  %v490_v33 = vld [vmem:[#allocation2 + $0x58] sm:$0xff] }
  0x79   : > { %887 = vmatpush.bf16.msra.mxu1 %v1708_v44  ;;  %1767 = vmatpush.bf16.msra.mxu3 %v1708_v44  ;;  %v1571_v44 = vor.u32 %v1738_v39, %v1568_v40  ;;  %v475_v37 = vld [vmem:[#allocation2 + $0xd8] sm:$0xff] }
  0x7c   : > { %799 = vmatpush.bf16.msra.mxu0 %v1699_v45  ;;  %1760 = vmatpush.bf16.msra.mxu2 %v1699_v45  ;;  %v1510_v45 = vld [vmem:[%s2015_s7 + $0x50] sm:$0xf] }
  0x7d   : > { %888 = vmatpush.bf16.msra.mxu1 %v1707_v46  ;;  %1768 = vmatpush.bf16.msra.mxu3 %v1707_v46  ;;  %v1725_v46 = vld [vmem:[%s2015_s7 + $0x54] sm:$0xf0] }
  0x7e   : > { %v1511_v53 = vor.u32 %v1725_v46, %v1510_v45 }
  0x80   : > { %800 = vmatpush.bf16.msra.mxu0 %v1698_v48  ;;  %1761 = vmatpush.bf16.msra.mxu2 %v1698_v48  ;;  %v1741_v48 = vld [vmem:[%s2015_s7 + $0xd4] sm:$0xf0] }
  0x81   : > { %889 = vmatpush.bf16.msra.mxu1 %v1706_v51  ;;  %1769 = vmatpush.bf16.msra.mxu3 %v1706_v51  ;;  %v1740_v51 = vld [vmem:[%s2015_s7 + $0xd4] sm:$0xf]  ;;  %v1575_v54 = vor.u32 %v1741_v48, %v1574_v47  ;;  %v476_v47 = vld [vmem:[#allocation2 + $0x18] sm:$0xff] }
  0x82   : > { %v1579_v56 = vor.u32 %v1740_v51, %v1576_v52 }
  0x83   : > { %801 = vmatmul.bf16.vlgmr.msra.gmra.mxu0 %v1471_v57  ;;  %841 = vmatmul.bf16.vlgmr.msra.gmra.mxu2 %v1535_v58  ;;  %v1518_v57 = vld [vmem:[%s2015_s7 + $0x60] sm:$0xf]  ;;  %v1727_v58 = vld [vmem:[%s2015_s7 + $0x64] sm:$0xf0] }
  0x84   : > { %890 = vmatmul.bf16.vlgmr.msra.gmra.mxu1 %v1475_v59  ;;  %930 = vmatmul.bf16.vlgmr.msra.gmra.mxu3 %v1539_v60  ;;  %v1582_v59 = vld [vmem:[%s2015_s7 + $0xe0] sm:$0xf]  ;;  %v1743_v60 = vld [vmem:[%s2015_s7 + $0xe4] sm:$0xf0]  ;;  %v1519_v1 = vor.u32 %v1727_v58, %v1518_v57  ;;  %v477_v57 = vld [vmem:[#allocation2 + $0x50] sm:$0xff] }
  0x85   : > { %v1583_v2 = vor.u32 %v1743_v60, %v1582_v59 }
  0x93   : > { %806 = vmatmul.bf16.gmra.mxu0 %v1479_v5  ;;  %846 = vmatmul.bf16.gmra.mxu2 %v1543_v6  ;;  %v1526_v5 = vld [vmem:[%s2015_s7 + $0x70] sm:$0xf]  ;;  %v1729_v6 = vld [vmem:[%s2015_s7 + $0x74] sm:$0xf0] }
  0x94   : > { %895 = vmatmul.bf16.gmra.mxu1 %v1483_v7  ;;  %935 = vmatmul.bf16.gmra.mxu3 %v1547_v8  ;;  %v1590_v7 = vld [vmem:[%s2015_s7 + $0xf0] sm:$0xf]  ;;  %v1745_v8 = vld [vmem:[%s2015_s7 + $0xf4] sm:$0xf0]  ;;  %v1527_v13 = vor.u32 %v1729_v6, %v1526_v5 }
  0x95   : > { %v1591_v14 = vor.u32 %v1745_v8, %v1590_v7 }
  0xa3   : > { %811 = vmatmul.bf16.gmra.mxu0 %v1487_v17  ;;  %851 = vmatmul.bf16.gmra.mxu2 %v1551_v18  ;;  %v473_v18 = vld [vmem:[#allocation2 + $0xb0] sm:$0xff] }
  0xa4   : > { %900 = vmatmul.bf16.gmra.mxu1 %v1491_v19  ;;  %940 = vmatmul.bf16.gmra.mxu3 %v1555_v20 }
  0xb3   : > { %816 = vmatmul.bf16.gmra.mxu0 %v1495_v29  ;;  %856 = vmatmul.bf16.gmra.mxu2 %v1559_v30 }
  0xb4   : > { %905 = vmatmul.bf16.gmra.mxu1 %v1499_v31  ;;  %945 = vmatmul.bf16.gmra.mxu3 %v1563_v32 }
  0xc3   : > { %821 = vmatmul.bf16.gmra.mxu0 %v1503_v41  ;;  %861 = vmatmul.bf16.gmra.mxu2 %v1567_v42 }
  0xc4   : > { %910 = vmatmul.bf16.gmra.mxu1 %v1507_v43  ;;  %950 = vmatmul.bf16.gmra.mxu3 %v1571_v44  ;;  %v491_v43 = vld [vmem:[#allocation2 + $0x40] sm:$0xff] }
  0xd3   : > { %826 = vmatmul.bf16.gmra.mxu0 %v1511_v53  ;;  %866 = vmatmul.bf16.gmra.mxu2 %v1575_v54  ;;  %v492_v53 = vld [vmem:[#allocation2 + $0xc8] sm:$0xff] }
  0xd4   : > { %915 = vmatmul.bf16.gmra.mxu1 %v1515_v55  ;;  %955 = vmatmul.bf16.gmra.mxu3 %v1579_v56 }
  0xe3   : > { %831 = vmatmul.bf16.gmra.mxu0 %v1519_v1  ;;  %871 = vmatmul.bf16.gmra.mxu2 %v1583_v2 }
  0xe4   : > { %920 = vmatmul.bf16.gmra.mxu1 %v1523_v3  ;;  %960 = vmatmul.bf16.gmra.mxu3 %v1587_v4  ;;  %v478_v3 = vld [vmem:[#allocation2 + $0x68] sm:$0xff] }
  0xf3   : > { %836 = vmatmul.bf16.gmra.mxu0 %v1527_v13  ;;  %876 = vmatmul.bf16.gmra.mxu2 %v1591_v14  ;;  %v479_v13 = vld [vmem:[#allocation2 + $0x30] sm:$0xff] }
  0xf4   : > { %925 = vmatmul.bf16.gmra.mxu1 %v1531_v15  ;;  %965 = vmatmul.bf16.gmra.mxu3 %v1595_v16 }
 0x100   : > { %v802_v17 = vpop.f32.mrf.mxu0 }
 0x101   : > { %v891_v19 = vpop.f32.mrf.mxu1 }
 0x102   : > { %v892_v20 = vadd.f32 %v891_v19, %v802_v17  ;;  %v495_v19 = vld [vmem:[#allocation2 + $0x70] sm:$0xff] }
 0x104   : > { %v971_v21 = vadd.f32 %v892_v20, %v473_v18 }
 0x106   : > { %1003 = vst [vmem:[#allocation2 + $0xb0] sm:$0xff] %v971_v21  ;;  %v842_v22 = vpop.f32.mrf.mxu2 }
 0x107   : > { %v931_v24 = vpop.f32.mrf.mxu3 }
 0x108   : > { %v932_v25 = vadd.f32 %v931_v24, %v842_v22  ;;  %v804_v26 = vpop.f32.mrf.mxu0 }
 0x109   : > { %v893_v28 = vpop.f32.mrf.mxu1 }
 0x10a   : > { %v987_v29 = vadd.f32 %v932_v25, %v489_v23  ;;  %v894_v30 = vadd.f32 %v893_v28, %v804_v26  ;;  %v480_v23 = vld [vmem:[#allocation2 + $0x48] sm:$0xff] }
 0x10c   : > { %1019 = vst [vmem:[#allocation2 + $0x38] sm:$0xff] %v987_v29  ;;  %v972_v31 = vadd.f32 %v894_v30, %v474_v27  ;;  %v496_v29 = vld [vmem:[#allocation2 + $0xc0] sm:$0xff] }
 0x10e   : > { %1004 = vst [vmem:[#allocation2] sm:$0xff] %v972_v31  ;;  %v844_v32 = vpop.f32.mrf.mxu2 }
 0x10f   : > { %v933_v34 = vpop.f32.mrf.mxu3 }
 0x110   : > { %v934_v35 = vadd.f32 %v933_v34, %v844_v32  ;;  %v807_v36 = vpop.f32.mrf.mxu0 }
 0x111   : > { %v896_v38 = vpop.f32.mrf.mxu1 }
 0x112   : > { %v988_v39 = vadd.f32 %v934_v35, %v490_v33  ;;  %v897_v40 = vadd.f32 %v896_v38, %v807_v36  ;;  %v481_v33 = vld [vmem:[#allocation2 + $0x80] sm:$0xff] }
 0x114   : > { %1020 = vst [vmem:[#allocation2 + $0x58] sm:$0xff] %v988_v39  ;;  %v973_v41 = vadd.f32 %v897_v40, %v475_v37  ;;  %v497_v39 = vld [vmem:[#allocation2 + $0xa8] sm:$0xff] }
 0x116   : > { %1005 = vst [vmem:[#allocation2 + $0xd8] sm:$0xff] %v973_v41  ;;  %v847_v42 = vpop.f32.mrf.mxu2 }
 0x117   : > { %v936_v44 = vpop.f32.mrf.mxu3 }
 0x118   : > { %v937_v45 = vadd.f32 %v936_v44, %v847_v42  ;;  %v809_v46 = vpop.f32.mrf.mxu0 }
 0x119   : > { %v898_v48 = vpop.f32.mrf.mxu1 }
 0x11a   : > { %v989_v49 = vadd.f32 %v937_v45, %v491_v43  ;;  %v899_v50 = vadd.f32 %v898_v48, %v809_v46  ;;  %v482_v43 = vld [vmem:[#allocation2 + $0x88] sm:$0xff] }
 0x11c   : > { %1021 = vst [vmem:[#allocation2 + $0x40] sm:$0xff] %v989_v49  ;;  %v974_v51 = vadd.f32 %v899_v50, %v476_v47  ;;  %v498_v49 = vld [vmem:[#allocation2 + $0xd0] sm:$0xff] }
 0x11e   : > { %1006 = vst [vmem:[#allocation2 + $0x18] sm:$0xff] %v974_v51  ;;  %v849_v52 = vpop.f32.mrf.mxu2 }
 0x11f   : > { %v938_v54 = vpop.f32.mrf.mxu3 }
 0x120   : > { %v939_v55 = vadd.f32 %v938_v54, %v849_v52  ;;  %v812_v56 = vpop.f32.mrf.mxu0 }
 0x121   : > { %v901_v58 = vpop.f32.mrf.mxu1 }
 0x122   : > { %v990_v59 = vadd.f32 %v939_v55, %v492_v53  ;;  %v902_v60 = vadd.f32 %v901_v58, %v812_v56  ;;  %v483_v53 = vld [vmem:[#allocation2 + $0xe8] sm:$0xff] }
 0x124   : > { %1022 = vst [vmem:[#allocation2 + $0xc8] sm:$0xff] %v990_v59  ;;  %v975_v61 = vadd.f32 %v902_v60, %v477_v57  ;;  %v499_v59 = vld [vmem:[#allocation2 + $0x10] sm:$0xff] }
 0x126   : > { %1007 = vst [vmem:[#allocation2 + $0x50] sm:$0xff] %v975_v61  ;;  %v852_v62 = vpop.f32.mrf.mxu2 }
 0x127   : > { %v941_v0 = vpop.f32.mrf.mxu3 }
 0x128   : > { %v942_v1 = vadd.f32 %v941_v0, %v852_v62  ;;  %v814_v2 = vpop.f32.mrf.mxu0 }
 0x129   : > { %v903_v4 = vpop.f32.mrf.mxu1 }
 0x12a   : > { %v991_v5 = vadd.f32 %v942_v1, %v493_v63  ;;  %v904_v6 = vadd.f32 %v903_v4, %v814_v2  ;;  %v484_v63 = vld [vmem:[#allocation2 + $0xb8] sm:$0xff] }
 0x12c   : > { %1023 = vst [vmem:[#allocation2 + $0xe0] sm:$0xff] %v991_v5  ;;  %v976_v7 = vadd.f32 %v904_v6, %v478_v3  ;;  %v500_v5 = vld [vmem:[#allocation2 + $0x28] sm:$0xff] }
 0x12e   : > { %1008 = vst [vmem:[#allocation2 + $0x68] sm:$0xff] %v976_v7  ;;  %v854_v8 = vpop.f32.mrf.mxu2 }
 0x12f   : > { %v943_v10 = vpop.f32.mrf.mxu3 }
 0x130   : > { %v944_v11 = vadd.f32 %v943_v10, %v854_v8  ;;  %v817_v12 = vpop.f32.mrf.mxu0 }
 0x131   : > { %v906_v14 = vpop.f32.mrf.mxu1 }
 0x132   : > { %v992_v15 = vadd.f32 %v944_v11, %v494_v9  ;;  %v907_v16 = vadd.f32 %v906_v14, %v817_v12  ;;  %v485_v9 = vld [vmem:[#allocation2 + $0x60] sm:$0xff] }
 0x134   : > { %1024 = vst [vmem:[#allocation2 + $0x90] sm:$0xff] %v992_v15  ;;  %v977_v17 = vadd.f32 %v907_v16, %v479_v13  ;;  %v501_v15 = vld [vmem:[#allocation2 + $0xa0] sm:$0xff] }
 0x136   : > { %1009 = vst [vmem:[#allocation2 + $0x30] sm:$0xff] %v977_v17  ;;  %v857_v18 = vpop.f32.mrf.mxu2 }
 0x137   : > { %v946_v20 = vpop.f32.mrf.mxu3 }
 0x138   : > { %v947_v21 = vadd.f32 %v946_v20, %v857_v18  ;;  %v819_v22 = vpop.f32.mrf.mxu0 }
 0x139   : > { %v908_v24 = vpop.f32.mrf.mxu1 }
 0x13a   : > { %v993_v25 = vadd.f32 %v947_v21, %v495_v19  ;;  %v909_v26 = vadd.f32 %v908_v24, %v819_v22  ;;  %v486_v19 = vld [vmem:[#allocation2 + $0xf0] sm:$0xff] }
 0x13c   : > { %1025 = vst [vmem:[#allocation2 + $0x70] sm:$0xff] %v993_v25  ;;  %v978_v27 = vadd.f32 %v909_v26, %v480_v23  ;;  %v502_v25 = vld [vmem:[#allocation2 + $0xf8] sm:$0xff] }
 0x13e   : > { %1010 = vst [vmem:[#allocation2 + $0x48] sm:$0xff] %v978_v27  ;;  %v859_v28 = vpop.f32.mrf.mxu2 }
 0x13f   : > { %v948_v30 = vpop.f32.mrf.mxu3 }
 0x140   : > { %v949_v31 = vadd.f32 %v948_v30, %v859_v28  ;;  %v822_v32 = vpop.f32.mrf.mxu0 }
 0x141   : > { %v911_v34 = vpop.f32.mrf.mxu1 }
 0x142   : > { %v994_v35 = vadd.f32 %v949_v31, %v496_v29  ;;  %v912_v36 = vadd.f32 %v911_v34, %v822_v32  ;;  %v487_v29 = vld [vmem:[#allocation2 + $0x8] sm:$0xff] }
 0x144   : > { %1026 = vst [vmem:[#allocation2 + $0xc0] sm:$0xff] %v994_v35  ;;  %v979_v37 = vadd.f32 %v912_v36, %v481_v33  ;;  %v503_v35 = vld [vmem:[#allocation2 + $0x20] sm:$0xff] }
 0x146   : > { %1011 = vst [vmem:[#allocation2 + $0x80] sm:$0xff] %v979_v37  ;;  %v862_v38 = vpop.f32.mrf.mxu2 }
 0x147   : > { %v951_v40 = vpop.f32.mrf.mxu3 }
 0x148   : > { %v952_v41 = vadd.f32 %v951_v40, %v862_v38  ;;  %v824_v42 = vpop.f32.mrf.mxu0 }
 0x149   : > { %v913_v44 = vpop.f32.mrf.mxu1 }
 0x14a   : > { %v995_v45 = vadd.f32 %v952_v41, %v497_v39  ;;  %v914_v46 = vadd.f32 %v913_v44, %v824_v42  ;;  %v488_v39 = vld [vmem:[#allocation2 + $0x78] sm:$0xff] }
 0x14c   : > { %1027 = vst [vmem:[#allocation2 + $0xa8] sm:$0xff] %v995_v45  ;;  %v980_v47 = vadd.f32 %v914_v46, %v482_v43  ;;  %v504_v45 = vld [vmem:[#allocation2 + $0x98] sm:$0xff] }
 0x14e   : > { %1012 = vst [vmem:[#allocation2 + $0x88] sm:$0xff] %v980_v47  ;;  %v864_v48 = vpop.f32.mrf.mxu2 }
 0x14f   : > { %v953_v50 = vpop.f32.mrf.mxu3 }
 0x150   : > { %v954_v51 = vadd.f32 %v953_v50, %v864_v48  ;;  %v827_v52 = vpop.f32.mrf.mxu0 }
 0x151   : > { %v916_v54 = vpop.f32.mrf.mxu1 }
 0x152   : > { %v996_v55 = vadd.f32 %v954_v51, %v498_v49  ;;  %v917_v56 = vadd.f32 %v916_v54, %v827_v52 }
 0x154   : > { %1028 = vst [vmem:[#allocation2 + $0xd0] sm:$0xff] %v996_v55  ;;  %v981_v57 = vadd.f32 %v917_v56, %v483_v53 }
 0x156   : > { %1013 = vst [vmem:[#allocation2 + $0xe8] sm:$0xff] %v981_v57  ;;  %v867_v58 = vpop.f32.mrf.mxu2 }
 0x157   : > { %v956_v60 = vpop.f32.mrf.mxu3 }
 0x158   : > { %v957_v61 = vadd.f32 %v956_v60, %v867_v58  ;;  %v829_v62 = vpop.f32.mrf.mxu0 }
 0x159   : > { %v918_v0 = vpop.f32.mrf.mxu1 }
 0x15a   : > { %v997_v1 = vadd.f32 %v957_v61, %v499_v59  ;;  %v919_v2 = vadd.f32 %v918_v0, %v829_v62 }
 0x15c   : > { %1029 = vst [vmem:[#allocation2 + $0x10] sm:$0xff] %v997_v1  ;;  %v982_v3 = vadd.f32 %v919_v2, %v484_v63 }
 0x15e   : > { %1014 = vst [vmem:[#allocation2 + $0xb8] sm:$0xff] %v982_v3  ;;  %v869_v4 = vpop.f32.mrf.mxu2 }
 0x15f   : > { %v958_v6 = vpop.f32.mrf.mxu3 }
 0x160   : > { %v959_v7 = vadd.f32 %v958_v6, %v869_v4  ;;  %v832_v8 = vpop.f32.mrf.mxu0 }
 0x161   : > { %v921_v10 = vpop.f32.mrf.mxu1 }
 0x162   : > { %v998_v11 = vadd.f32 %v959_v7, %v500_v5  ;;  %v922_v12 = vadd.f32 %v921_v10, %v832_v8 }
 0x164   : > { %1030 = vst [vmem:[#allocation2 + $0x28] sm:$0xff] %v998_v11  ;;  %v983_v13 = vadd.f32 %v922_v12, %v485_v9 }
 0x166   : > { %1015 = vst [vmem:[#allocation2 + $0x60] sm:$0xff] %v983_v13  ;;  %v872_v14 = vpop.f32.mrf.mxu2 }
 0x167   : > { %v961_v16 = vpop.f32.mrf.mxu3 }
 0x168   : > { %v962_v17 = vadd.f32 %v961_v16, %v872_v14  ;;  %v834_v18 = vpop.f32.mrf.mxu0 }
 0x169   : > { %v923_v20 = vpop.f32.mrf.mxu1 }
 0x16a   : > { %v999_v21 = vadd.f32 %v962_v17, %v501_v15  ;;  %v924_v22 = vadd.f32 %v923_v20, %v834_v18 }
 0x16c   : > { %1031 = vst [vmem:[#allocation2 + $0xa0] sm:$0xff] %v999_v21  ;;  %v984_v23 = vadd.f32 %v924_v22, %v486_v19 }
 0x16e   : > { %1016 = vst [vmem:[#allocation2 + $0xf0] sm:$0xff] %v984_v23  ;;  %v874_v24 = vpop.f32.mrf.mxu2 }
 0x16f   : > { %v963_v26 = vpop.f32.mrf.mxu3 }
 0x170   : > { %v964_v27 = vadd.f32 %v963_v26, %v874_v24  ;;  %v837_v28 = vpop.f32.mrf.mxu0 }
 0x171   : > { %v926_v30 = vpop.f32.mrf.mxu1 }
 0x172   : > { %v1000_v31 = vadd.f32 %v964_v27, %v502_v25  ;;  %v927_v32 = vadd.f32 %v926_v30, %v837_v28 }
 0x174   : > { %1032 = vst [vmem:[#allocation2 + $0xf8] sm:$0xff] %v1000_v31  ;;  %v985_v33 = vadd.f32 %v927_v32, %v487_v29 }
 0x176   : > { %1017 = vst [vmem:[#allocation2 + $0x8] sm:$0xff] %v985_v33  ;;  %v877_v34 = vpop.f32.mrf.mxu2 }
 0x177   : > { %v966_v36 = vpop.f32.mrf.mxu3 }
 0x178   : > { %v967_v37 = vadd.f32 %v966_v36, %v877_v34  ;;  %v839_v38 = vpop.f32.mrf.mxu0 }
 0x179   : > { %v928_v40 = vpop.f32.mrf.mxu1 }
 0x17a   : > { %v1001_v41 = vadd.f32 %v967_v37, %v503_v35  ;;  %v929_v42 = vadd.f32 %v928_v40, %v839_v38 }
 0x17c   : > { %1033 = vst [vmem:[#allocation2 + $0x20] sm:$0xff] %v1001_v41  ;;  %v986_v43 = vadd.f32 %v929_v42, %v488_v39 }
 0x17e   : > { %1018 = vst [vmem:[#allocation2 + $0x78] sm:$0xff] %v986_v43  ;;  %v879_v44 = vpop.f32.mrf.mxu2 }
 0x17f   : > { %v968_v46 = vpop.f32.mrf.mxu3 }
 0x180   : > { %v969_v47 = vadd.f32 %v968_v46, %v879_v44  ;;  %1038 = sbr.rel (%p1660_p10) target bundleno = 655 (0x28f), region = 82 }
 0x182   : > { %v1002_v48 = vadd.f32 %v969_v47, %v504_v45 }
 0x184   : > { %1034 = vst [vmem:[#allocation2 + $0x98] sm:$0xff] %v1002_v48 }
 0x185   : > { %v1753_v49 = vld [vmem:[%s2338_s2 + $0x38] sm:$0xff]  ;;  %v1752_v50 = vld [vmem:[%s2338_s2 + $0x30] sm:$0xff]  ;;  %v1751_v51 = vld [vmem:[%s2338_s2 + $0x28] sm:$0xff] }
 0x186   : > { %1151 = vmatpush.bf16.msra.mxu0 %v1753_v49  ;;  %1770 = vmatpush.bf16.msra.mxu1 %v1753_v49  ;;  %v1750_v52 = vld [vmem:[%s2338_s2 + $0x20] sm:$0xff]  ;;  %v1749_v53 = vld [vmem:[%s2338_s2 + $0x18] sm:$0xff]  ;;  %v1748_v54 = vld [vmem:[%s2338_s2 + $0x10] sm:$0xff] }
 0x187   : > { %1771 = vmatpush.bf16.msra.mxu2 %v1753_v49  ;;  %1772 = vmatpush.bf16.msra.mxu3 %v1753_v49  ;;  %v1747_v55 = vld [vmem:[%s2338_s2 + $0x8] sm:$0xff]  ;;  %v1746_v56 = vld [vmem:[%s2338_s2] sm:$0xff]  ;;  %v1039_v57 = vld [vmem:[#allocation2 + $0xb0] sm:$0xff] }
 0x188   : > { %v1040_v58 = vld [vmem:[#allocation2] sm:$0xff]  ;;  %v1048_v60 = vld [vmem:[#allocation2 + $0x88] sm:$0xff]  ;;  %v1055_v61 = vld [vmem:[#allocation2 + $0x38] sm:$0xff] }
 0x189   : > { %v1047_v59 = vld [vmem:[#allocation2 + $0x80] sm:$0xff]  ;;  %v1056_v62 = vld [vmem:[#allocation2 + $0x58] sm:$0xff]  ;;  %v1063_v63 = vld [vmem:[#allocation2 + $0xa8] sm:$0xff]  ;;  %v1071_v1 = vpack.c.bf16 %v1040_v58, %v1039_v57 }
 0x18a   : > { %1152 = vmatpush.bf16.msra.mxu0 %v1752_v50  ;;  %1773 = vmatpush.bf16.msra.mxu1 %v1752_v50  ;;  %v1064_v0 = vld [vmem:[#allocation2 + $0xd0] sm:$0xff]  ;;  %v1075_v2 = vpack.c.bf16 %v1048_v60, %v1047_v59  ;;  %v1079_v3 = vpack.c.bf16 %v1056_v62, %v1055_v61  ;;  %v1041_v5 = vld [vmem:[#allocation2 + $0xd8] sm:$0xff]  ;;  %v1049_v7 = vld [vmem:[#allocation2 + $0xe8] sm:$0xff] }
 0x18b   : > { %1774 = vmatpush.bf16.msra.mxu2 %v1752_v50  ;;  %1775 = vmatpush.bf16.msra.mxu3 %v1752_v50  ;;  %v1083_v4 = vpack.c.bf16 %v1064_v0, %v1063_v63  ;;  %v1042_v6 = vld [vmem:[#allocation2 + $0x18] sm:$0xff]  ;;  %v1057_v9 = vld [vmem:[#allocation2 + $0x40] sm:$0xff]  ;;  %v1058_v10 = vld [vmem:[#allocation2 + $0xc8] sm:$0xff] }
 0x18c   : > { %v1050_v8 = vld [vmem:[#allocation2 + $0xb8] sm:$0xff]  ;;  %v1065_v11 = vld [vmem:[#allocation2 + $0x10] sm:$0xff]  ;;  %v1066_v12 = vld [vmem:[#allocation2 + $0x28] sm:$0xff]  ;;  %v1072_v13 = vpack.c.bf16 %v1042_v6, %v1041_v5  ;;  %v1080_v15 = vpack.c.bf16 %v1058_v10, %v1057_v9 }
 0x18d   : > { %v1076_v14 = vpack.c.bf16 %v1050_v8, %v1049_v7  ;;  %v1084_v16 = vpack.c.bf16 %v1066_v12, %v1065_v11  ;;  %v1043_v17 = vld [vmem:[#allocation2 + $0x50] sm:$0xff]  ;;  %v1044_v18 = vld [vmem:[#allocation2 + $0x68] sm:$0xff]  ;;  %v1051_v19 = vld [vmem:[#allocation2 + $0x60] sm:$0xff] }
 0x18e   : > { %1153 = vmatpush.bf16.msra.mxu0 %v1751_v51  ;;  %1776 = vmatpush.bf16.msra.mxu1 %v1751_v51  ;;  %v1052_v20 = vld [vmem:[#allocation2 + $0xf0] sm:$0xff]  ;;  %v1059_v21 = vld [vmem:[#allocation2 + $0xe0] sm:$0xff]  ;;  %v1068_v24 = vld [vmem:[#allocation2 + $0xf8] sm:$0xff]  ;;  %v1073_v25 = vpack.c.bf16 %v1044_v18, %v1043_v17 }
 0x18f   : > { %1777 = vmatpush.bf16.msra.mxu2 %v1751_v51  ;;  %1778 = vmatpush.bf16.msra.mxu3 %v1751_v51  ;;  %v1060_v22 = vld [vmem:[#allocation2 + $0x90] sm:$0xff]  ;;  %v1067_v23 = vld [vmem:[#allocation2 + $0xa0] sm:$0xff]  ;;  %v1077_v26 = vpack.c.bf16 %v1052_v20, %v1051_v19  ;;  %v1046_v30 = vld [vmem:[#allocation2 + $0x48] sm:$0xff] }
 0x190   : > { %v1081_v27 = vpack.c.bf16 %v1060_v22, %v1059_v21  ;;  %v1085_v28 = vpack.c.bf16 %v1068_v24, %v1067_v23  ;;  %v1045_v29 = vld [vmem:[#allocation2 + $0x30] sm:$0xff]  ;;  %v1053_v31 = vld [vmem:[#allocation2 + $0x8] sm:$0xff]  ;;  %v1054_v32 = vld [vmem:[#allocation2 + $0x78] sm:$0xff] }
 0x191   : > { %v1061_v33 = vld [vmem:[#allocation2 + $0x70] sm:$0xff]  ;;  %v1062_v34 = vld [vmem:[#allocation2 + $0xc0] sm:$0xff]  ;;  %v1070_v36 = vld [vmem:[#allocation2 + $0x98] sm:$0xff]  ;;  %v1074_v37 = vpack.c.bf16 %v1046_v30, %v1045_v29  ;;  %v1078_v38 = vpack.c.bf16 %v1054_v32, %v1053_v31 }
 0x192   : > { %1154 = vmatpush.bf16.msra.mxu0 %v1750_v52  ;;  %1779 = vmatpush.bf16.msra.mxu1 %v1750_v52  ;;  %v1069_v35 = vld [vmem:[#allocation2 + $0x20] sm:$0xff]  ;;  %v1082_v39 = vpack.c.bf16 %v1062_v34, %v1061_v33 }
 0x193   : > { %1780 = vmatpush.bf16.msra.mxu2 %v1750_v52  ;;  %1781 = vmatpush.bf16.msra.mxu3 %v1750_v52  ;;  %v1086_v40 = vpack.c.bf16 %v1070_v36, %v1069_v35  ;;  %v1272_v42 = vld [vmem:[%s2339_s3] sm:$0xff] }
 0x194   : > { %v1280_v44 = vld [vmem:[%s2339_s3 + $0x40] sm:$0xff] }
 0x196   : > { %1155 = vmatpush.bf16.msra.mxu0 %v1749_v53  ;;  %1782 = vmatpush.bf16.msra.mxu1 %v1749_v53 }
 0x197   : > { %1783 = vmatpush.bf16.msra.mxu2 %v1749_v53  ;;  %1784 = vmatpush.bf16.msra.mxu3 %v1749_v53 }
 0x19a   : > { %1156 = vmatpush.bf16.msra.mxu0 %v1748_v54  ;;  %1785 = vmatpush.bf16.msra.mxu1 %v1748_v54 }
 0x19b   : > { %1786 = vmatpush.bf16.msra.mxu2 %v1748_v54  ;;  %1787 = vmatpush.bf16.msra.mxu3 %v1748_v54 }
 0x19e   : > { %1157 = vmatpush.bf16.msra.mxu0 %v1747_v55  ;;  %1788 = vmatpush.bf16.msra.mxu1 %v1747_v55 }
 0x19f   : > { %1789 = vmatpush.bf16.msra.mxu2 %v1747_v55  ;;  %1790 = vmatpush.bf16.msra.mxu3 %v1747_v55 }
 0x1a2   : > { %1158 = vmatpush.bf16.msra.mxu0 %v1746_v56  ;;  %1791 = vmatpush.bf16.msra.mxu1 %v1746_v56 }
 0x1a3   : > { %1792 = vmatpush.bf16.msra.mxu2 %v1746_v56  ;;  %1793 = vmatpush.bf16.msra.mxu3 %v1746_v56 }
 0x1a5   : > { %1159 = vmatmul.bf16.vlgmr.msra.gmra.mxu0 %v1071_v1  ;;  %1179 = vmatmul.bf16.vlgmr.msra.gmra.mxu1 %v1075_v2 }
 0x1a6   : > { %1199 = vmatmul.bf16.vlgmr.msra.gmra.mxu2 %v1079_v3  ;;  %1219 = vmatmul.bf16.vlgmr.msra.gmra.mxu3 %v1083_v4 }
 0x1b5   : > { %1164 = vmatmul.bf16.gmra.mxu0 %v1072_v13  ;;  %1184 = vmatmul.bf16.gmra.mxu1 %v1076_v14 }
 0x1b6   : > { %1204 = vmatmul.bf16.gmra.mxu2 %v1080_v15  ;;  %1224 = vmatmul.bf16.gmra.mxu3 %v1084_v16 }
 0x1c5   : > { %1169 = vmatmul.bf16.gmra.mxu0 %v1073_v25  ;;  %1189 = vmatmul.bf16.gmra.mxu1 %v1077_v26 }
 0x1c6   : > { %1209 = vmatmul.bf16.gmra.mxu2 %v1081_v27  ;;  %1229 = vmatmul.bf16.gmra.mxu3 %v1085_v28 }
 0x1d5   : > { %1174 = vmatmul.bf16.gmra.mxu0 %v1074_v37  ;;  %1194 = vmatmul.bf16.gmra.mxu1 %v1078_v38 }
 0x1d6   : > { %1214 = vmatmul.bf16.gmra.mxu2 %v1082_v39  ;;  %1234 = vmatmul.bf16.gmra.mxu3 %v1086_v40 }
 0x222   : > { %v1160_v41 = vpop.f32.mrf.mxu0  ;;  %v1180_v43 = vpop.f32.mrf.mxu1 }
 0x223   : > { %v1240_v45 = vmax.f32 %v1160_v41, 0.0  ;;  %v1248_v46 = vmax.f32 %v1180_v43, 0.0 }
 0x225   : > { %v1304_v47 = vadd.f32 %v1272_v42, %v1240_v45  ;;  %v1312_v48 = vadd.f32 %v1280_v44, %v1248_v46 }
 0x227   : > { %1336 = vst [vmem:[%s2340_s4] sm:$0xff] %v1304_v47 }
 0x228   : > { %1344 = vst [vmem:[%s2340_s4 + $0x40] sm:$0xff] %v1312_v48 }
 0x229   : > { %v1200_v49 = vpop.f32.mrf.mxu2  ;;  %v1220_v51 = vpop.f32.mrf.mxu3 }
 0x22a   : > { %v1256_v53 = vmax.f32 %v1200_v49, 0.0  ;;  %v1264_v54 = vmax.f32 %v1220_v51, 0.0  ;;  %v1162_v55 = vpop.f32.mrf.mxu0  ;;  %v1182_v57 = vpop.f32.mrf.mxu1 }
 0x22b   : > { %v1241_v59 = vmax.f32 %v1162_v55, 0.0  ;;  %v1249_v60 = vmax.f32 %v1182_v57, 0.0 }
 0x22f   : > { %v1288_v50 = vld [vmem:[%s2339_s3 + $0x80] sm:$0xff]  ;;  %v1273_v56 = vld [vmem:[%s2339_s3 + $0x8] sm:$0xff] }
 0x230   : > { %v1296_v52 = vld [vmem:[%s2339_s3 + $0xc0] sm:$0xff]  ;;  %v1281_v58 = vld [vmem:[%s2339_s3 + $0x48] sm:$0xff]  ;;  %v1320_v61 = vadd.f32 %v1288_v50, %v1256_v53  ;;  %v1305_v63 = vadd.f32 %v1273_v56, %v1241_v59 }
 0x231   : > { %v1328_v62 = vadd.f32 %v1296_v52, %v1264_v54  ;;  %v1313_v0 = vadd.f32 %v1281_v58, %v1249_v60  ;;  %v1202_v1 = vpop.f32.mrf.mxu2  ;;  %v1222_v3 = vpop.f32.mrf.mxu3 }
 0x232   : > { %1352 = vst [vmem:[%s2340_s4 + $0x80] sm:$0xff] %v1320_v61  ;;  %v1257_v5 = vmax.f32 %v1202_v1, 0.0  ;;  %v1265_v6 = vmax.f32 %v1222_v3, 0.0  ;;  %v1165_v7 = vpop.f32.mrf.mxu0  ;;  %v1185_v9 = vpop.f32.mrf.mxu1 }
 0x233   : > { %1360 = vst [vmem:[%s2340_s4 + $0xc0] sm:$0xff] %v1328_v62  ;;  %v1242_v11 = vmax.f32 %v1165_v7, 0.0  ;;  %v1250_v12 = vmax.f32 %v1185_v9, 0.0 }
 0x234   : > { %1337 = vst [vmem:[%s2340_s4 + $0x8] sm:$0xff] %v1305_v63 }
 0x235   : > { %1345 = vst [vmem:[%s2340_s4 + $0x48] sm:$0xff] %v1313_v0 }
 0x239   : > { %v1205_v17 = vpop.f32.mrf.mxu2  ;;  %v1225_v19 = vpop.f32.mrf.mxu3 }
 0x23a   : > { %v1258_v21 = vmax.f32 %v1205_v17, 0.0  ;;  %v1266_v22 = vmax.f32 %v1225_v19, 0.0  ;;  %v1167_v23 = vpop.f32.mrf.mxu0  ;;  %v1187_v25 = vpop.f32.mrf.mxu1 }
 0x23b   : > { %v1243_v27 = vmax.f32 %v1167_v23, 0.0  ;;  %v1251_v28 = vmax.f32 %v1187_v25, 0.0 }
 0x23c   : > { %v1289_v2 = vld [vmem:[%s2339_s3 + $0x88] sm:$0xff]  ;;  %v1274_v8 = vld [vmem:[%s2339_s3 + $0x10] sm:$0xff] }
 0x23d   : > { %v1297_v4 = vld [vmem:[%s2339_s3 + $0xc8] sm:$0xff]  ;;  %v1282_v10 = vld [vmem:[%s2339_s3 + $0x50] sm:$0xff]  ;;  %v1321_v13 = vadd.f32 %v1289_v2, %v1257_v5  ;;  %v1306_v15 = vadd.f32 %v1274_v8, %v1242_v11 }
 0x23e   : > { %v1329_v14 = vadd.f32 %v1297_v4, %v1265_v6  ;;  %v1314_v16 = vadd.f32 %v1282_v10, %v1250_v12 }
 0x23f   : > { %1353 = vst [vmem:[%s2340_s4 + $0x88] sm:$0xff] %v1321_v13 }
 0x240   : > { %1361 = vst [vmem:[%s2340_s4 + $0xc8] sm:$0xff] %v1329_v14 }
 0x241   : > { %1338 = vst [vmem:[%s2340_s4 + $0x10] sm:$0xff] %v1306_v15  ;;  %v1207_v33 = vpop.f32.mrf.mxu2  ;;  %v1227_v35 = vpop.f32.mrf.mxu3 }
 0x242   : > { %1346 = vst [vmem:[%s2340_s4 + $0x50] sm:$0xff] %v1314_v16  ;;  %v1259_v37 = vmax.f32 %v1207_v33, 0.0  ;;  %v1267_v38 = vmax.f32 %v1227_v35, 0.0  ;;  %v1170_v39 = vpop.f32.mrf.mxu0  ;;  %v1190_v41 = vpop.f32.mrf.mxu1 }
 0x243   : > { %v1244_v43 = vmax.f32 %v1170_v39, 0.0  ;;  %v1252_v44 = vmax.f32 %v1190_v41, 0.0 }
 0x249   : > { %v1290_v18 = vld [vmem:[%s2339_s3 + $0x90] sm:$0xff]  ;;  %v1275_v24 = vld [vmem:[%s2339_s3 + $0x18] sm:$0xff]  ;;  %v1210_v49 = vpop.f32.mrf.mxu2  ;;  %v1230_v51 = vpop.f32.mrf.mxu3 }
 0x24a   : > { %v1298_v20 = vld [vmem:[%s2339_s3 + $0xd0] sm:$0xff]  ;;  %v1283_v26 = vld [vmem:[%s2339_s3 + $0x58] sm:$0xff]  ;;  %v1322_v29 = vadd.f32 %v1290_v18, %v1258_v21  ;;  %v1307_v31 = vadd.f32 %v1275_v24, %v1243_v27  ;;  %v1260_v53 = vmax.f32 %v1210_v49, 0.0  ;;  %v1268_v54 = vmax.f32 %v1230_v51, 0.0  ;;  %v1172_v55 = vpop.f32.mrf.mxu0  ;;  %v1192_v57 = vpop.f32.mrf.mxu1 }
 0x24b   : > { %v1330_v30 = vadd.f32 %v1298_v20, %v1266_v22  ;;  %v1315_v32 = vadd.f32 %v1283_v26, %v1251_v28  ;;  %v1245_v59 = vmax.f32 %v1172_v55, 0.0  ;;  %v1253_v60 = vmax.f32 %v1192_v57, 0.0 }
 0x24c   : > { %1354 = vst [vmem:[%s2340_s4 + $0x90] sm:$0xff] %v1322_v29 }
 0x24d   : > { %1362 = vst [vmem:[%s2340_s4 + $0xd0] sm:$0xff] %v1330_v30 }
 0x24e   : > { %1339 = vst [vmem:[%s2340_s4 + $0x18] sm:$0xff] %v1307_v31 }
 0x24f   : > { %1347 = vst [vmem:[%s2340_s4 + $0x58] sm:$0xff] %v1315_v32 }
 0x251   : > { %v1212_v1 = vpop.f32.mrf.mxu2  ;;  %v1232_v3 = vpop.f32.mrf.mxu3 }
 0x252   : > { %v1261_v5 = vmax.f32 %v1212_v1, 0.0  ;;  %v1269_v6 = vmax.f32 %v1232_v3, 0.0  ;;  %v1175_v7 = vpop.f32.mrf.mxu0  ;;  %v1195_v9 = vpop.f32.mrf.mxu1 }
 0x253   : > { %v1246_v11 = vmax.f32 %v1175_v7, 0.0  ;;  %v1254_v12 = vmax.f32 %v1195_v9, 0.0 }
 0x256   : > { %v1291_v34 = vld [vmem:[%s2339_s3 + $0x98] sm:$0xff]  ;;  %v1276_v40 = vld [vmem:[%s2339_s3 + $0x20] sm:$0xff] }
 0x257   : > { %v1299_v36 = vld [vmem:[%s2339_s3 + $0xd8] sm:$0xff]  ;;  %v1284_v42 = vld [vmem:[%s2339_s3 + $0x60] sm:$0xff]  ;;  %v1323_v45 = vadd.f32 %v1291_v34, %v1259_v37  ;;  %v1308_v47 = vadd.f32 %v1276_v40, %v1244_v43 }
 0x258   : > { %v1331_v46 = vadd.f32 %v1299_v36, %v1267_v38  ;;  %v1316_v48 = vadd.f32 %v1284_v42, %v1252_v44 }
 0x259   : > { %1355 = vst [vmem:[%s2340_s4 + $0x98] sm:$0xff] %v1323_v45  ;;  %v1215_v17 = vpop.f32.mrf.mxu2  ;;  %v1235_v19 = vpop.f32.mrf.mxu3 }
 0x25a   : > { %1363 = vst [vmem:[%s2340_s4 + $0xd8] sm:$0xff] %v1331_v46  ;;  %v1262_v21 = vmax.f32 %v1215_v17, 0.0  ;;  %v1270_v22 = vmax.f32 %v1235_v19, 0.0  ;;  %v1177_v23 = vpop.f32.mrf.mxu0  ;;  %v1197_v25 = vpop.f32.mrf.mxu1 }
 0x25b   : > { %1340 = vst [vmem:[%s2340_s4 + $0x20] sm:$0xff] %v1308_v47  ;;  %v1247_v27 = vmax.f32 %v1177_v23, 0.0  ;;  %v1255_v28 = vmax.f32 %v1197_v25, 0.0 }
 0x25c   : > { %1348 = vst [vmem:[%s2340_s4 + $0x60] sm:$0xff] %v1316_v48 }
 0x261   : > { %v1217_v33 = vpop.f32.mrf.mxu2  ;;  %v1237_v35 = vpop.f32.mrf.mxu3 }
 0x262   : > { %v1263_v37 = vmax.f32 %v1217_v33, 0.0  ;;  %v1271_v38 = vmax.f32 %v1237_v35, 0.0 }
 0x263   : > { %v1292_v50 = vld [vmem:[%s2339_s3 + $0xa0] sm:$0xff]  ;;  %v1277_v56 = vld [vmem:[%s2339_s3 + $0x28] sm:$0xff] }
 0x264   : > { %v1300_v52 = vld [vmem:[%s2339_s3 + $0xe0] sm:$0xff]  ;;  %v1285_v58 = vld [vmem:[%s2339_s3 + $0x68] sm:$0xff]  ;;  %v1324_v61 = vadd.f32 %v1292_v50, %v1260_v53  ;;  %v1309_v63 = vadd.f32 %v1277_v56, %v1245_v59 }
 0x265   : > { %v1332_v62 = vadd.f32 %v1300_v52, %v1268_v54  ;;  %v1317_v0 = vadd.f32 %v1285_v58, %v1253_v60 }
 0x266   : > { %1356 = vst [vmem:[%s2340_s4 + $0xa0] sm:$0xff] %v1324_v61 }
 0x267   : > { %1364 = vst [vmem:[%s2340_s4 + $0xe0] sm:$0xff] %v1332_v62 }
 0x268   : > { %1341 = vst [vmem:[%s2340_s4 + $0x28] sm:$0xff] %v1309_v63 }
 0x269   : > { %1349 = vst [vmem:[%s2340_s4 + $0x68] sm:$0xff] %v1317_v0 }
 0x270   : > { %v1293_v2 = vld [vmem:[%s2339_s3 + $0xa8] sm:$0xff]  ;;  %v1278_v8 = vld [vmem:[%s2339_s3 + $0x30] sm:$0xff] }
 0x271   : > { %v1301_v4 = vld [vmem:[%s2339_s3 + $0xe8] sm:$0xff]  ;;  %v1286_v10 = vld [vmem:[%s2339_s3 + $0x70] sm:$0xff]  ;;  %v1325_v13 = vadd.f32 %v1293_v2, %v1261_v5  ;;  %v1310_v15 = vadd.f32 %v1278_v8, %v1246_v11 }
 0x272   : > { %v1333_v14 = vadd.f32 %v1301_v4, %v1269_v6  ;;  %v1318_v16 = vadd.f32 %v1286_v10, %v1254_v12 }
 0x273   : > { %1357 = vst [vmem:[%s2340_s4 + $0xa8] sm:$0xff] %v1325_v13 }
 0x274   : > { %1365 = vst [vmem:[%s2340_s4 + $0xe8] sm:$0xff] %v1333_v14 }
 0x275   : > { %1342 = vst [vmem:[%s2340_s4 + $0x30] sm:$0xff] %v1310_v15 }
 0x276   : > { %1350 = vst [vmem:[%s2340_s4 + $0x70] sm:$0xff] %v1318_v16 }
 0x27d   : > { %v1294_v18 = vld [vmem:[%s2339_s3 + $0xb0] sm:$0xff]  ;;  %v1279_v24 = vld [vmem:[%s2339_s3 + $0x38] sm:$0xff] }
 0x27e   : > { %v1302_v20 = vld [vmem:[%s2339_s3 + $0xf0] sm:$0xff]  ;;  %v1287_v26 = vld [vmem:[%s2339_s3 + $0x78] sm:$0xff]  ;;  %v1326_v29 = vadd.f32 %v1294_v18, %v1262_v21  ;;  %v1311_v31 = vadd.f32 %v1279_v24, %v1247_v27 }
 0x27f   : > { %v1334_v30 = vadd.f32 %v1302_v20, %v1270_v22  ;;  %v1319_v32 = vadd.f32 %v1287_v26, %v1255_v28 }
 0x280   : > { %1358 = vst [vmem:[%s2340_s4 + $0xb0] sm:$0xff] %v1326_v29 }
 0x281   : > { %1366 = vst [vmem:[%s2340_s4 + $0xf0] sm:$0xff] %v1334_v30 }
 0x282   : > { %1343 = vst [vmem:[%s2340_s4 + $0x38] sm:$0xff] %v1311_v31 }
 0x283   : > { %1351 = vst [vmem:[%s2340_s4 + $0x78] sm:$0xff] %v1319_v32 }
 0x28a   : > { %v1295_v34 = vld [vmem:[%s2339_s3 + $0xb8] sm:$0xff] }
 0x28b   : > { %v1303_v36 = vld [vmem:[%s2339_s3 + $0xf8] sm:$0xff]  ;;  %v1327_v39 = vadd.f32 %v1295_v34, %v1263_v37 }
 0x28c   : > { %v1335_v40 = vadd.f32 %v1303_v36, %v1271_v38 }
 0x28d   : > { %1359 = vst [vmem:[%s2340_s4 + $0xb8] sm:$0xff] %v1327_v39 }
 0x28e   : > { %1367 = vst [vmem:[%s2340_s4 + $0xf8] sm:$0xff] %v1335_v40 }
 0x28f PF: > { %s14_s19 = sadd.s32 1, %s1873_s19   ;;  %s2341_s15 = smov %s1861_s16 }
 0x290   : > { %p11_p11 = scmp.ge.s32.totalorder %s14_s19, 4   ;;  %s2342_s16 = smov %s1936_s23 }
 0x291   : > { %s2343_s17 = smov %s1869_s18  ;;  %s2344_s18 = smov %s2346_s20 }
 0x292   :  { %13 = sbr.rel (!%p11_p11) target bundleno = 3 (0x3), region = 121 }

// kernel: ngcf_forward_padded.4
= control target key start
LH: loop header
LB: loop body
LE: loop exit
PB: predicated region body
PF: predicated region fallthrough
CT: control target
= control target key end

     0   :  { %s2139_s18 = smov 0   ;;  %s2141_s19 = smov 0   ;;  %s2622_s0 = inlined_call_operand.vmem [shape: bf16[256,512], index: 0, kind: input, shape index: {}]   ;;  %s2623_s1 = inlined_call_operand.vmem [shape: bf16[512,128], index: 1, kind: input, shape index: {}]   ;;  %s2624_s2 = inlined_call_operand.vmem [shape: bf16[128,128], index: 2, kind: input, shape index: {}]   ;;  %s2625_s3 = inlined_call_operand.vmem [shape: f32[256,128], index: 3, kind: input, shape index: {}, may-alias: {3,5}]   ;;  %s2626_s4 = inlined_call_operand.vmem [shape: bf16[256,128], index: 4, kind: output, shape index: {0}]   ;;  %s2627_s5 = inlined_call_operand.vmem [shape: f32[256,128], index: 5, kind: output, shape index: {1}, may-alias: {3,5}]  }
   0x1   :  { %s2143_s20 = smov 0   ;;  %s2145_s21 = smov 0  }
   0x2   :  { %s2147_s22 = smov 0  }
   0x3 LB: > { %s25_s23 = sadd.s32 1, %s2102_s21  ;;  %p44_p1 = scmp.ne.s32.totalorder %s2094_s19, %s2090_s18  ;;  %s2106_s22 = sphi %s2147_s22, %s16_s22   ;;  %s2102_s21 = sphi %s2145_s21, %s2631_s21   ;;  %s2098_s20 = sphi %s2143_s20, %s2630_s20   ;;  %s2094_s19 = sphi %s2141_s19, %s2629_s19   ;;  %s2090_s18 = sphi %s2139_s18, %s2628_s18  }
   0x4   : > { %p26_p0 = scmp.ge.s32.totalorder %s25_s23, 2  ;;  %p45_p2 = scmp.eq.s32.totalorder %s2106_s22, 0 }
   0x5   : > { %s37_s25 = sadd.s32 1, %s2094_s19  ;;  %p1595_p5 = scmp.ge.s32.totalorder %s2106_s22, 2 }
   0x6   : > { %s2633_s23 = smov (%p26_p0, %s25_s23), 0  ;;  %p46_p3 = por %p45_p2, %p44_p1 }
   0x7   : > { %s33_s24 = ssub.s32 %s2102_s21, %s2633_s23  ;;  %205 = sbr.rel (%p1595_p5) target bundleno = 48 (0x30), region = 28 }
   0x8   : > { %p35_p4 = scmp.eq.s32.totalorder %s33_s24, 0 }
   0xa   : > { %s2174_s26 = scalar_select %p35_p4, %s2094_s19, %s37_s25  }
   0xc   : > { %208 = sbr.rel (!%p46_p3) target bundleno = 48 (0x30), region = 32  ;;  %s210_s27 = sand.u32 (%p46_p3), 1, %s2094_s19  }
   0xd   : > { %s1835_s28 = sshll.u32 (%p46_p3), %s2102_s21, 3  ;;  %s1596_s29 = sshll.u32 (%p46_p3), %s210_s27, 8 }
   0xe   : > { %s2182_s7 = scalar_lea.vmem (%p46_p3), %s2622_s0, %s1835_s28  ;;  %s2187_s8 = scalar_lea.vmem (%p46_p3), [#allocation3], %s1596_s29 }
   0xf   : > { %v309_v0 = vld [vmem:[%s2182_s7] sm:$0xff] (%p46_p3)  ;;  %v311_v1 = vld [vmem:[%s2182_s7 + $0x10] sm:$0xff] (%p46_p3) }
  0x10   : > { %v313_v2 = vld [vmem:[%s2182_s7 + $0x20] sm:$0xff] (%p46_p3)  ;;  %310 = vst [vmem:[%s2187_s8] sm:$0xff] (%p46_p3), %v309_v0  ;;  %v315_v3 = vld [vmem:[%s2182_s7 + $0x30] sm:$0xff] (%p46_p3) }
  0x11   : > { %312 = vst [vmem:[%s2187_s8 + $0x8] sm:$0xff] %v311_v1  ;;  %v317_v4 = vld [vmem:[%s2182_s7 + $0x40] sm:$0xff]  ;;  %v319_v5 = vld [vmem:[%s2182_s7 + $0x50] sm:$0xff] }
  0x12   : > { %314 = vst [vmem:[%s2187_s8 + $0x10] sm:$0xff] %v313_v2  ;;  %v321_v6 = vld [vmem:[%s2182_s7 + $0x60] sm:$0xff]  ;;  %v323_v7 = vld [vmem:[%s2182_s7 + $0x70] sm:$0xff] }
  0x13   : > { %316 = vst [vmem:[%s2187_s8 + $0x18] sm:$0xff] %v315_v3  ;;  %v325_v8 = vld [vmem:[%s2182_s7 + $0x80] sm:$0xff]  ;;  %v327_v9 = vld [vmem:[%s2182_s7 + $0x90] sm:$0xff] }
  0x14   : > { %318 = vst [vmem:[%s2187_s8 + $0x20] sm:$0xff] %v317_v4  ;;  %v329_v10 = vld [vmem:[%s2182_s7 + $0xa0] sm:$0xff]  ;;  %v331_v11 = vld [vmem:[%s2182_s7 + $0xb0] sm:$0xff] }
  0x15   : > { %320 = vst [vmem:[%s2187_s8 + $0x28] sm:$0xff] %v319_v5  ;;  %v333_v12 = vld [vmem:[%s2182_s7 + $0xc0] sm:$0xff]  ;;  %v335_v13 = vld [vmem:[%s2182_s7 + $0xd0] sm:$0xff] }
  0x16   : > { %322 = vst [vmem:[%s2187_s8 + $0x30] sm:$0xff] %v321_v6  ;;  %v337_v14 = vld [vmem:[%s2182_s7 + $0xe0] sm:$0xff]  ;;  %v339_v15 = vld [vmem:[%s2182_s7 + $0xf0] sm:$0xff] }
  0x17   : > { %324 = vst [vmem:[%s2187_s8 + $0x38] sm:$0xff] %v323_v7  ;;  %v341_v16 = vld [vmem:[%s2182_s7 + $0x100] sm:$0xff]  ;;  %v343_v17 = vld [vmem:[%s2182_s7 + $0x110] sm:$0xff] }
  0x18   : > { %326 = vst [vmem:[%s2187_s8 + $0x40] sm:$0xff] %v325_v8  ;;  %v345_v18 = vld [vmem:[%s2182_s7 + $0x120] sm:$0xff]  ;;  %v347_v19 = vld [vmem:[%s2182_s7 + $0x130] sm:$0xff] }
  0x19   : > { %328 = vst [vmem:[%s2187_s8 + $0x48] sm:$0xff] %v327_v9  ;;  %v349_v20 = vld [vmem:[%s2182_s7 + $0x140] sm:$0xff]  ;;  %v351_v21 = vld [vmem:[%s2182_s7 + $0x150] sm:$0xff] }
  0x1a   : > { %330 = vst [vmem:[%s2187_s8 + $0x50] sm:$0xff] %v329_v10  ;;  %v353_v22 = vld [vmem:[%s2182_s7 + $0x160] sm:$0xff]  ;;  %v355_v23 = vld [vmem:[%s2182_s7 + $0x170] sm:$0xff] }
  0x1b   : > { %332 = vst [vmem:[%s2187_s8 + $0x58] sm:$0xff] %v331_v11  ;;  %v357_v24 = vld [vmem:[%s2182_s7 + $0x180] sm:$0xff]  ;;  %v359_v25 = vld [vmem:[%s2182_s7 + $0x190] sm:$0xff] }
  0x1c   : > { %334 = vst [vmem:[%s2187_s8 + $0x60] sm:$0xff] %v333_v12  ;;  %v361_v26 = vld [vmem:[%s2182_s7 + $0x1a0] sm:$0xff]  ;;  %v363_v27 = vld [vmem:[%s2182_s7 + $0x1b0] sm:$0xff] }
  0x1d   : > { %336 = vst [vmem:[%s2187_s8 + $0x68] sm:$0xff] %v335_v13  ;;  %v365_v28 = vld [vmem:[%s2182_s7 + $0x1c0] sm:$0xff]  ;;  %v367_v29 = vld [vmem:[%s2182_s7 + $0x1d0] sm:$0xff] }
  0x1e   : > { %338 = vst [vmem:[%s2187_s8 + $0x70] sm:$0xff] %v337_v14  ;;  %v369_v30 = vld [vmem:[%s2182_s7 + $0x1e0] sm:$0xff]  ;;  %v371_v31 = vld [vmem:[%s2182_s7 + $0x1f0] sm:$0xff] }
  0x1f   : > { %340 = vst [vmem:[%s2187_s8 + $0x78] sm:$0xff] %v339_v15 }
  0x20   : > { %342 = vst [vmem:[%s2187_s8 + $0x80] sm:$0xff] %v341_v16 }
  0x21   : > { %344 = vst [vmem:[%s2187_s8 + $0x88] sm:$0xff] %v343_v17 }
  0x22   : > { %346 = vst [vmem:[%s2187_s8 + $0x90] sm:$0xff] %v345_v18 }
  0x23   : > { %348 = vst [vmem:[%s2187_s8 + $0x98] sm:$0xff] %v347_v19 }
  0x24   : > { %350 = vst [vmem:[%s2187_s8 + $0xa0] sm:$0xff] %v349_v20 }
  0x25   : > { %352 = vst [vmem:[%s2187_s8 + $0xa8] sm:$0xff] %v351_v21 }
  0x26   : > { %354 = vst [vmem:[%s2187_s8 + $0xb0] sm:$0xff] %v353_v22 }
  0x27   : > { %356 = vst [vmem:[%s2187_s8 + $0xb8] sm:$0xff] %v355_v23 }
  0x28   : > { %358 = vst [vmem:[%s2187_s8 + $0xc0] sm:$0xff] %v357_v24 }
  0x29   : > { %360 = vst [vmem:[%s2187_s8 + $0xc8] sm:$0xff] %v359_v25 }
  0x2a   : > { %362 = vst [vmem:[%s2187_s8 + $0xd0] sm:$0xff] %v361_v26 }
  0x2b   : > { %364 = vst [vmem:[%s2187_s8 + $0xd8] sm:$0xff] %v363_v27 }
  0x2c   : > { %366 = vst [vmem:[%s2187_s8 + $0xe0] sm:$0xff] %v365_v28 }
  0x2d   : > { %368 = vst [vmem:[%s2187_s8 + $0xe8] sm:$0xff] %v367_v29 }
  0x2e   : > { %370 = vst [vmem:[%s2187_s8 + $0xf0] sm:$0xff] %v369_v30 }
  0x2f   : > { %372 = vst [vmem:[%s2187_s8 + $0xf8] sm:$0xff] %v371_v31 }
  0x30 PF: > { %p1599_p6 = scmp.ge.s32.totalorder %s2106_s22, 1  ;;  %p377_p7 = scmp.lt.s32.totalorder %s2106_s22, 3 }
  0x32   : > { %p378_p8 = pnand %p1599_p6, %p377_p7 }
  0x33   : > { %s384_s9 = sand.u32 (!%p378_p8), 1, %s2090_s18   ;;  %p1601_p9 = scmp.ne.s32.totalorder (!%p378_p8), %s2098_s20, 0 }
  0x34   : > { %381 = sbr.rel (%p378_p8) target bundleno = 714 (0x2ca), region = 70  ;;  %s1600_s10 = sshll.u32 (!%p378_p8), %s384_s9, 8 }
  0x35   : > { %s2253_s11 = scalar_lea.vmem (!%p378_p8), [#allocation3], %s1600_s10 }
  0x39   : > { %444 = sbr.rel (%p1601_p9) target bundleno = 95 (0x5f), region = 78 }
  0x3e   : > { %v2108_v32 = vmov 0.0  }
  0x3f   : > { %445 = vst [vmem:[#allocation2 + $0xb0] sm:$0xff] %v2108_v32 }
  0x40   : > { %446 = vst [vmem:[#allocation2] sm:$0xff] %v2108_v32 }
  0x41   : > { %447 = vst [vmem:[#allocation2 + $0xd8] sm:$0xff] %v2108_v32 }
  0x42   : > { %448 = vst [vmem:[#allocation2 + $0x18] sm:$0xff] %v2108_v32 }
  0x43   : > { %449 = vst [vmem:[#allocation2 + $0x50] sm:$0xff] %v2108_v32 }
  0x44   : > { %450 = vst [vmem:[#allocation2 + $0x68] sm:$0xff] %v2108_v32 }
  0x45   : > { %451 = vst [vmem:[#allocation2 + $0x30] sm:$0xff] %v2108_v32 }
  0x46   : > { %452 = vst [vmem:[#allocation2 + $0x48] sm:$0xff] %v2108_v32 }
  0x47   : > { %453 = vst [vmem:[#allocation2 + $0x80] sm:$0xff] %v2108_v32 }
  0x48   : > { %454 = vst [vmem:[#allocation2 + $0x88] sm:$0xff] %v2108_v32 }
  0x49   : > { %455 = vst [vmem:[#allocation2 + $0xe8] sm:$0xff] %v2108_v32 }
  0x4a   : > { %456 = vst [vmem:[#allocation2 + $0xb8] sm:$0xff] %v2108_v32 }
  0x4b   : > { %457 = vst [vmem:[#allocation2 + $0x60] sm:$0xff] %v2108_v32 }
  0x4c   : > { %458 = vst [vmem:[#allocation2 + $0xf0] sm:$0xff] %v2108_v32 }
  0x4d   : > { %459 = vst [vmem:[#allocation2 + $0x8] sm:$0xff] %v2108_v32 }
  0x4e   : > { %460 = vst [vmem:[#allocation2 + $0x78] sm:$0xff] %v2108_v32 }
  0x4f   : > { %461 = vst [vmem:[#allocation2 + $0x38] sm:$0xff] %v2108_v32 }
  0x50   : > { %462 = vst [vmem:[#allocation2 + $0x58] sm:$0xff] %v2108_v32 }
  0x51   : > { %463 = vst [vmem:[#allocation2 + $0x40] sm:$0xff] %v2108_v32 }
  0x52   : > { %464 = vst [vmem:[#allocation2 + $0xc8] sm:$0xff] %v2108_v32 }
  0x53   : > { %465 = vst [vmem:[#allocation2 + $0xe0] sm:$0xff] %v2108_v32 }
  0x54   : > { %466 = vst [vmem:[#allocation2 + $0x90] sm:$0xff] %v2108_v32 }
  0x55   : > { %467 = vst [vmem:[#allocation2 + $0x70] sm:$0xff] %v2108_v32 }
  0x56   : > { %468 = vst [vmem:[#allocation2 + $0xc0] sm:$0xff] %v2108_v32 }
  0x57   : > { %469 = vst [vmem:[#allocation2 + $0xa8] sm:$0xff] %v2108_v32 }
  0x58   : > { %470 = vst [vmem:[#allocation2 + $0xd0] sm:$0xff] %v2108_v32 }
  0x59   : > { %471 = vst [vmem:[#allocation2 + $0x10] sm:$0xff] %v2108_v32 }
  0x5a   : > { %472 = vst [vmem:[#allocation2 + $0x28] sm:$0xff] %v2108_v32 }
  0x5b   : > { %473 = vst [vmem:[#allocation2 + $0xa0] sm:$0xff] %v2108_v32 }
  0x5c   : > { %474 = vst [vmem:[#allocation2 + $0xf8] sm:$0xff] %v2108_v32 }
  0x5d   : > { %475 = vst [vmem:[#allocation2 + $0x20] sm:$0xff] %v2108_v32 }
  0x5e   : > { %476 = vst [vmem:[#allocation2 + $0x98] sm:$0xff] %v2108_v32 }
  0x5f PF: > { %s1602_s12 = sshll.u32 %s2098_s20, 8  ;;  %v1606_v47 = vld [vmem:[%s2253_s11] sm:$0xf]  ;;  %v1853_v49 = vld [vmem:[%s2253_s11 + $0x4] sm:$0xf0]  ;;  %p1796_p10 = scmp.ne.s32.totalorder %s2098_s20, 1 }
  0x60   : > { %s478_s13 = sshra.s32 %s1602_s12, 3  ;;  %v1670_v50 = vld [vmem:[%s2253_s11 + $0x80] sm:$0xf]  ;;  %v1869_v52 = vld [vmem:[%s2253_s11 + $0x84] sm:$0xf0]  ;;  %v1607_v57 = vor.u32 %v1853_v49, %v1606_v47 }
  0x61   : > { %s1603_s14 = sshll.u32 %s478_s13, 2  ;;  %v1852_v53 = vld [vmem:[%s2253_s11 + $0x4] sm:$0xf]  ;;  %v1608_v54 = vld [vmem:[%s2253_s11 + $0x8] sm:$0xf0]  ;;  %v1671_v58 = vor.u32 %v1869_v52, %v1670_v50 }
  0x62   : > { %s2260_s17 = scalar_lea.vmem %s2623_s1, %s1603_s14  ;;  %v1868_v55 = vld [vmem:[%s2253_s11 + $0x84] sm:$0xf]  ;;  %v1672_v56 = vld [vmem:[%s2253_s11 + $0x88] sm:$0xf0]  ;;  %v1611_v59 = vor.u32 %v1852_v53, %v1608_v54  ;;  %v1614_v61 = vld [vmem:[%s2253_s11 + $0x10] sm:$0xf] }
  0x63   : > { %v1843_v33 = vld [vmem:[%s2260_s17 + $0x38] sm:$0xff]  ;;  %v1842_v35 = vld [vmem:[%s2260_s17 + $0x30] sm:$0xff]  ;;  %v1841_v37 = vld [vmem:[%s2260_s17 + $0x28] sm:$0xff]  ;;  %v1675_v60 = vor.u32 %v1868_v55, %v1672_v56 }
  0x64   : > { %v1851_v34 = vld [vmem:[%s2260_s17 + $0x78] sm:$0xff]  ;;  %834 = vmatpush.bf16.msra.mxu0 %v1843_v33  ;;  %1987 = vmatpush.bf16.msra.mxu2 %v1843_v33  ;;  %v1850_v36 = vld [vmem:[%s2260_s17 + $0x70] sm:$0xff]  ;;  %v1849_v38 = vld [vmem:[%s2260_s17 + $0x68] sm:$0xff] }
  0x65   : > { %923 = vmatpush.bf16.msra.mxu1 %v1851_v34  ;;  %1995 = vmatpush.bf16.msra.mxu3 %v1851_v34  ;;  %v1840_v39 = vld [vmem:[%s2260_s17 + $0x20] sm:$0xff]  ;;  %v1839_v41 = vld [vmem:[%s2260_s17 + $0x18] sm:$0xff]  ;;  %v1838_v43 = vld [vmem:[%s2260_s17 + $0x10] sm:$0xff] }
  0x66   : > { %v1848_v40 = vld [vmem:[%s2260_s17 + $0x60] sm:$0xff]  ;;  %v1847_v42 = vld [vmem:[%s2260_s17 + $0x58] sm:$0xff]  ;;  %v1846_v44 = vld [vmem:[%s2260_s17 + $0x50] sm:$0xff] }
  0x67   : > { %v1837_v45 = vld [vmem:[%s2260_s17 + $0x8] sm:$0xff]  ;;  %v1836_v48 = vld [vmem:[%s2260_s17] sm:$0xff]  ;;  %v1855_v62 = vld [vmem:[%s2253_s11 + $0x14] sm:$0xf0] }
  0x68   : > { %835 = vmatpush.bf16.msra.mxu0 %v1842_v35  ;;  %1988 = vmatpush.bf16.msra.mxu2 %v1842_v35  ;;  %v1845_v46 = vld [vmem:[%s2260_s17 + $0x48] sm:$0xff]  ;;  %v1844_v51 = vld [vmem:[%s2260_s17 + $0x40] sm:$0xff]  ;;  %v1678_v63 = vld [vmem:[%s2253_s11 + $0x90] sm:$0xf]  ;;  %v1615_v5 = vor.u32 %v1855_v62, %v1614_v61 }
  0x69   : > { %924 = vmatpush.bf16.msra.mxu1 %v1850_v36  ;;  %1996 = vmatpush.bf16.msra.mxu3 %v1850_v36  ;;  %v1871_v0 = vld [vmem:[%s2253_s11 + $0x94] sm:$0xf0]  ;;  %v1854_v1 = vld [vmem:[%s2253_s11 + $0x14] sm:$0xf]  ;;  %v1616_v2 = vld [vmem:[%s2253_s11 + $0x18] sm:$0xf0] }
  0x6a   : > { %v1870_v3 = vld [vmem:[%s2253_s11 + $0x94] sm:$0xf]  ;;  %v1680_v4 = vld [vmem:[%s2253_s11 + $0x98] sm:$0xf0]  ;;  %v1679_v6 = vor.u32 %v1871_v0, %v1678_v63  ;;  %v1619_v7 = vor.u32 %v1854_v1, %v1616_v2  ;;  %v1622_v9 = vld [vmem:[%s2253_s11 + $0x20] sm:$0xf] }
  0x6b   : > { %v1683_v8 = vor.u32 %v1870_v3, %v1680_v4  ;;  %v1857_v10 = vld [vmem:[%s2253_s11 + $0x24] sm:$0xf0]  ;;  %v1686_v11 = vld [vmem:[%s2253_s11 + $0xa0] sm:$0xf]  ;;  %v1856_v13 = vld [vmem:[%s2253_s11 + $0x24] sm:$0xf] }
  0x6c   : > { %836 = vmatpush.bf16.msra.mxu0 %v1841_v37  ;;  %1989 = vmatpush.bf16.msra.mxu2 %v1841_v37  ;;  %v1873_v12 = vld [vmem:[%s2253_s11 + $0xa4] sm:$0xf0]  ;;  %v1624_v14 = vld [vmem:[%s2253_s11 + $0x28] sm:$0xf0]  ;;  %v1872_v15 = vld [vmem:[%s2253_s11 + $0xa4] sm:$0xf]  ;;  %v1623_v17 = vor.u32 %v1857_v10, %v1622_v9 }
  0x6d   : > { %925 = vmatpush.bf16.msra.mxu1 %v1849_v38  ;;  %1997 = vmatpush.bf16.msra.mxu3 %v1849_v38  ;;  %v1688_v16 = vld [vmem:[%s2253_s11 + $0xa8] sm:$0xf0]  ;;  %v1687_v18 = vor.u32 %v1873_v12, %v1686_v11  ;;  %v1627_v19 = vor.u32 %v1856_v13, %v1624_v14  ;;  %v1630_v21 = vld [vmem:[%s2253_s11 + $0x30] sm:$0xf]  ;;  %v1859_v22 = vld [vmem:[%s2253_s11 + $0x34] sm:$0xf0] }
  0x6e   : > { %v1691_v20 = vor.u32 %v1872_v15, %v1688_v16  ;;  %v1694_v23 = vld [vmem:[%s2253_s11 + $0xb0] sm:$0xf]  ;;  %v1875_v24 = vld [vmem:[%s2253_s11 + $0xb4] sm:$0xf0]  ;;  %v1858_v25 = vld [vmem:[%s2253_s11 + $0x34] sm:$0xf]  ;;  %v1631_v29 = vor.u32 %v1859_v22, %v1630_v21 }
  0x6f   : > { %v1632_v26 = vld [vmem:[%s2253_s11 + $0x38] sm:$0xf0]  ;;  %v1874_v27 = vld [vmem:[%s2253_s11 + $0xb4] sm:$0xf]  ;;  %v1695_v30 = vor.u32 %v1875_v24, %v1694_v23  ;;  %v1638_v33 = vld [vmem:[%s2253_s11 + $0x40] sm:$0xf] }
  0x70   : > { %837 = vmatpush.bf16.msra.mxu0 %v1840_v39  ;;  %1990 = vmatpush.bf16.msra.mxu2 %v1840_v39  ;;  %v1696_v28 = vld [vmem:[%s2253_s11 + $0xb8] sm:$0xf0]  ;;  %v1635_v31 = vor.u32 %v1858_v25, %v1632_v26  ;;  %v1861_v34 = vld [vmem:[%s2253_s11 + $0x44] sm:$0xf0]  ;;  %v1702_v35 = vld [vmem:[%s2253_s11 + $0xc0] sm:$0xf] }
  0x71   : > { %926 = vmatpush.bf16.msra.mxu1 %v1848_v40  ;;  %1998 = vmatpush.bf16.msra.mxu3 %v1848_v40  ;;  %v1699_v32 = vor.u32 %v1874_v27, %v1696_v28  ;;  %v1877_v36 = vld [vmem:[%s2253_s11 + $0xc4] sm:$0xf0]  ;;  %v1860_v37 = vld [vmem:[%s2253_s11 + $0x44] sm:$0xf]  ;;  %v1640_v38 = vld [vmem:[%s2253_s11 + $0x48] sm:$0xf0] }
  0x72   : > { %v1876_v39 = vld [vmem:[%s2253_s11 + $0xc4] sm:$0xf]  ;;  %v1704_v40 = vld [vmem:[%s2253_s11 + $0xc8] sm:$0xf0]  ;;  %v1710_v47 = vld [vmem:[%s2253_s11 + $0xd0] sm:$0xf] }
  0x73   : > { %v1862_v49 = vld [vmem:[%s2253_s11 + $0x54] sm:$0xf]  ;;  %v1648_v50 = vld [vmem:[%s2253_s11 + $0x58] sm:$0xf0]  ;;  %v1864_v61 = vld [vmem:[%s2253_s11 + $0x64] sm:$0xf] }
  0x74   : > { %838 = vmatpush.bf16.msra.mxu0 %v1839_v41  ;;  %1991 = vmatpush.bf16.msra.mxu2 %v1839_v41  ;;  %v1639_v41 = vor.u32 %v1861_v34, %v1638_v33  ;;  %v1712_v52 = vld [vmem:[%s2253_s11 + $0xd8] sm:$0xf0]  ;;  %v1651_v55 = vor.u32 %v1862_v49, %v1648_v50  ;;  %v1656_v62 = vld [vmem:[%s2253_s11 + $0x68] sm:$0xf0]  ;;  %v1880_v63 = vld [vmem:[%s2253_s11 + $0xe4] sm:$0xf] }
  0x75   : > { %927 = vmatpush.bf16.msra.mxu1 %v1847_v42  ;;  %1999 = vmatpush.bf16.msra.mxu3 %v1847_v42  ;;  %v1703_v42 = vor.u32 %v1877_v36, %v1702_v35  ;;  %v1720_v0 = vld [vmem:[%s2253_s11 + $0xe8] sm:$0xf0]  ;;  %v1659_v3 = vor.u32 %v1864_v61, %v1656_v62  ;;  %v1866_v9 = vld [vmem:[%s2253_s11 + $0x74] sm:$0xf]  ;;  %v1664_v10 = vld [vmem:[%s2253_s11 + $0x78] sm:$0xf0] }
  0x76   : > { %v1723_v4 = vor.u32 %v1880_v63, %v1720_v0  ;;  %v1882_v11 = vld [vmem:[%s2253_s11 + $0xf4] sm:$0xf]  ;;  %v1728_v12 = vld [vmem:[%s2253_s11 + $0xf8] sm:$0xf0]  ;;  %v1667_v15 = vor.u32 %v1866_v9, %v1664_v10  ;;  %v515_v27 = vld [vmem:[#allocation2] sm:$0xff] }
  0x77   : > { %v1731_v16 = vor.u32 %v1882_v11, %v1728_v12  ;;  %v530_v23 = vld [vmem:[#allocation2 + $0x38] sm:$0xff]  ;;  %v534_v63 = vld [vmem:[#allocation2 + $0xe0] sm:$0xff]  ;;  %v535_v9 = vld [vmem:[#allocation2 + $0x90] sm:$0xff] }
  0x78   : > { %839 = vmatpush.bf16.msra.mxu0 %v1838_v43  ;;  %1992 = vmatpush.bf16.msra.mxu2 %v1838_v43  ;;  %v1643_v43 = vor.u32 %v1860_v37, %v1640_v38  ;;  %v531_v33 = vld [vmem:[#allocation2 + $0x58] sm:$0xff] }
  0x79   : > { %928 = vmatpush.bf16.msra.mxu1 %v1846_v44  ;;  %2000 = vmatpush.bf16.msra.mxu3 %v1846_v44  ;;  %v1707_v44 = vor.u32 %v1876_v39, %v1704_v40  ;;  %v516_v37 = vld [vmem:[#allocation2 + $0xd8] sm:$0xff] }
  0x7c   : > { %840 = vmatpush.bf16.msra.mxu0 %v1837_v45  ;;  %1993 = vmatpush.bf16.msra.mxu2 %v1837_v45  ;;  %v1646_v45 = vld [vmem:[%s2253_s11 + $0x50] sm:$0xf] }
  0x7d   : > { %929 = vmatpush.bf16.msra.mxu1 %v1845_v46  ;;  %2001 = vmatpush.bf16.msra.mxu3 %v1845_v46  ;;  %v1863_v46 = vld [vmem:[%s2253_s11 + $0x54] sm:$0xf0] }
  0x7e   : > { %v1647_v53 = vor.u32 %v1863_v46, %v1646_v45 }
  0x80   : > { %841 = vmatpush.bf16.msra.mxu0 %v1836_v48  ;;  %1994 = vmatpush.bf16.msra.mxu2 %v1836_v48  ;;  %v1879_v48 = vld [vmem:[%s2253_s11 + $0xd4] sm:$0xf0] }
  0x81   : > { %930 = vmatpush.bf16.msra.mxu1 %v1844_v51  ;;  %2002 = vmatpush.bf16.msra.mxu3 %v1844_v51  ;;  %v1878_v51 = vld [vmem:[%s2253_s11 + $0xd4] sm:$0xf]  ;;  %v1711_v54 = vor.u32 %v1879_v48, %v1710_v47  ;;  %v517_v47 = vld [vmem:[#allocation2 + $0x18] sm:$0xff] }
  0x82   : > { %v1715_v56 = vor.u32 %v1878_v51, %v1712_v52 }
  0x83   : > { %842 = vmatmul.bf16.vlgmr.msra.gmra.mxu0 %v1607_v57  ;;  %882 = vmatmul.bf16.vlgmr.msra.gmra.mxu2 %v1671_v58  ;;  %v1654_v57 = vld [vmem:[%s2253_s11 + $0x60] sm:$0xf]  ;;  %v1865_v58 = vld [vmem:[%s2253_s11 + $0x64] sm:$0xf0] }
  0x84   : > { %931 = vmatmul.bf16.vlgmr.msra.gmra.mxu1 %v1611_v59  ;;  %971 = vmatmul.bf16.vlgmr.msra.gmra.mxu3 %v1675_v60  ;;  %v1718_v59 = vld [vmem:[%s2253_s11 + $0xe0] sm:$0xf]  ;;  %v1881_v60 = vld [vmem:[%s2253_s11 + $0xe4] sm:$0xf0]  ;;  %v1655_v1 = vor.u32 %v1865_v58, %v1654_v57  ;;  %v518_v57 = vld [vmem:[#allocation2 + $0x50] sm:$0xff] }
  0x85   : > { %v1719_v2 = vor.u32 %v1881_v60, %v1718_v59 }
  0x93   : > { %847 = vmatmul.bf16.gmra.mxu0 %v1615_v5  ;;  %887 = vmatmul.bf16.gmra.mxu2 %v1679_v6  ;;  %v1662_v5 = vld [vmem:[%s2253_s11 + $0x70] sm:$0xf]  ;;  %v1867_v6 = vld [vmem:[%s2253_s11 + $0x74] sm:$0xf0] }
  0x94   : > { %936 = vmatmul.bf16.gmra.mxu1 %v1619_v7  ;;  %976 = vmatmul.bf16.gmra.mxu3 %v1683_v8  ;;  %v1726_v7 = vld [vmem:[%s2253_s11 + $0xf0] sm:$0xf]  ;;  %v1883_v8 = vld [vmem:[%s2253_s11 + $0xf4] sm:$0xf0]  ;;  %v1663_v13 = vor.u32 %v1867_v6, %v1662_v5 }
  0x95   : > { %v1727_v14 = vor.u32 %v1883_v8, %v1726_v7 }
  0xa3   : > { %852 = vmatmul.bf16.gmra.mxu0 %v1623_v17  ;;  %892 = vmatmul.bf16.gmra.mxu2 %v1687_v18  ;;  %v514_v18 = vld [vmem:[#allocation2 + $0xb0] sm:$0xff] }
  0xa4   : > { %941 = vmatmul.bf16.gmra.mxu1 %v1627_v19  ;;  %981 = vmatmul.bf16.gmra.mxu3 %v1691_v20 }
  0xb3   : > { %857 = vmatmul.bf16.gmra.mxu0 %v1631_v29  ;;  %897 = vmatmul.bf16.gmra.mxu2 %v1695_v30 }
  0xb4   : > { %946 = vmatmul.bf16.gmra.mxu1 %v1635_v31  ;;  %986 = vmatmul.bf16.gmra.mxu3 %v1699_v32 }
  0xc3   : > { %862 = vmatmul.bf16.gmra.mxu0 %v1639_v41  ;;  %902 = vmatmul.bf16.gmra.mxu2 %v1703_v42 }
  0xc4   : > { %951 = vmatmul.bf16.gmra.mxu1 %v1643_v43  ;;  %991 = vmatmul.bf16.gmra.mxu3 %v1707_v44  ;;  %v532_v43 = vld [vmem:[#allocation2 + $0x40] sm:$0xff] }
  0xd3   : > { %867 = vmatmul.bf16.gmra.mxu0 %v1647_v53  ;;  %907 = vmatmul.bf16.gmra.mxu2 %v1711_v54  ;;  %v533_v53 = vld [vmem:[#allocation2 + $0xc8] sm:$0xff] }
  0xd4   : > { %956 = vmatmul.bf16.gmra.mxu1 %v1651_v55  ;;  %996 = vmatmul.bf16.gmra.mxu3 %v1715_v56 }
  0xe3   : > { %872 = vmatmul.bf16.gmra.mxu0 %v1655_v1  ;;  %912 = vmatmul.bf16.gmra.mxu2 %v1719_v2 }
  0xe4   : > { %961 = vmatmul.bf16.gmra.mxu1 %v1659_v3  ;;  %1001 = vmatmul.bf16.gmra.mxu3 %v1723_v4  ;;  %v519_v3 = vld [vmem:[#allocation2 + $0x68] sm:$0xff] }
  0xf3   : > { %877 = vmatmul.bf16.gmra.mxu0 %v1663_v13  ;;  %917 = vmatmul.bf16.gmra.mxu2 %v1727_v14  ;;  %v520_v13 = vld [vmem:[#allocation2 + $0x30] sm:$0xff] }
  0xf4   : > { %966 = vmatmul.bf16.gmra.mxu1 %v1667_v15  ;;  %1006 = vmatmul.bf16.gmra.mxu3 %v1731_v16 }
 0x100   : > { %v843_v17 = vpop.f32.mrf.mxu0 }
 0x101   : > { %v932_v19 = vpop.f32.mrf.mxu1 }
 0x102   : > { %v933_v20 = vadd.f32 %v932_v19, %v843_v17  ;;  %v536_v19 = vld [vmem:[#allocation2 + $0x70] sm:$0xff] }
 0x104   : > { %v1012_v21 = vadd.f32 %v933_v20, %v514_v18 }
 0x106   : > { %1044 = vst [vmem:[#allocation2 + $0xb0] sm:$0xff] %v1012_v21  ;;  %v883_v22 = vpop.f32.mrf.mxu2 }
 0x107   : > { %v972_v24 = vpop.f32.mrf.mxu3 }
 0x108   : > { %v973_v25 = vadd.f32 %v972_v24, %v883_v22  ;;  %v845_v26 = vpop.f32.mrf.mxu0 }
 0x109   : > { %v934_v28 = vpop.f32.mrf.mxu1 }
 0x10a   : > { %v1028_v29 = vadd.f32 %v973_v25, %v530_v23  ;;  %v935_v30 = vadd.f32 %v934_v28, %v845_v26  ;;  %v521_v23 = vld [vmem:[#allocation2 + $0x48] sm:$0xff] }
 0x10c   : > { %1060 = vst [vmem:[#allocation2 + $0x38] sm:$0xff] %v1028_v29  ;;  %v1013_v31 = vadd.f32 %v935_v30, %v515_v27  ;;  %v537_v29 = vld [vmem:[#allocation2 + $0xc0] sm:$0xff] }
 0x10e   : > { %1045 = vst [vmem:[#allocation2] sm:$0xff] %v1013_v31  ;;  %v885_v32 = vpop.f32.mrf.mxu2 }
 0x10f   : > { %v974_v34 = vpop.f32.mrf.mxu3 }
 0x110   : > { %v975_v35 = vadd.f32 %v974_v34, %v885_v32  ;;  %v848_v36 = vpop.f32.mrf.mxu0 }
 0x111   : > { %v937_v38 = vpop.f32.mrf.mxu1 }
 0x112   : > { %v1029_v39 = vadd.f32 %v975_v35, %v531_v33  ;;  %v938_v40 = vadd.f32 %v937_v38, %v848_v36  ;;  %v522_v33 = vld [vmem:[#allocation2 + $0x80] sm:$0xff] }
 0x114   : > { %1061 = vst [vmem:[#allocation2 + $0x58] sm:$0xff] %v1029_v39  ;;  %v1014_v41 = vadd.f32 %v938_v40, %v516_v37  ;;  %v538_v39 = vld [vmem:[#allocation2 + $0xa8] sm:$0xff] }
 0x116   : > { %1046 = vst [vmem:[#allocation2 + $0xd8] sm:$0xff] %v1014_v41  ;;  %v888_v42 = vpop.f32.mrf.mxu2 }
 0x117   : > { %v977_v44 = vpop.f32.mrf.mxu3 }
 0x118   : > { %v978_v45 = vadd.f32 %v977_v44, %v888_v42  ;;  %v850_v46 = vpop.f32.mrf.mxu0 }
 0x119   : > { %v939_v48 = vpop.f32.mrf.mxu1 }
 0x11a   : > { %v1030_v49 = vadd.f32 %v978_v45, %v532_v43  ;;  %v940_v50 = vadd.f32 %v939_v48, %v850_v46  ;;  %v523_v43 = vld [vmem:[#allocation2 + $0x88] sm:$0xff] }
 0x11c   : > { %1062 = vst [vmem:[#allocation2 + $0x40] sm:$0xff] %v1030_v49  ;;  %v1015_v51 = vadd.f32 %v940_v50, %v517_v47  ;;  %v539_v49 = vld [vmem:[#allocation2 + $0xd0] sm:$0xff] }
 0x11e   : > { %1047 = vst [vmem:[#allocation2 + $0x18] sm:$0xff] %v1015_v51  ;;  %v890_v52 = vpop.f32.mrf.mxu2 }
 0x11f   : > { %v979_v54 = vpop.f32.mrf.mxu3 }
 0x120   : > { %v980_v55 = vadd.f32 %v979_v54, %v890_v52  ;;  %v853_v56 = vpop.f32.mrf.mxu0 }
 0x121   : > { %v942_v58 = vpop.f32.mrf.mxu1 }
 0x122   : > { %v1031_v59 = vadd.f32 %v980_v55, %v533_v53  ;;  %v943_v60 = vadd.f32 %v942_v58, %v853_v56  ;;  %v524_v53 = vld [vmem:[#allocation2 + $0xe8] sm:$0xff] }
 0x124   : > { %1063 = vst [vmem:[#allocation2 + $0xc8] sm:$0xff] %v1031_v59  ;;  %v1016_v61 = vadd.f32 %v943_v60, %v518_v57  ;;  %v540_v59 = vld [vmem:[#allocation2 + $0x10] sm:$0xff] }
 0x126   : > { %1048 = vst [vmem:[#allocation2 + $0x50] sm:$0xff] %v1016_v61  ;;  %v893_v62 = vpop.f32.mrf.mxu2 }
 0x127   : > { %v982_v0 = vpop.f32.mrf.mxu3 }
 0x128   : > { %v983_v1 = vadd.f32 %v982_v0, %v893_v62  ;;  %v855_v2 = vpop.f32.mrf.mxu0 }
 0x129   : > { %v944_v4 = vpop.f32.mrf.mxu1 }
 0x12a   : > { %v1032_v5 = vadd.f32 %v983_v1, %v534_v63  ;;  %v945_v6 = vadd.f32 %v944_v4, %v855_v2  ;;  %v525_v63 = vld [vmem:[#allocation2 + $0xb8] sm:$0xff] }
 0x12c   : > { %1064 = vst [vmem:[#allocation2 + $0xe0] sm:$0xff] %v1032_v5  ;;  %v1017_v7 = vadd.f32 %v945_v6, %v519_v3  ;;  %v541_v5 = vld [vmem:[#allocation2 + $0x28] sm:$0xff] }
 0x12e   : > { %1049 = vst [vmem:[#allocation2 + $0x68] sm:$0xff] %v1017_v7  ;;  %v895_v8 = vpop.f32.mrf.mxu2 }
 0x12f   : > { %v984_v10 = vpop.f32.mrf.mxu3 }
 0x130   : > { %v985_v11 = vadd.f32 %v984_v10, %v895_v8  ;;  %v858_v12 = vpop.f32.mrf.mxu0 }
 0x131   : > { %v947_v14 = vpop.f32.mrf.mxu1 }
 0x132   : > { %v1033_v15 = vadd.f32 %v985_v11, %v535_v9  ;;  %v948_v16 = vadd.f32 %v947_v14, %v858_v12  ;;  %v526_v9 = vld [vmem:[#allocation2 + $0x60] sm:$0xff] }
 0x134   : > { %1065 = vst [vmem:[#allocation2 + $0x90] sm:$0xff] %v1033_v15  ;;  %v1018_v17 = vadd.f32 %v948_v16, %v520_v13  ;;  %v542_v15 = vld [vmem:[#allocation2 + $0xa0] sm:$0xff] }
 0x136   : > { %1050 = vst [vmem:[#allocation2 + $0x30] sm:$0xff] %v1018_v17  ;;  %v898_v18 = vpop.f32.mrf.mxu2 }
 0x137   : > { %v987_v20 = vpop.f32.mrf.mxu3 }
 0x138   : > { %v988_v21 = vadd.f32 %v987_v20, %v898_v18  ;;  %v860_v22 = vpop.f32.mrf.mxu0 }
 0x139   : > { %v949_v24 = vpop.f32.mrf.mxu1 }
 0x13a   : > { %v1034_v25 = vadd.f32 %v988_v21, %v536_v19  ;;  %v950_v26 = vadd.f32 %v949_v24, %v860_v22  ;;  %v527_v19 = vld [vmem:[#allocation2 + $0xf0] sm:$0xff] }
 0x13c   : > { %1066 = vst [vmem:[#allocation2 + $0x70] sm:$0xff] %v1034_v25  ;;  %v1019_v27 = vadd.f32 %v950_v26, %v521_v23  ;;  %v543_v25 = vld [vmem:[#allocation2 + $0xf8] sm:$0xff] }
 0x13e   : > { %1051 = vst [vmem:[#allocation2 + $0x48] sm:$0xff] %v1019_v27  ;;  %v900_v28 = vpop.f32.mrf.mxu2 }
 0x13f   : > { %v989_v30 = vpop.f32.mrf.mxu3 }
 0x140   : > { %v990_v31 = vadd.f32 %v989_v30, %v900_v28  ;;  %v863_v32 = vpop.f32.mrf.mxu0 }
 0x141   : > { %v952_v34 = vpop.f32.mrf.mxu1 }
 0x142   : > { %v1035_v35 = vadd.f32 %v990_v31, %v537_v29  ;;  %v953_v36 = vadd.f32 %v952_v34, %v863_v32  ;;  %v528_v29 = vld [vmem:[#allocation2 + $0x8] sm:$0xff] }
 0x144   : > { %1067 = vst [vmem:[#allocation2 + $0xc0] sm:$0xff] %v1035_v35  ;;  %v1020_v37 = vadd.f32 %v953_v36, %v522_v33  ;;  %v544_v35 = vld [vmem:[#allocation2 + $0x20] sm:$0xff] }
 0x146   : > { %1052 = vst [vmem:[#allocation2 + $0x80] sm:$0xff] %v1020_v37  ;;  %v903_v38 = vpop.f32.mrf.mxu2 }
 0x147   : > { %v992_v40 = vpop.f32.mrf.mxu3 }
 0x148   : > { %v993_v41 = vadd.f32 %v992_v40, %v903_v38  ;;  %v865_v42 = vpop.f32.mrf.mxu0 }
 0x149   : > { %v954_v44 = vpop.f32.mrf.mxu1 }
 0x14a   : > { %v1036_v45 = vadd.f32 %v993_v41, %v538_v39  ;;  %v955_v46 = vadd.f32 %v954_v44, %v865_v42  ;;  %v529_v39 = vld [vmem:[#allocation2 + $0x78] sm:$0xff] }
 0x14c   : > { %1068 = vst [vmem:[#allocation2 + $0xa8] sm:$0xff] %v1036_v45  ;;  %v1021_v47 = vadd.f32 %v955_v46, %v523_v43  ;;  %v545_v45 = vld [vmem:[#allocation2 + $0x98] sm:$0xff] }
 0x14e   : > { %1053 = vst [vmem:[#allocation2 + $0x88] sm:$0xff] %v1021_v47  ;;  %v905_v48 = vpop.f32.mrf.mxu2 }
 0x14f   : > { %v994_v50 = vpop.f32.mrf.mxu3 }
 0x150   : > { %v995_v51 = vadd.f32 %v994_v50, %v905_v48  ;;  %v868_v52 = vpop.f32.mrf.mxu0 }
 0x151   : > { %v957_v54 = vpop.f32.mrf.mxu1 }
 0x152   : > { %v1037_v55 = vadd.f32 %v995_v51, %v539_v49  ;;  %v958_v56 = vadd.f32 %v957_v54, %v868_v52 }
 0x154   : > { %1069 = vst [vmem:[#allocation2 + $0xd0] sm:$0xff] %v1037_v55  ;;  %v1022_v57 = vadd.f32 %v958_v56, %v524_v53 }
 0x156   : > { %1054 = vst [vmem:[#allocation2 + $0xe8] sm:$0xff] %v1022_v57  ;;  %v908_v58 = vpop.f32.mrf.mxu2 }
 0x157   : > { %v997_v60 = vpop.f32.mrf.mxu3 }
 0x158   : > { %v998_v61 = vadd.f32 %v997_v60, %v908_v58  ;;  %v870_v62 = vpop.f32.mrf.mxu0 }
 0x159   : > { %v959_v0 = vpop.f32.mrf.mxu1 }
 0x15a   : > { %v1038_v1 = vadd.f32 %v998_v61, %v540_v59  ;;  %v960_v2 = vadd.f32 %v959_v0, %v870_v62 }
 0x15c   : > { %1070 = vst [vmem:[#allocation2 + $0x10] sm:$0xff] %v1038_v1  ;;  %v1023_v3 = vadd.f32 %v960_v2, %v525_v63 }
 0x15e   : > { %1055 = vst [vmem:[#allocation2 + $0xb8] sm:$0xff] %v1023_v3  ;;  %v910_v4 = vpop.f32.mrf.mxu2 }
 0x15f   : > { %v999_v6 = vpop.f32.mrf.mxu3 }
 0x160   : > { %v1000_v7 = vadd.f32 %v999_v6, %v910_v4  ;;  %v873_v8 = vpop.f32.mrf.mxu0 }
 0x161   : > { %v962_v10 = vpop.f32.mrf.mxu1 }
 0x162   : > { %v1039_v11 = vadd.f32 %v1000_v7, %v541_v5  ;;  %v963_v12 = vadd.f32 %v962_v10, %v873_v8 }
 0x164   : > { %1071 = vst [vmem:[#allocation2 + $0x28] sm:$0xff] %v1039_v11  ;;  %v1024_v13 = vadd.f32 %v963_v12, %v526_v9 }
 0x166   : > { %1056 = vst [vmem:[#allocation2 + $0x60] sm:$0xff] %v1024_v13  ;;  %v913_v14 = vpop.f32.mrf.mxu2 }
 0x167   : > { %v1002_v16 = vpop.f32.mrf.mxu3 }
 0x168   : > { %v1003_v17 = vadd.f32 %v1002_v16, %v913_v14  ;;  %v875_v18 = vpop.f32.mrf.mxu0 }
 0x169   : > { %v964_v20 = vpop.f32.mrf.mxu1 }
 0x16a   : > { %v1040_v21 = vadd.f32 %v1003_v17, %v542_v15  ;;  %v965_v22 = vadd.f32 %v964_v20, %v875_v18 }
 0x16c   : > { %1072 = vst [vmem:[#allocation2 + $0xa0] sm:$0xff] %v1040_v21  ;;  %v1025_v23 = vadd.f32 %v965_v22, %v527_v19 }
 0x16e   : > { %1057 = vst [vmem:[#allocation2 + $0xf0] sm:$0xff] %v1025_v23  ;;  %v915_v24 = vpop.f32.mrf.mxu2 }
 0x16f   : > { %v1004_v26 = vpop.f32.mrf.mxu3 }
 0x170   : > { %v1005_v27 = vadd.f32 %v1004_v26, %v915_v24  ;;  %v878_v28 = vpop.f32.mrf.mxu0 }
 0x171   : > { %v967_v30 = vpop.f32.mrf.mxu1 }
 0x172   : > { %v1041_v31 = vadd.f32 %v1005_v27, %v543_v25  ;;  %v968_v32 = vadd.f32 %v967_v30, %v878_v28 }
 0x174   : > { %1073 = vst [vmem:[#allocation2 + $0xf8] sm:$0xff] %v1041_v31  ;;  %v1026_v33 = vadd.f32 %v968_v32, %v528_v29 }
 0x176   : > { %1058 = vst [vmem:[#allocation2 + $0x8] sm:$0xff] %v1026_v33  ;;  %v918_v34 = vpop.f32.mrf.mxu2 }
 0x177   : > { %v1007_v36 = vpop.f32.mrf.mxu3 }
 0x178   : > { %v1008_v37 = vadd.f32 %v1007_v36, %v918_v34  ;;  %v880_v38 = vpop.f32.mrf.mxu0 }
 0x179   : > { %v969_v40 = vpop.f32.mrf.mxu1 }
 0x17a   : > { %v1042_v41 = vadd.f32 %v1008_v37, %v544_v35  ;;  %v970_v42 = vadd.f32 %v969_v40, %v880_v38 }
 0x17c   : > { %1074 = vst [vmem:[#allocation2 + $0x20] sm:$0xff] %v1042_v41  ;;  %v1027_v43 = vadd.f32 %v970_v42, %v529_v39 }
 0x17e   : > { %1059 = vst [vmem:[#allocation2 + $0x78] sm:$0xff] %v1027_v43  ;;  %v920_v44 = vpop.f32.mrf.mxu2 }
 0x17f   : > { %v1009_v46 = vpop.f32.mrf.mxu3 }
 0x180   : > { %v1010_v47 = vadd.f32 %v1009_v46, %v920_v44  ;;  %1079 = sbr.rel (%p1796_p10) target bundleno = 714 (0x2ca), region = 82 }
 0x182   : > { %v1043_v48 = vadd.f32 %v1010_v47, %v545_v45 }
 0x184   : > { %1075 = vst [vmem:[#allocation2 + $0x98] sm:$0xff] %v1043_v48 }
 0x185   : > { %v1891_v49 = vld [vmem:[%s2624_s2 + $0x38] sm:$0xff]  ;;  %v1890_v50 = vld [vmem:[%s2624_s2 + $0x30] sm:$0xff]  ;;  %v1889_v51 = vld [vmem:[%s2624_s2 + $0x28] sm:$0xff] }
 0x186   : > { %1192 = vmatpush.bf16.msra.mxu0 %v1891_v49  ;;  %2003 = vmatpush.bf16.msra.mxu1 %v1891_v49  ;;  %v1888_v52 = vld [vmem:[%s2624_s2 + $0x20] sm:$0xff]  ;;  %v1887_v53 = vld [vmem:[%s2624_s2 + $0x18] sm:$0xff]  ;;  %v1886_v54 = vld [vmem:[%s2624_s2 + $0x10] sm:$0xff] }
 0x187   : > { %2004 = vmatpush.bf16.msra.mxu2 %v1891_v49  ;;  %2005 = vmatpush.bf16.msra.mxu3 %v1891_v49  ;;  %v1885_v55 = vld [vmem:[%s2624_s2 + $0x8] sm:$0xff]  ;;  %v1884_v56 = vld [vmem:[%s2624_s2] sm:$0xff]  ;;  %v1080_v57 = vld [vmem:[#allocation2 + $0xb0] sm:$0xff] }
 0x188   : > { %v1081_v58 = vld [vmem:[#allocation2] sm:$0xff]  ;;  %v1089_v60 = vld [vmem:[#allocation2 + $0x88] sm:$0xff]  ;;  %v1096_v61 = vld [vmem:[#allocation2 + $0x38] sm:$0xff] }
 0x189   : > { %v1088_v59 = vld [vmem:[#allocation2 + $0x80] sm:$0xff]  ;;  %v1097_v62 = vld [vmem:[#allocation2 + $0x58] sm:$0xff]  ;;  %v1104_v63 = vld [vmem:[#allocation2 + $0xa8] sm:$0xff]  ;;  %v1112_v1 = vpack.c.bf16 %v1081_v58, %v1080_v57 }
 0x18a   : > { %1193 = vmatpush.bf16.msra.mxu0 %v1890_v50  ;;  %2006 = vmatpush.bf16.msra.mxu1 %v1890_v50  ;;  %v1105_v0 = vld [vmem:[#allocation2 + $0xd0] sm:$0xff]  ;;  %v1116_v2 = vpack.c.bf16 %v1089_v60, %v1088_v59  ;;  %v1120_v3 = vpack.c.bf16 %v1097_v62, %v1096_v61  ;;  %v1082_v5 = vld [vmem:[#allocation2 + $0xd8] sm:$0xff]  ;;  %v1090_v7 = vld [vmem:[#allocation2 + $0xe8] sm:$0xff] }
 0x18b   : > { %2007 = vmatpush.bf16.msra.mxu2 %v1890_v50  ;;  %2008 = vmatpush.bf16.msra.mxu3 %v1890_v50  ;;  %v1124_v4 = vpack.c.bf16 %v1105_v0, %v1104_v63  ;;  %v1083_v6 = vld [vmem:[#allocation2 + $0x18] sm:$0xff]  ;;  %v1098_v9 = vld [vmem:[#allocation2 + $0x40] sm:$0xff]  ;;  %v1099_v10 = vld [vmem:[#allocation2 + $0xc8] sm:$0xff] }
 0x18c   : > { %v1091_v8 = vld [vmem:[#allocation2 + $0xb8] sm:$0xff]  ;;  %v1106_v11 = vld [vmem:[#allocation2 + $0x10] sm:$0xff]  ;;  %v1107_v12 = vld [vmem:[#allocation2 + $0x28] sm:$0xff]  ;;  %v1113_v13 = vpack.c.bf16 %v1083_v6, %v1082_v5  ;;  %v1121_v15 = vpack.c.bf16 %v1099_v10, %v1098_v9 }
 0x18d   : > { %v1117_v14 = vpack.c.bf16 %v1091_v8, %v1090_v7  ;;  %v1125_v16 = vpack.c.bf16 %v1107_v12, %v1106_v11  ;;  %v1084_v17 = vld [vmem:[#allocation2 + $0x50] sm:$0xff]  ;;  %v1085_v18 = vld [vmem:[#allocation2 + $0x68] sm:$0xff]  ;;  %v1092_v19 = vld [vmem:[#allocation2 + $0x60] sm:$0xff] }
 0x18e   : > { %1194 = vmatpush.bf16.msra.mxu0 %v1889_v51  ;;  %2009 = vmatpush.bf16.msra.mxu1 %v1889_v51  ;;  %v1093_v20 = vld [vmem:[#allocation2 + $0xf0] sm:$0xff]  ;;  %v1100_v21 = vld [vmem:[#allocation2 + $0xe0] sm:$0xff]  ;;  %v1109_v24 = vld [vmem:[#allocation2 + $0xf8] sm:$0xff]  ;;  %v1114_v25 = vpack.c.bf16 %v1085_v18, %v1084_v17 }
 0x18f   : > { %2010 = vmatpush.bf16.msra.mxu2 %v1889_v51  ;;  %2011 = vmatpush.bf16.msra.mxu3 %v1889_v51  ;;  %v1101_v22 = vld [vmem:[#allocation2 + $0x90] sm:$0xff]  ;;  %v1108_v23 = vld [vmem:[#allocation2 + $0xa0] sm:$0xff]  ;;  %v1118_v26 = vpack.c.bf16 %v1093_v20, %v1092_v19  ;;  %v1087_v30 = vld [vmem:[#allocation2 + $0x48] sm:$0xff] }
 0x190   : > { %v1122_v27 = vpack.c.bf16 %v1101_v22, %v1100_v21  ;;  %v1126_v28 = vpack.c.bf16 %v1109_v24, %v1108_v23  ;;  %v1086_v29 = vld [vmem:[#allocation2 + $0x30] sm:$0xff]  ;;  %v1094_v31 = vld [vmem:[#allocation2 + $0x8] sm:$0xff]  ;;  %v1095_v32 = vld [vmem:[#allocation2 + $0x78] sm:$0xff] }
 0x191   : > { %v1102_v33 = vld [vmem:[#allocation2 + $0x70] sm:$0xff]  ;;  %v1103_v34 = vld [vmem:[#allocation2 + $0xc0] sm:$0xff]  ;;  %v1111_v36 = vld [vmem:[#allocation2 + $0x98] sm:$0xff]  ;;  %v1115_v37 = vpack.c.bf16 %v1087_v30, %v1086_v29  ;;  %v1119_v38 = vpack.c.bf16 %v1095_v32, %v1094_v31 }
 0x192   : > { %1195 = vmatpush.bf16.msra.mxu0 %v1888_v52  ;;  %2012 = vmatpush.bf16.msra.mxu1 %v1888_v52  ;;  %v1110_v35 = vld [vmem:[#allocation2 + $0x20] sm:$0xff]  ;;  %v1123_v39 = vpack.c.bf16 %v1103_v34, %v1102_v33 }
 0x193   : > { %2013 = vmatpush.bf16.msra.mxu2 %v1888_v52  ;;  %2014 = vmatpush.bf16.msra.mxu3 %v1888_v52  ;;  %v1127_v40 = vpack.c.bf16 %v1111_v36, %v1110_v35  ;;  %v1377_v42 = vld [vmem:[%s2625_s3] sm:$0xff] }
 0x194   : > { %v1385_v44 = vld [vmem:[%s2625_s3 + $0x40] sm:$0xff] }
 0x196   : > { %1196 = vmatpush.bf16.msra.mxu0 %v1887_v53  ;;  %2015 = vmatpush.bf16.msra.mxu1 %v1887_v53 }
 0x197   : > { %2016 = vmatpush.bf16.msra.mxu2 %v1887_v53  ;;  %2017 = vmatpush.bf16.msra.mxu3 %v1887_v53 }
 0x19a   : > { %1197 = vmatpush.bf16.msra.mxu0 %v1886_v54  ;;  %2018 = vmatpush.bf16.msra.mxu1 %v1886_v54 }
 0x19b   : > { %2019 = vmatpush.bf16.msra.mxu2 %v1886_v54  ;;  %2020 = vmatpush.bf16.msra.mxu3 %v1886_v54 }
 0x19e   : > { %1198 = vmatpush.bf16.msra.mxu0 %v1885_v55  ;;  %2021 = vmatpush.bf16.msra.mxu1 %v1885_v55 }
 0x19f   : > { %2022 = vmatpush.bf16.msra.mxu2 %v1885_v55  ;;  %2023 = vmatpush.bf16.msra.mxu3 %v1885_v55 }
 0x1a2   : > { %1199 = vmatpush.bf16.msra.mxu0 %v1884_v56  ;;  %2024 = vmatpush.bf16.msra.mxu1 %v1884_v56 }
 0x1a3   : > { %2025 = vmatpush.bf16.msra.mxu2 %v1884_v56  ;;  %2026 = vmatpush.bf16.msra.mxu3 %v1884_v56 }
 0x1a5   : > { %1200 = vmatmul.bf16.vlgmr.msra.gmra.mxu0 %v1112_v1  ;;  %1220 = vmatmul.bf16.vlgmr.msra.gmra.mxu1 %v1116_v2 }
 0x1a6   : > { %1240 = vmatmul.bf16.vlgmr.msra.gmra.mxu2 %v1120_v3  ;;  %1260 = vmatmul.bf16.vlgmr.msra.gmra.mxu3 %v1124_v4 }
 0x1b5   : > { %1205 = vmatmul.bf16.gmra.mxu0 %v1113_v13  ;;  %1225 = vmatmul.bf16.gmra.mxu1 %v1117_v14 }
 0x1b6   : > { %1245 = vmatmul.bf16.gmra.mxu2 %v1121_v15  ;;  %1265 = vmatmul.bf16.gmra.mxu3 %v1125_v16 }
 0x1c5   : > { %1210 = vmatmul.bf16.gmra.mxu0 %v1114_v25  ;;  %1230 = vmatmul.bf16.gmra.mxu1 %v1118_v26 }
 0x1c6   : > { %1250 = vmatmul.bf16.gmra.mxu2 %v1122_v27  ;;  %1270 = vmatmul.bf16.gmra.mxu3 %v1126_v28 }
 0x1d5   : > { %1215 = vmatmul.bf16.gmra.mxu0 %v1115_v37  ;;  %1235 = vmatmul.bf16.gmra.mxu1 %v1119_v38 }
 0x1d6   : > { %1255 = vmatmul.bf16.gmra.mxu2 %v1123_v39  ;;  %1275 = vmatmul.bf16.gmra.mxu3 %v1127_v40 }
 0x222   : > { %v1201_v41 = vpop.f32.mrf.mxu0  ;;  %v1221_v43 = vpop.f32.mrf.mxu1 }
 0x223   : > { %v1281_v45 = vmax.f32 %v1201_v41, 0.0  ;;  %v1289_v46 = vmax.f32 %v1221_v43, 0.0 }
 0x225   : > { %v1409_v47 = vadd.f32 %v1377_v42, %v1281_v45  ;;  %v1417_v48 = vadd.f32 %v1385_v44, %v1289_v46 }
 0x227   : > { %1441 = vst [vmem:[%s2627_s5] sm:$0xff] %v1409_v47 }
 0x228   : > { %1449 = vst [vmem:[%s2627_s5 + $0x40] sm:$0xff] %v1417_v48 }
 0x229   : > { %v1241_v49 = vpop.f32.mrf.mxu2  ;;  %v1261_v51 = vpop.f32.mrf.mxu3 }
 0x22a   : > { %v1297_v53 = vmax.f32 %v1241_v49, 0.0  ;;  %v1305_v54 = vmax.f32 %v1261_v51, 0.0  ;;  %v1203_v55 = vpop.f32.mrf.mxu0  ;;  %v1223_v57 = vpop.f32.mrf.mxu1 }
 0x22b   : > { %v1282_v58 = vmax.f32 %v1203_v55, 0.0  ;;  %v1290_v59 = vmax.f32 %v1223_v57, 0.0 }
 0x22d   : > { %v1895_v63 = vpack.c.bf16 %v1282_v58, %v1281_v45  ;;  %v1915_v1 = vpack.c.bf16 %v1290_v59, %v1289_v46 }
 0x22f   : > { %v1393_v50 = vld [vmem:[%s2625_s3 + $0x80] sm:$0xff]  ;;  %v1378_v56 = vld [vmem:[%s2625_s3 + $0x8] sm:$0xff]  ;;  %1896 = vst [vmem:[%s2626_s4] sm:$0xff] %v1895_v63  }
 0x230   : > { %v1401_v52 = vld [vmem:[%s2625_s3 + $0xc0] sm:$0xff]  ;;  %v1425_v60 = vadd.f32 %v1393_v50, %v1297_v53  ;;  %v1386_v62 = vld [vmem:[%s2625_s3 + $0x48] sm:$0xff]  ;;  %v1410_v0 = vadd.f32 %v1378_v56, %v1282_v58  ;;  %1975 = vst [vmem:[%s2626_s4 + $0x20] sm:$0xff] %v1915_v1  }
 0x231   : > { %v1433_v61 = vadd.f32 %v1401_v52, %v1305_v54  ;;  %v1418_v2 = vadd.f32 %v1386_v62, %v1290_v59  ;;  %v1243_v3 = vpop.f32.mrf.mxu2  ;;  %v1263_v5 = vpop.f32.mrf.mxu3 }
 0x232   : > { %1457 = vst [vmem:[%s2627_s5 + $0x80] sm:$0xff] %v1425_v60  ;;  %v1298_v6 = vmax.f32 %v1243_v3, 0.0  ;;  %v1306_v7 = vmax.f32 %v1263_v5, 0.0  ;;  %v1206_v9 = vpop.f32.mrf.mxu0  ;;  %v1226_v10 = vpop.f32.mrf.mxu1 }
 0x233   : > { %1465 = vst [vmem:[%s2627_s5 + $0xc0] sm:$0xff] %v1433_v61  ;;  %v1283_v11 = vmax.f32 %v1206_v9, 0.0  ;;  %v1291_v13 = vmax.f32 %v1226_v10, 0.0 }
 0x234   : > { %1442 = vst [vmem:[%s2627_s5 + $0x8] sm:$0xff] %v1410_v0  ;;  %v1935_v14 = vpack.c.bf16 %v1298_v6, %v1297_v53  ;;  %v1955_v16 = vpack.c.bf16 %v1306_v7, %v1305_v54 }
 0x236   : > { %1979 = vst [vmem:[%s2626_s4 + $0x40] sm:$0xff] %v1935_v14  }
 0x237   : > { %1983 = vst [vmem:[%s2626_s4 + $0x60] sm:$0xff] %v1955_v16  }
 0x239   : > { %v1246_v21 = vpop.f32.mrf.mxu2  ;;  %v1266_v23 = vpop.f32.mrf.mxu3 }
 0x23a   : > { %v1299_v25 = vmax.f32 %v1246_v21, 0.0  ;;  %v1307_v26 = vmax.f32 %v1266_v23, 0.0  ;;  %v1208_v27 = vpop.f32.mrf.mxu0  ;;  %v1228_v29 = vpop.f32.mrf.mxu1 }
 0x23b   : > { %v1394_v4 = vld [vmem:[%s2625_s3 + $0x88] sm:$0xff]  ;;  %v1284_v30 = vmax.f32 %v1208_v27, 0.0  ;;  %v1292_v31 = vmax.f32 %v1228_v29, 0.0 }
 0x23c   : > { %v1402_v8 = vld [vmem:[%s2625_s3 + $0xc8] sm:$0xff]  ;;  %v1426_v15 = vadd.f32 %v1394_v4, %v1298_v6 }
 0x23d   : > { %1450 = vst [vmem:[%s2627_s5 + $0x48] sm:$0xff] %v1418_v2  ;;  %v1434_v18 = vadd.f32 %v1402_v8, %v1306_v7  ;;  %v1900_v35 = vpack.c.bf16 %v1284_v30, %v1283_v11  ;;  %v1920_v37 = vpack.c.bf16 %v1292_v31, %v1291_v13 }
 0x23f   : > { %1972 = vst [vmem:[%s2626_s4 + $0x8] sm:$0xff] %v1900_v35  }
 0x240   : > { %1976 = vst [vmem:[%s2626_s4 + $0x28] sm:$0xff] %v1920_v37  }
 0x241   : > { %v1248_v39 = vpop.f32.mrf.mxu2  ;;  %v1268_v41 = vpop.f32.mrf.mxu3 }
 0x242   : > { %v1300_v42 = vmax.f32 %v1248_v39, 0.0  ;;  %v1308_v43 = vmax.f32 %v1268_v41, 0.0  ;;  %v1211_v45 = vpop.f32.mrf.mxu0  ;;  %v1231_v46 = vpop.f32.mrf.mxu1 }
 0x243   : > { %v1285_v47 = vmax.f32 %v1211_v45, 0.0  ;;  %v1293_v49 = vmax.f32 %v1231_v46, 0.0 }
 0x244   : > { %v1379_v12 = vld [vmem:[%s2625_s3 + $0x10] sm:$0xff]  ;;  %v1940_v50 = vpack.c.bf16 %v1300_v42, %v1299_v25  ;;  %v1960_v52 = vpack.c.bf16 %v1308_v43, %v1307_v26 }
 0x245   : > { %v1387_v17 = vld [vmem:[%s2625_s3 + $0x50] sm:$0xff]  ;;  %v1411_v19 = vadd.f32 %v1379_v12, %v1283_v11 }
 0x246   : > { %1458 = vst [vmem:[%s2627_s5 + $0x88] sm:$0xff] %v1426_v15  ;;  %v1419_v20 = vadd.f32 %v1387_v17, %v1291_v13 }
 0x247   : > { %1466 = vst [vmem:[%s2627_s5 + $0xc8] sm:$0xff] %v1434_v18 }
 0x248   : > { %1980 = vst [vmem:[%s2626_s4 + $0x48] sm:$0xff] %v1940_v50  }
 0x249   : > { %1984 = vst [vmem:[%s2626_s4 + $0x68] sm:$0xff] %v1960_v52   ;;  %v1251_v57 = vpop.f32.mrf.mxu2  ;;  %v1271_v59 = vpop.f32.mrf.mxu3 }
 0x24a   : > { %v1301_v61 = vmax.f32 %v1251_v57, 0.0  ;;  %v1309_v62 = vmax.f32 %v1271_v59, 0.0  ;;  %v1213_v63 = vpop.f32.mrf.mxu0  ;;  %v1233_v1 = vpop.f32.mrf.mxu1 }
 0x24b   : > { %v1286_v2 = vmax.f32 %v1213_v63, 0.0  ;;  %v1294_v3 = vmax.f32 %v1233_v1, 0.0 }
 0x24d   : > { %v1905_v7 = vpack.c.bf16 %v1286_v2, %v1285_v47  ;;  %v1925_v9 = vpack.c.bf16 %v1294_v3, %v1293_v49 }
 0x24e   : > { %v1395_v22 = vld [vmem:[%s2625_s3 + $0x90] sm:$0xff] }
 0x24f   : > { %v1403_v24 = vld [vmem:[%s2625_s3 + $0xd0] sm:$0xff]  ;;  %v1427_v32 = vadd.f32 %v1395_v22, %v1299_v25  ;;  %1973 = vst [vmem:[%s2626_s4 + $0x10] sm:$0xff] %v1905_v7  }
 0x250   : > { %1443 = vst [vmem:[%s2627_s5 + $0x10] sm:$0xff] %v1411_v19  ;;  %v1435_v33 = vadd.f32 %v1403_v24, %v1307_v26 }
 0x251   : > { %v1253_v11 = vpop.f32.mrf.mxu2  ;;  %v1273_v13 = vpop.f32.mrf.mxu3  ;;  %1977 = vst [vmem:[%s2626_s4 + $0x30] sm:$0xff] %v1925_v9  }
 0x252   : > { %v1302_v14 = vmax.f32 %v1253_v11, 0.0  ;;  %v1310_v15 = vmax.f32 %v1273_v13, 0.0  ;;  %v1216_v17 = vpop.f32.mrf.mxu0  ;;  %v1236_v18 = vpop.f32.mrf.mxu1 }
 0x253   : > { %v1287_v19 = vmax.f32 %v1216_v17, 0.0  ;;  %v1295_v21 = vmax.f32 %v1236_v18, 0.0 }
 0x254   : > { %v1945_v22 = vpack.c.bf16 %v1302_v14, %v1301_v61  ;;  %v1965_v24 = vpack.c.bf16 %v1310_v15, %v1309_v62 }
 0x256   : > { %1981 = vst [vmem:[%s2626_s4 + $0x50] sm:$0xff] %v1945_v22  }
 0x257   : > { %v1380_v28 = vld [vmem:[%s2625_s3 + $0x18] sm:$0xff]  ;;  %1985 = vst [vmem:[%s2626_s4 + $0x70] sm:$0xff] %v1965_v24  }
 0x258   : > { %1451 = vst [vmem:[%s2627_s5 + $0x50] sm:$0xff] %v1419_v20  ;;  %v1412_v36 = vadd.f32 %v1380_v28, %v1284_v30 }
 0x259   : > { %v1256_v29 = vpop.f32.mrf.mxu2 }
 0x25a   : > { %v1218_v35 = vpop.f32.mrf.mxu0  ;;  %v1238_v37 = vpop.f32.mrf.mxu1 }
 0x25b   : > { %v1296_v39 = vmax.f32 %v1238_v37, 0.0 }
 0x25d   : > { %v1930_v45 = vpack.c.bf16 %v1296_v39, %v1295_v21 }
 0x25f   : > { %v1388_v34 = vld [vmem:[%s2625_s3 + $0x58] sm:$0xff]  ;;  %1978 = vst [vmem:[%s2626_s4 + $0x38] sm:$0xff] %v1930_v45  }
 0x260   : > { %1459 = vst [vmem:[%s2627_s5 + $0x90] sm:$0xff] %v1427_v32  ;;  %v1420_v38 = vadd.f32 %v1388_v34, %v1292_v31  ;;  %v1276_v31 = vpop.f32.mrf.mxu3 }
 0x261   : > { %1467 = vst [vmem:[%s2627_s5 + $0xd0] sm:$0xff] %v1435_v33  ;;  %v1303_v33 = vmax.f32 %v1256_v29, 0.0  ;;  %v1311_v34 = vmax.f32 %v1276_v31, 0.0 }
 0x262   : > { %1444 = vst [vmem:[%s2627_s5 + $0x18] sm:$0xff] %v1412_v36 }
 0x269   : > { %v1396_v40 = vld [vmem:[%s2625_s3 + $0x98] sm:$0xff] }
 0x26a   : > { %v1404_v44 = vld [vmem:[%s2625_s3 + $0xd8] sm:$0xff]  ;;  %v1428_v51 = vadd.f32 %v1396_v40, %v1300_v42 }
 0x26b   : > { %1452 = vst [vmem:[%s2627_s5 + $0x58] sm:$0xff] %v1420_v38  ;;  %v1436_v54 = vadd.f32 %v1404_v44, %v1308_v43  ;;  %v1288_v38 = vmax.f32 %v1218_v35, 0.0 }
 0x26d   : > { %v1910_v43 = vpack.c.bf16 %v1288_v38, %v1287_v19 }
 0x26f   : > { %1974 = vst [vmem:[%s2626_s4 + $0x18] sm:$0xff] %v1910_v43  }
 0x272   : > { %v1381_v48 = vld [vmem:[%s2625_s3 + $0x20] sm:$0xff] }
 0x273   : > { %v1389_v53 = vld [vmem:[%s2625_s3 + $0x60] sm:$0xff]  ;;  %v1413_v55 = vadd.f32 %v1381_v48, %v1285_v47  ;;  %v1258_v47 = vpop.f32.mrf.mxu2 }
 0x274   : > { %1460 = vst [vmem:[%s2627_s5 + $0x98] sm:$0xff] %v1428_v51  ;;  %v1421_v56 = vadd.f32 %v1389_v53, %v1293_v49  ;;  %v1278_v49 = vpop.f32.mrf.mxu3  ;;  %v1304_v50 = vmax.f32 %v1258_v47, 0.0 }
 0x275   : > { %1468 = vst [vmem:[%s2627_s5 + $0xd8] sm:$0xff] %v1436_v54  ;;  %v1312_v51 = vmax.f32 %v1278_v49, 0.0 }
 0x276   : > { %v1950_v53 = vpack.c.bf16 %v1304_v50, %v1303_v33 }
 0x278   : > { %1982 = vst [vmem:[%s2626_s4 + $0x58] sm:$0xff] %v1950_v53  }
 0x27c   : > { %v1397_v58 = vld [vmem:[%s2625_s3 + $0xa0] sm:$0xff] }
 0x27d   : > { %v1405_v60 = vld [vmem:[%s2625_s3 + $0xe0] sm:$0xff]  ;;  %v1429_v4 = vadd.f32 %v1397_v58, %v1301_v61 }
 0x27e   : > { %1445 = vst [vmem:[%s2627_s5 + $0x20] sm:$0xff] %v1413_v55  ;;  %v1437_v5 = vadd.f32 %v1405_v60, %v1309_v62  ;;  %v1970_v55 = vpack.c.bf16 %v1312_v51, %v1311_v34 }
 0x280   : > { %1986 = vst [vmem:[%s2626_s4 + $0x78] sm:$0xff] %v1970_v55  }
 0x285   : > { %v1382_v0 = vld [vmem:[%s2625_s3 + $0x28] sm:$0xff] }
 0x286   : > { %1453 = vst [vmem:[%s2627_s5 + $0x60] sm:$0xff] %v1421_v56  ;;  %v1414_v8 = vadd.f32 %v1382_v0, %v1286_v2 }
 0x28d   : > { %v1390_v6 = vld [vmem:[%s2625_s3 + $0x68] sm:$0xff] }
 0x28e   : > { %1461 = vst [vmem:[%s2627_s5 + $0xa0] sm:$0xff] %v1429_v4  ;;  %v1422_v10 = vadd.f32 %v1390_v6, %v1294_v3 }
 0x28f   : > { %1469 = vst [vmem:[%s2627_s5 + $0xe0] sm:$0xff] %v1437_v5 }
 0x290   : > { %1446 = vst [vmem:[%s2627_s5 + $0x28] sm:$0xff] %v1414_v8 }
 0x297   : > { %v1398_v12 = vld [vmem:[%s2625_s3 + $0xa8] sm:$0xff] }
 0x298   : > { %v1406_v16 = vld [vmem:[%s2625_s3 + $0xe8] sm:$0xff]  ;;  %v1430_v23 = vadd.f32 %v1398_v12, %v1302_v14 }
 0x299   : > { %1454 = vst [vmem:[%s2627_s5 + $0x68] sm:$0xff] %v1422_v10  ;;  %v1438_v26 = vadd.f32 %v1406_v16, %v1310_v15 }
 0x2a0   : > { %v1383_v20 = vld [vmem:[%s2625_s3 + $0x30] sm:$0xff] }
 0x2a1   : > { %v1391_v25 = vld [vmem:[%s2625_s3 + $0x70] sm:$0xff]  ;;  %v1415_v27 = vadd.f32 %v1383_v20, %v1287_v19 }
 0x2a2   : > { %1462 = vst [vmem:[%s2627_s5 + $0xa8] sm:$0xff] %v1430_v23  ;;  %v1423_v28 = vadd.f32 %v1391_v25, %v1295_v21 }
 0x2a3   : > { %1470 = vst [vmem:[%s2627_s5 + $0xe8] sm:$0xff] %v1438_v26 }
 0x2aa   : > { %v1399_v30 = vld [vmem:[%s2625_s3 + $0xb0] sm:$0xff] }
 0x2ab   : > { %v1407_v32 = vld [vmem:[%s2625_s3 + $0xf0] sm:$0xff]  ;;  %v1431_v40 = vadd.f32 %v1399_v30, %v1303_v33 }
 0x2ac   : > { %1447 = vst [vmem:[%s2627_s5 + $0x30] sm:$0xff] %v1415_v27  ;;  %v1439_v41 = vadd.f32 %v1407_v32, %v1311_v34 }
 0x2b3   : > { %v1384_v36 = vld [vmem:[%s2625_s3 + $0x38] sm:$0xff] }
 0x2b4   : > { %1455 = vst [vmem:[%s2627_s5 + $0x70] sm:$0xff] %v1423_v28  ;;  %v1416_v44 = vadd.f32 %v1384_v36, %v1288_v38 }
 0x2bb   : > { %v1392_v42 = vld [vmem:[%s2625_s3 + $0x78] sm:$0xff] }
 0x2bc   : > { %1463 = vst [vmem:[%s2627_s5 + $0xb0] sm:$0xff] %v1431_v40  ;;  %v1424_v46 = vadd.f32 %v1392_v42, %v1296_v39 }
 0x2bd   : > { %1471 = vst [vmem:[%s2627_s5 + $0xf0] sm:$0xff] %v1439_v41 }
 0x2be   : > { %1448 = vst [vmem:[%s2627_s5 + $0x38] sm:$0xff] %v1416_v44 }
 0x2c5   : > { %v1400_v48 = vld [vmem:[%s2625_s3 + $0xb8] sm:$0xff] }
 0x2c6   : > { %v1408_v52 = vld [vmem:[%s2625_s3 + $0xf8] sm:$0xff]  ;;  %v1432_v54 = vadd.f32 %v1400_v48, %v1304_v50 }
 0x2c7   : > { %1456 = vst [vmem:[%s2627_s5 + $0x78] sm:$0xff] %v1424_v46  ;;  %v1440_v56 = vadd.f32 %v1408_v52, %v1312_v51 }
 0x2c8   : > { %1464 = vst [vmem:[%s2627_s5 + $0xb8] sm:$0xff] %v1432_v54 }
 0x2c9   : > { %1472 = vst [vmem:[%s2627_s5 + $0xf8] sm:$0xff] %v1440_v56 }
 0x2ca PF: > { %s16_s22 = sadd.s32 1, %s2106_s22   ;;  %s2628_s18 = smov %s2094_s19 }
 0x2cb   : > { %p13_p11 = scmp.ge.s32.totalorder %s16_s22, 4   ;;  %s2629_s19 = smov %s2174_s26 }
 0x2cc   : > { %s2630_s20 = smov %s2102_s21  ;;  %s2631_s21 = smov %s2633_s23 }
 0x2cd   :  { %15 = sbr.rel (!%p13_p11) target bundleno = 3 (0x3), region = 133 }

// kernel: ngcf_forward_padded.7
= control target key start
LH: loop header
LB: loop body
LE: loop exit
PB: predicated region body
PF: predicated region fallthrough
CT: control target
= control target key end

     0   :  { %s1698_s15 = smov 0   ;;  %s1700_s16 = smov 0   ;;  %s2038_s0 = inlined_call_operand.vmem [shape: bf16[512,256], index: 0, kind: input, shape index: {}]   ;;  %s2039_s1 = inlined_call_operand.vmem [shape: bf16[256,128], index: 1, kind: input, shape index: {}]   ;;  %s2040_s2 = inlined_call_operand.vmem [shape: bf16[128,128], index: 2, kind: input, shape index: {}]   ;;  %s2041_s3 = inlined_call_operand.vmem [shape: f32[512,128], index: 3, kind: input, shape index: {}, may-alias: {3,4}]   ;;  %s2042_s4 = inlined_call_operand.vmem [shape: f32[512,128], index: 4, kind: output, shape index: {}, may-alias: {3,4}]  }
   0x1   :  { %s1702_s17 = smov 0  }
   0x2 LB: > { %s26_s18 = sadd.s32 1, %s1667_s16  ;;  %p1310_p0 = scmp.ge.s32.totalorder %s1671_s17, 1  ;;  %s1671_s17 = sphi %s1702_s17, %s14_s17   ;;  %s1667_s16 = sphi %s1700_s16, %s2044_s16   ;;  %s1663_s15 = sphi %s1698_s15, %s2043_s15  }
   0x3   : > { %p28_p1 = scmp.ge.s32.totalorder %s26_s18, 2  ;;  %p194_p2 = scmp.lt.s32.totalorder %s1671_s17, 3 }
   0x5   : > { %s2046_s18 = smov (%p28_p1, %s26_s18), 0  ;;  %p195_p3 = pnand %p1310_p0, %p194_p2 }
   0x6   : > { %s1311_s5 = sshll.u32 (!%p195_p3), %s1663_s15, 5 }
   0x7   : > { %198 = sbr.rel (%p195_p3) target bundleno = 504 (0x1f8), region = 36  ;;  %p232_p4 = scmp.lt.s32.totalorder (!%p195_p3), %s1311_s5, 63 }
   0xc   : > { %v1552_v0 = vld [vmem:[%s2039_s1 + $0x38] sm:$0xff]  ;;  %v1551_v2 = vld [vmem:[%s2039_s1 + $0x30] sm:$0xff]  ;;  %v1550_v4 = vld [vmem:[%s2039_s1 + $0x28] sm:$0xff]  ;;  %s2048_s5 = smov (!%p232_p4, %s1311_s5), 63 }
   0xd   : > { %v1560_v1 = vld [vmem:[%s2039_s1 + $0x78] sm:$0xff]  ;;  %647 = vmatpush.bf16.msra.mxu0 %v1552_v0  ;;  %1601 = vmatpush.bf16.msra.mxu3 %v1552_v0  ;;  %v1559_v3 = vld [vmem:[%s2039_s1 + $0x70] sm:$0xff]  ;;  %v1558_v5 = vld [vmem:[%s2039_s1 + $0x68] sm:$0xff]  ;;  %s1755_s21 = sshll.u32 %s2048_s5, 3 }
   0xe   : > { %736 = vmatpush.bf16.msra.mxu1 %v1560_v1  ;;  %v1549_v6 = vld [vmem:[%s2039_s1 + $0x20] sm:$0xff]  ;;  %v1548_v8 = vld [vmem:[%s2039_s1 + $0x18] sm:$0xff]  ;;  %v1547_v10 = vld [vmem:[%s2039_s1 + $0x10] sm:$0xff]  ;;  %s1764_s26 = scalar_lea.vmem %s2038_s0, %s1755_s21  ;;  %s1876_s29 = scalar_lea.vmem %s2041_s3, %s1755_s21 }
   0xf   : > { %v1557_v7 = vld [vmem:[%s2039_s1 + $0x60] sm:$0xff]  ;;  %v1556_v9 = vld [vmem:[%s2039_s1 + $0x58] sm:$0xff]  ;;  %v1555_v11 = vld [vmem:[%s2039_s1 + $0x50] sm:$0xff]  ;;  %s1959_s6 = scalar_lea.vmem %s2042_s4, %s1755_s21 }
  0x10   : > { %v1546_v12 = vld [vmem:[%s2039_s1 + $0x8] sm:$0xff]  ;;  %v1545_v14 = vld [vmem:[%s2039_s1] sm:$0xff]  ;;  %v1328_v25 = vld [vmem:[%s1764_s26 + $0x10] sm:$0xf] }
  0x11   : > { %648 = vmatpush.bf16.msra.mxu0 %v1551_v2  ;;  %1602 = vmatpush.bf16.msra.mxu3 %v1551_v2  ;;  %v1554_v13 = vld [vmem:[%s2039_s1 + $0x48] sm:$0xff]  ;;  %v1320_v15 = vld [vmem:[%s1764_s26] sm:$0xf]  ;;  %v1561_v20 = vld [vmem:[%s1764_s26 + $0x4] sm:$0xf] }
  0x12   : > { %737 = vmatpush.bf16.msra.mxu1 %v1559_v3  ;;  %v1562_v16 = vld [vmem:[%s1764_s26 + $0x4] sm:$0xf0]  ;;  %v1416_v17 = vld [vmem:[%s1764_s26 + $0xc0] sm:$0xf]  ;;  %v1322_v21 = vld [vmem:[%s1764_s26 + $0x8] sm:$0xf0] }
  0x13   : > { %v1586_v18 = vld [vmem:[%s1764_s26 + $0xc4] sm:$0xf0]  ;;  %v1553_v19 = vld [vmem:[%s2039_s1 + $0x40] sm:$0xff]  ;;  %v1321_v22 = vor.u32 %v1562_v16, %v1320_v15  ;;  %v1325_v24 = vor.u32 %v1561_v20, %v1322_v21  ;;  %v1564_v26 = vld [vmem:[%s1764_s26 + $0x14] sm:$0xf0] }
  0x14   : > { %v1417_v23 = vor.u32 %v1586_v18, %v1416_v17  ;;  %v1424_v27 = vld [vmem:[%s1764_s26 + $0xd0] sm:$0xf]  ;;  %v1588_v28 = vld [vmem:[%s1764_s26 + $0xd4] sm:$0xf0]  ;;  %v1563_v29 = vld [vmem:[%s1764_s26 + $0x14] sm:$0xf]  ;;  %v1329_v31 = vor.u32 %v1564_v26, %v1328_v25 }
  0x15   : > { %649 = vmatpush.bf16.msra.mxu0 %v1550_v4  ;;  %1603 = vmatpush.bf16.msra.mxu3 %v1550_v4  ;;  %v1330_v30 = vld [vmem:[%s1764_s26 + $0x18] sm:$0xf0]  ;;  %v1425_v32 = vor.u32 %v1588_v28, %v1424_v27  ;;  %v1336_v34 = vld [vmem:[%s1764_s26 + $0x20] sm:$0xf]  ;;  %v1566_v35 = vld [vmem:[%s1764_s26 + $0x24] sm:$0xf0] }
  0x16   : > { %738 = vmatpush.bf16.msra.mxu1 %v1558_v5  ;;  %v1333_v33 = vor.u32 %v1563_v29, %v1330_v30  ;;  %v1432_v36 = vld [vmem:[%s1764_s26 + $0xe0] sm:$0xf]  ;;  %v1590_v37 = vld [vmem:[%s1764_s26 + $0xe4] sm:$0xf0]  ;;  %v1565_v38 = vld [vmem:[%s1764_s26 + $0x24] sm:$0xf]  ;;  %v1337_v40 = vor.u32 %v1566_v35, %v1336_v34 }
  0x17   : > { %v1338_v39 = vld [vmem:[%s1764_s26 + $0x28] sm:$0xf0]  ;;  %v1433_v41 = vor.u32 %v1590_v37, %v1432_v36  ;;  %v1344_v43 = vld [vmem:[%s1764_s26 + $0x30] sm:$0xf]  ;;  %v1568_v44 = vld [vmem:[%s1764_s26 + $0x34] sm:$0xf0] }
  0x18   : > { %v1341_v42 = vor.u32 %v1565_v38, %v1338_v39  ;;  %v1440_v45 = vld [vmem:[%s1764_s26 + $0xf0] sm:$0xf]  ;;  %v1592_v46 = vld [vmem:[%s1764_s26 + $0xf4] sm:$0xf0]  ;;  %v1567_v47 = vld [vmem:[%s1764_s26 + $0x34] sm:$0xf]  ;;  %v1345_v49 = vor.u32 %v1568_v44, %v1344_v43 }
  0x19   : > { %650 = vmatpush.bf16.msra.mxu0 %v1549_v6  ;;  %1604 = vmatpush.bf16.msra.mxu3 %v1549_v6  ;;  %v1346_v48 = vld [vmem:[%s1764_s26 + $0x38] sm:$0xf0]  ;;  %v1441_v50 = vor.u32 %v1592_v46, %v1440_v45  ;;  %v1352_v52 = vld [vmem:[%s1764_s26 + $0x40] sm:$0xf]  ;;  %v1570_v53 = vld [vmem:[%s1764_s26 + $0x44] sm:$0xf0] }
  0x1a   : > { %739 = vmatpush.bf16.msra.mxu1 %v1557_v7  ;;  %v1349_v51 = vor.u32 %v1567_v47, %v1346_v48  ;;  %v1585_v54 = vld [vmem:[%s1764_s26 + $0xc4] sm:$0xf]  ;;  %v1418_v55 = vld [vmem:[%s1764_s26 + $0xc8] sm:$0xf0]  ;;  %v1353_v58 = vor.u32 %v1570_v53, %v1352_v52  ;;  %v1600_v61 = vld [vmem:[%s2040_s2 + $0x38] sm:$0xff] }
  0x1b   : > { %v1569_v56 = vld [vmem:[%s1764_s26 + $0x44] sm:$0xf]  ;;  %v1354_v57 = vld [vmem:[%s1764_s26 + $0x48] sm:$0xf0]  ;;  %v1421_v59 = vor.u32 %v1585_v54, %v1418_v55  ;;  %1004 = vmatpush.bf16.msra.mxu2 %v1600_v61  ;;  %v1599_v62 = vld [vmem:[%s2040_s2 + $0x30] sm:$0xff] }
  0x1c   : > { %v1357_v60 = vor.u32 %v1569_v56, %v1354_v57  ;;  %v1360_v63 = vld [vmem:[%s1764_s26 + $0x50] sm:$0xf]  ;;  %v1572_v0 = vld [vmem:[%s1764_s26 + $0x54] sm:$0xf0]  ;;  %v1426_v2 = vld [vmem:[%s1764_s26 + $0xd8] sm:$0xf0] }
  0x1d   : > { %651 = vmatpush.bf16.msra.mxu0 %v1548_v8  ;;  %1605 = vmatpush.bf16.msra.mxu3 %v1548_v8  ;;  %v1362_v4 = vld [vmem:[%s1764_s26 + $0x58] sm:$0xf0]  ;;  %v1598_v8 = vld [vmem:[%s2040_s2 + $0x28] sm:$0xff]  ;;  %v1573_v15 = vld [vmem:[%s1764_s26 + $0x64] sm:$0xf] }
  0x1e   : > { %740 = vmatpush.bf16.msra.mxu1 %v1556_v9  ;;  %v1370_v16 = vld [vmem:[%s1764_s26 + $0x68] sm:$0xf0]  ;;  %v1595_v20 = vld [vmem:[%s2040_s2 + $0x10] sm:$0xff]  ;;  %v1442_v26 = vld [vmem:[%s1764_s26 + $0xf8] sm:$0xf0] }
  0x1f   : > { %1005 = vmatpush.bf16.msra.mxu2 %v1599_v62  ;;  %v1594_v21 = vld [vmem:[%s2040_s2 + $0x8] sm:$0xff]  ;;  %v1591_v25 = vld [vmem:[%s1764_s26 + $0xf4] sm:$0xf]  ;;  %v1378_v28 = vld [vmem:[%s1764_s26 + $0x78] sm:$0xf0] }
  0x20   : > { %v1575_v27 = vld [vmem:[%s1764_s26 + $0x74] sm:$0xf]  ;;  %v1445_v30 = vor.u32 %v1591_v25, %v1442_v26  ;;  %v1577_v34 = vld [vmem:[%s1764_s26 + $0x84] sm:$0xf]  ;;  %v1386_v35 = vld [vmem:[%s1764_s26 + $0x88] sm:$0xf0] }
  0x21   : > { %652 = vmatpush.bf16.msra.mxu0 %v1547_v10  ;;  %1606 = vmatpush.bf16.msra.mxu3 %v1547_v10  ;;  %v1596_v10 = vld [vmem:[%s2040_s2 + $0x18] sm:$0xff]  ;;  %v1389_v38 = vor.u32 %v1577_v34, %v1386_v35  ;;  %v1392_v46 = vld [vmem:[%s1764_s26 + $0x90] sm:$0xf]  ;;  %v1579_v48 = vld [vmem:[%s1764_s26 + $0x94] sm:$0xf] }
  0x22   : > { %741 = vmatpush.bf16.msra.mxu1 %v1555_v11  ;;  %v1580_v47 = vld [vmem:[%s1764_s26 + $0x94] sm:$0xf0] }
  0x23   : > { %1006 = vmatpush.bf16.msra.mxu2 %v1598_v8 }
  0x25   : > { %653 = vmatpush.bf16.msra.mxu0 %v1546_v12  ;;  %1607 = vmatpush.bf16.msra.mxu3 %v1546_v12  ;;  %v1574_v12 = vld [vmem:[%s1764_s26 + $0x64] sm:$0xf0] }
  0x26   : > { %742 = vmatpush.bf16.msra.mxu1 %v1554_v13 }
  0x29   : > { %654 = vmatpush.bf16.msra.mxu0 %v1545_v14  ;;  %1608 = vmatpush.bf16.msra.mxu3 %v1545_v14  ;;  %v1434_v14 = vld [vmem:[%s1764_s26 + $0xe8] sm:$0xf0] }
  0x2a   : > { %743 = vmatpush.bf16.msra.mxu1 %v1553_v19 }
  0x2c   : > { %655 = vmatmul.bf16.vlgmr.msra.gmra.mxu0 %v1321_v22  ;;  %715 = vmatmul.bf16.vlgmr.msra.gmra.mxu3 %v1417_v23  ;;  %v1593_v22 = vld [vmem:[%s2040_s2] sm:$0xff]  ;;  %v1376_v23 = vld [vmem:[%s1764_s26 + $0x70] sm:$0xf] }
  0x2d   : > { %1609 = vmatpush.bf16.msrb.mxu3 %v1560_v1  ;;  %744 = vmatmul.bf16.vlgmr.msra.gmra.mxu1 %v1325_v24  ;;  %v1587_v1 = vld [vmem:[%s1764_s26 + $0xd4] sm:$0xf]  ;;  %v1576_v24 = vld [vmem:[%s1764_s26 + $0x74] sm:$0xf0] }
  0x2e   : > { %v1429_v6 = vor.u32 %v1587_v1, %v1426_v2  ;;  %v1377_v29 = vor.u32 %v1576_v24, %v1376_v23 }
  0x31   : > { %1610 = vmatpush.bf16.msrb.mxu3 %v1559_v3  ;;  %v1571_v3 = vld [vmem:[%s1764_s26 + $0x54] sm:$0xf] }
  0x35   : > { %1611 = vmatpush.bf16.msrb.mxu3 %v1558_v5  ;;  %v1361_v5 = vor.u32 %v1572_v0, %v1360_v63  ;;  %v1581_v63 = vld [vmem:[%s1764_s26 + $0xa4] sm:$0xf]  ;;  %v1402_v0 = vld [vmem:[%s1764_s26 + $0xa8] sm:$0xf0] }
  0x39   : > { %1612 = vmatpush.bf16.msrb.mxu3 %v1557_v7  ;;  %v1365_v7 = vor.u32 %v1571_v3, %v1362_v4  ;;  %v1405_v4 = vor.u32 %v1581_v63, %v1402_v0 }
  0x3c   : > { %660 = vmatmul.bf16.gmra.mxu0 %v1329_v31  ;;  %720 = vmatmul.bf16.gmra.mxu3 %v1425_v32  ;;  %v1381_v31 = vor.u32 %v1575_v27, %v1378_v28  ;;  %v1384_v32 = vld [vmem:[%s1764_s26 + $0x80] sm:$0xf] }
  0x3d   : > { %1613 = vmatpush.bf16.msrb.mxu3 %v1556_v9  ;;  %749 = vmatmul.bf16.gmra.mxu1 %v1333_v33  ;;  %v1597_v9 = vld [vmem:[%s2040_s2 + $0x20] sm:$0xff]  ;;  %v1578_v33 = vld [vmem:[%s1764_s26 + $0x84] sm:$0xf0] }
  0x3e   : > { %1007 = vmatpush.bf16.msra.mxu2 %v1597_v9  ;;  %v1385_v36 = vor.u32 %v1578_v33, %v1384_v32 }
  0x41   : > { %1614 = vmatpush.bf16.msrb.mxu3 %v1555_v11  ;;  %v1368_v11 = vld [vmem:[%s1764_s26 + $0x60] sm:$0xf] }
  0x42   : > { %1008 = vmatpush.bf16.msra.mxu2 %v1596_v10  ;;  %v1369_v17 = vor.u32 %v1574_v12, %v1368_v11  ;;  %v1408_v12 = vld [vmem:[%s1764_s26 + $0xb0] sm:$0xf] }
  0x45   : > { %1615 = vmatpush.bf16.msrb.mxu3 %v1554_v13  ;;  %v1589_v13 = vld [vmem:[%s1764_s26 + $0xe4] sm:$0xf] }
  0x46   : > { %v1437_v18 = vor.u32 %v1589_v13, %v1434_v14  ;;  %1009 = vmatpush.bf16.msra.mxu2 %v1595_v20  ;;  %v1584_v13 = vld [vmem:[%s1764_s26 + $0xb4] sm:$0xf0]  ;;  %v1583_v14 = vld [vmem:[%s1764_s26 + $0xb4] sm:$0xf] }
  0x49   : > { %1616 = vmatpush.bf16.msrb.mxu3 %v1553_v19  ;;  %v1373_v19 = vor.u32 %v1573_v15, %v1370_v16  ;;  %v1410_v15 = vld [vmem:[%s1764_s26 + $0xb8] sm:$0xf0] }
  0x4a   : > { %1010 = vmatpush.bf16.msra.mxu2 %v1594_v21 }
  0x4c   : > { %665 = vmatmul.bf16.gmra.mxu0 %v1337_v40  ;;  %725 = vmatmul.bf16.gmra.mxu3 %v1433_v41 }
  0x4d   : > { %754 = vmatmul.bf16.gmra.mxu1 %v1341_v42  ;;  %1617 = vmatpush.bf16.msra.mxu3 %v1600_v61  ;;  %v1400_v61 = vld [vmem:[%s1764_s26 + $0xa0] sm:$0xf] }
  0x4e   : > { %1011 = vmatpush.bf16.msra.mxu2 %v1593_v22 }
  0x51   : > { %1618 = vmatpush.bf16.msra.mxu3 %v1599_v62  ;;  %v1582_v62 = vld [vmem:[%s1764_s26 + $0xa4] sm:$0xf0] }
  0x52   : > { %v1401_v2 = vor.u32 %v1582_v62, %v1400_v61 }
  0x55   : > { %1619 = vmatpush.bf16.msra.mxu3 %v1598_v8 }
  0x59   : > { %1620 = vmatpush.bf16.msra.mxu3 %v1597_v9 }
  0x5c   : > { %670 = vmatmul.bf16.gmra.mxu0 %v1345_v49  ;;  %730 = vmatmul.bf16.gmra.mxu3 %v1441_v50  ;;  %v1394_v49 = vld [vmem:[%s1764_s26 + $0x98] sm:$0xf0] }
  0x5d   : > { %759 = vmatmul.bf16.gmra.mxu1 %v1349_v51  ;;  %1621 = vmatpush.bf16.msra.mxu3 %v1596_v10  ;;  %v1393_v51 = vor.u32 %v1580_v47, %v1392_v46  ;;  %v1397_v53 = vor.u32 %v1579_v48, %v1394_v49 }
  0x61   : > { %1622 = vmatpush.bf16.msra.mxu3 %v1595_v20 }
  0x65   : > { %1623 = vmatpush.bf16.msra.mxu3 %v1594_v21 }
  0x69   : > { %1624 = vmatpush.bf16.msra.mxu3 %v1593_v22 }
  0x6c   : > { %675 = vmatmul.bf16.gmra.mxu0 %v1353_v58  ;;  %804 = vmatmul.bf16.vlgmr.msrb.gmra.mxu3 %v1421_v59 }
  0x6d   : > { %764 = vmatmul.bf16.gmra.mxu1 %v1357_v60 }
  0x7c   : > { %680 = vmatmul.bf16.gmra.mxu0 %v1361_v5  ;;  %809 = vmatmul.bf16.gmra.mxu3 %v1429_v6 }
  0x7d   : > { %769 = vmatmul.bf16.gmra.mxu1 %v1365_v7 }
  0x8c   : > { %685 = vmatmul.bf16.gmra.mxu0 %v1369_v17  ;;  %814 = vmatmul.bf16.gmra.mxu3 %v1437_v18  ;;  %v1409_v17 = vor.u32 %v1584_v13, %v1408_v12 }
  0x8d   : > { %774 = vmatmul.bf16.gmra.mxu1 %v1373_v19  ;;  %v1413_v19 = vor.u32 %v1583_v14, %v1410_v15 }
  0x9c   : > { %690 = vmatmul.bf16.gmra.mxu0 %v1377_v29  ;;  %819 = vmatmul.bf16.gmra.mxu3 %v1445_v30 }
  0x9d   : > { %779 = vmatmul.bf16.gmra.mxu1 %v1381_v31 }
  0xa9   : > { %v656_v37 = vpop.f32.mrf.mxu0 }
  0xaa   : > { %v745_v39 = vpop.f32.mrf.mxu1 }
  0xab   : > { %v746_v43 = vadd.f32 %v745_v39, %v656_v37 }
  0xac   : > { %695 = vmatmul.bf16.gmra.mxu0 %v1385_v36 }
  0xad   : > { %784 = vmatmul.bf16.gmra.mxu1 %v1389_v38 }
  0xaf   : > { %v1851_v40 = vpop.f32.mrf.mxu3 }
  0xb1   : > { %v658_v41 = vpop.f32.mrf.mxu0 }
  0xb2   : > { %v747_v42 = vpop.f32.mrf.mxu1 }
  0xb3   : > { %v748_v44 = vadd.f32 %v747_v42, %v658_v41 }
  0xb5   : > { %v924_v45 = vpack.c.bf16 %v748_v44, %v746_v43 }
  0xb7   : > { %1012 = vmatmul.bf16.vlgmr.msra.gmra.mxu2 %v924_v45  ;;  %v718_v50 = vpop.f32.mrf.mxu3 }
  0xb9   : > { %v661_v52 = vpop.f32.mrf.mxu0 }
  0xba   : > { %v750_v54 = vpop.f32.mrf.mxu1 }
  0xbb   : > { %v751_v58 = vadd.f32 %v750_v54, %v661_v52 }
  0xbc   : > { %700 = vmatmul.bf16.gmra.mxu0 %v1393_v51 }
  0xbd   : > { %789 = vmatmul.bf16.gmra.mxu1 %v1397_v53 }
  0xbf   : > { %v1857_v55 = vpop.f32.mrf.mxu3 }
  0xc1   : > { %v663_v56 = vpop.f32.mrf.mxu0 }
  0xc2   : > { %v752_v57 = vpop.f32.mrf.mxu1 }
  0xc3   : > { %v753_v59 = vadd.f32 %v752_v57, %v663_v56 }
  0xc5   : > { %v925_v60 = vpack.c.bf16 %v753_v59, %v751_v58 }
  0xc7   : > { %1017 = vmatmul.bf16.gmra.mxu2 %v925_v60  ;;  %v723_v1 = vpop.f32.mrf.mxu3 }
  0xc9   : > { %v666_v3 = vpop.f32.mrf.mxu0 }
  0xca   : > { %v755_v5 = vpop.f32.mrf.mxu1 }
  0xcb   : > { %v756_v9 = vadd.f32 %v755_v5, %v666_v3 }
  0xcc   : > { %705 = vmatmul.bf16.gmra.mxu0 %v1401_v2 }
  0xcd   : > { %794 = vmatmul.bf16.gmra.mxu1 %v1405_v4 }
  0xcf   : > { %v1863_v6 = vpop.f32.mrf.mxu3 }
  0xd1   : > { %v668_v7 = vpop.f32.mrf.mxu0 }
  0xd2   : > { %v757_v8 = vpop.f32.mrf.mxu1 }
  0xd3   : > { %v758_v10 = vadd.f32 %v757_v8, %v668_v7 }
  0xd5   : > { %v926_v11 = vpack.c.bf16 %v758_v10, %v756_v9 }
  0xd7   : > { %1022 = vmatmul.bf16.gmra.mxu2 %v926_v11  ;;  %v728_v16 = vpop.f32.mrf.mxu3 }
  0xd9   : > { %v671_v18 = vpop.f32.mrf.mxu0 }
  0xda   : > { %v760_v20 = vpop.f32.mrf.mxu1 }
  0xdb   : > { %v761_v24 = vadd.f32 %v760_v20, %v671_v18  ;;  %v1125_v20 = vld [vmem:[%s1876_s29] sm:$0xff] }
  0xdc   : > { %710 = vmatmul.bf16.gmra.mxu0 %v1409_v17 }
  0xdd   : > { %799 = vmatmul.bf16.gmra.mxu1 %v1413_v19 }
  0xdf   : > { %v731_v21 = vpop.f32.mrf.mxu3 }
  0xe1   : > { %v673_v22 = vpop.f32.mrf.mxu0 }
  0xe2   : > { %v762_v23 = vpop.f32.mrf.mxu1 }
  0xe3   : > { %v763_v25 = vadd.f32 %v762_v23, %v673_v22  ;;  %v1126_v23 = vld [vmem:[%s1876_s29 + $0x8] sm:$0xff] }
  0xe5   : > { %v927_v26 = vpack.c.bf16 %v763_v25, %v761_v24  ;;  %v1127_v24 = vld [vmem:[%s1876_s29 + $0x10] sm:$0xff]  ;;  %v1128_v25 = vld [vmem:[%s1876_s29 + $0x18] sm:$0xff] }
  0xe7   : > { %1027 = vmatmul.bf16.gmra.mxu2 %v927_v26  ;;  %v733_v27 = vpop.f32.mrf.mxu3  ;;  %v1129_v26 = vld [vmem:[%s1876_s29 + $0x20] sm:$0xff] }
  0xe9   : > { %v676_v28 = vpop.f32.mrf.mxu0 }
  0xea   : > { %v765_v29 = vpop.f32.mrf.mxu1 }
  0xeb   : > { %v766_v33 = vadd.f32 %v765_v29, %v676_v28  ;;  %v1887_v28 = vld [vmem:[%s1876_s29 + $0x30] sm:$0xff]  ;;  %v1890_v29 = vld [vmem:[%s1876_s29 + $0x38] sm:$0xff] }
  0xef   : > { %v805_v30 = vpop.f32.mrf.mxu3 }
  0xf0   : > { %v806_v37 = vadd.f32 %v805_v30, %v1851_v40  ;;  %v1893_v30 = vld [vmem:[%s1876_s29 + $0x40] sm:$0xff] }
  0xf1   : > { %v678_v31 = vpop.f32.mrf.mxu0 }
  0xf2   : > { %v767_v32 = vpop.f32.mrf.mxu1 }
  0xf3   : > { %v768_v34 = vadd.f32 %v767_v32, %v678_v31  ;;  %v1896_v31 = vld [vmem:[%s1876_s29 + $0xc0] sm:$0xff]  ;;  %v1899_v32 = vld [vmem:[%s1876_s29 + $0x48] sm:$0xff] }
  0xf5   : > { %v928_v35 = vpack.c.bf16 %v768_v34, %v766_v33  ;;  %v1902_v33 = vld [vmem:[%s1876_s29 + $0xc8] sm:$0xff]  ;;  %v1905_v34 = vld [vmem:[%s1876_s29 + $0x50] sm:$0xff] }
  0xf7   : > { %1032 = vmatmul.bf16.gmra.mxu2 %v928_v35  ;;  %v807_v36 = vpop.f32.mrf.mxu3  ;;  %v1908_v35 = vld [vmem:[%s1876_s29 + $0xd0] sm:$0xff] }
  0xf8   : > { %v808_v38 = vadd.f32 %v807_v36, %v718_v50  ;;  %v1911_v36 = vld [vmem:[%s1876_s29 + $0x58] sm:$0xff] }
  0xf9   : > { %v681_v39 = vpop.f32.mrf.mxu0 }
  0xfa   : > { %v936_v41 = vpack.c.bf16 %v808_v38, %v806_v37  ;;  %v770_v42 = vpop.f32.mrf.mxu1  ;;  %v1914_v37 = vld [vmem:[%s1876_s29 + $0xd8] sm:$0xff]  ;;  %v1917_v38 = vld [vmem:[%s1876_s29 + $0x60] sm:$0xff] }
  0xfb   : > { %v771_v46 = vadd.f32 %v770_v42, %v681_v39  ;;  %v1920_v39 = vld [vmem:[%s1876_s29 + $0xe0] sm:$0xff]  ;;  %v1926_v42 = vld [vmem:[%s1876_s29 + $0xe8] sm:$0xff] }
  0xfc   : > { %1072 = vmatmul.bf16.vlgmr.msra.gmra.mxu3 %v936_v41  ;;  %v1923_v41 = vld [vmem:[%s1876_s29 + $0x68] sm:$0xff] }
  0xff   : > { %v810_v43 = vpop.f32.mrf.mxu3 }
 0x100   : > { %v811_v51 = vadd.f32 %v810_v43, %v1857_v55  ;;  %v1929_v43 = vld [vmem:[%s1876_s29 + $0x70] sm:$0xff] }
 0x101   : > { %v683_v44 = vpop.f32.mrf.mxu0 }
 0x102   : > { %v772_v45 = vpop.f32.mrf.mxu1 }
 0x103   : > { %v773_v47 = vadd.f32 %v772_v45, %v683_v44  ;;  %v1932_v44 = vld [vmem:[%s1876_s29 + $0xf0] sm:$0xff]  ;;  %v1935_v45 = vld [vmem:[%s1876_s29 + $0x78] sm:$0xff] }
 0x105   : > { %v929_v48 = vpack.c.bf16 %v773_v47, %v771_v46  ;;  %v1938_v46 = vld [vmem:[%s1876_s29 + $0xf8] sm:$0xff]  ;;  %v1941_v47 = vld [vmem:[%s1876_s29 + $0x80] sm:$0xff] }
 0x107   : > { %1037 = vmatmul.bf16.gmra.mxu2 %v929_v48  ;;  %v812_v49 = vpop.f32.mrf.mxu3  ;;  %v1944_v48 = vld [vmem:[%s1876_s29 + $0x88] sm:$0xff] }
 0x108   : > { %v813_v52 = vadd.f32 %v812_v49, %v723_v1 }
 0x109   : > { %v686_v53 = vpop.f32.mrf.mxu0 }
 0x10a   : > { %v775_v54 = vpop.f32.mrf.mxu1  ;;  %v937_v56 = vpack.c.bf16 %v813_v52, %v811_v51  ;;  %v1947_v51 = vld [vmem:[%s1876_s29 + $0x90] sm:$0xff]  ;;  %v1950_v52 = vld [vmem:[%s1876_s29 + $0x98] sm:$0xff] }
 0x10b   : > { %v776_v58 = vadd.f32 %v775_v54, %v686_v53  ;;  %v1953_v53 = vld [vmem:[%s1876_s29 + $0xa0] sm:$0xff]  ;;  %v1962_v54 = vld [vmem:[%s1876_s29 + $0xa8] sm:$0xff] }
 0x10c   : > { %1077 = vmatmul.bf16.gmra.mxu3 %v937_v56  ;;  %v1965_v56 = vld [vmem:[%s1876_s29 + $0xb0] sm:$0xff] }
 0x10f   : > { %v815_v40 = vpop.f32.mrf.mxu3 }
 0x110   : > { %v816_v62 = vadd.f32 %v815_v40, %v1863_v6  ;;  %v1968_v40 = vld [vmem:[%s1876_s29 + $0xb8] sm:$0xff] }
 0x111   : > { %v688_v50 = vpop.f32.mrf.mxu0 }
 0x112   : > { %v777_v57 = vpop.f32.mrf.mxu1 }
 0x113   : > { %v778_v59 = vadd.f32 %v777_v57, %v688_v50 }
 0x115   : > { %v930_v60 = vpack.c.bf16 %v778_v59, %v776_v58 }
 0x117   : > { %1042 = vmatmul.bf16.gmra.mxu2 %v930_v60  ;;  %v817_v61 = vpop.f32.mrf.mxu3 }
 0x118   : > { %v818_v63 = vadd.f32 %v817_v61, %v728_v16 }
 0x119   : > { %v691_v0 = vpop.f32.mrf.mxu0 }
 0x11a   : > { %v780_v2 = vpop.f32.mrf.mxu1  ;;  %v938_v3 = vpack.c.bf16 %v818_v63, %v816_v62 }
 0x11b   : > { %v781_v5 = vadd.f32 %v780_v2, %v691_v0 }
 0x11c   : > { %1082 = vmatmul.bf16.gmra.mxu3 %v938_v3 }
 0x11f   : > { %v820_v55 = vpop.f32.mrf.mxu3 }
 0x120   : > { %v821_v10 = vadd.f32 %v820_v55, %v731_v21 }
 0x121   : > { %v693_v1 = vpop.f32.mrf.mxu0 }
 0x122   : > { %v782_v4 = vpop.f32.mrf.mxu1 }
 0x123   : > { %v783_v7 = vadd.f32 %v782_v4, %v693_v1 }
 0x125   : > { %v931_v8 = vpack.c.bf16 %v783_v7, %v781_v5 }
 0x127   : > { %1047 = vmatmul.bf16.gmra.mxu2 %v931_v8  ;;  %v822_v9 = vpop.f32.mrf.mxu3 }
 0x128   : > { %v823_v11 = vadd.f32 %v822_v9, %v733_v27  ;;  %v1884_v27 = vld [vmem:[%s1876_s29 + $0x28] sm:$0xff] }
 0x129   : > { %v696_v12 = vpop.f32.mrf.mxu0 }
 0x12a   : > { %v785_v13 = vpop.f32.mrf.mxu1  ;;  %v939_v14 = vpack.c.bf16 %v823_v11, %v821_v10 }
 0x12b   : > { %v786_v16 = vadd.f32 %v785_v13, %v696_v12 }
 0x12c   : > { %1087 = vmatmul.bf16.gmra.mxu3 %v939_v14 }
 0x131   : > { %v698_v6 = vpop.f32.mrf.mxu0 }
 0x132   : > { %v787_v15 = vpop.f32.mrf.mxu1 }
 0x133   : > { %v788_v17 = vadd.f32 %v787_v15, %v698_v6 }
 0x135   : > { %v932_v18 = vpack.c.bf16 %v788_v17, %v786_v16 }
 0x137   : > { %1052 = vmatmul.bf16.gmra.mxu2 %v932_v18 }
 0x139   : > { %v701_v19 = vpop.f32.mrf.mxu0 }
 0x13a   : > { %v790_v21 = vpop.f32.mrf.mxu1  ;;  %v1013_v22 = vpop.f32.mrf.mxu2 }
 0x13b   : > { %v1093_v49 = vmax.f32 %v1013_v22, 0.0  ;;  %v791_v60 = vadd.f32 %v790_v21, %v701_v19 }
 0x13d   : > { %v1157_v50 = vadd.f32 %v1125_v20, %v1093_v49 }
 0x13f   : > { %1189 = vst [vmem:[%s1959_s6] sm:$0xff] %v1157_v50 }
 0x141   : > { %v703_v57 = vpop.f32.mrf.mxu0 }
 0x142   : > { %v792_v58 = vpop.f32.mrf.mxu1  ;;  %v1015_v59 = vpop.f32.mrf.mxu2 }
 0x143   : > { %v793_v61 = vadd.f32 %v792_v58, %v703_v57  ;;  %v1094_v62 = vmax.f32 %v1015_v59, 0.0 }
 0x145   : > { %v1158_v63 = vadd.f32 %v1126_v23, %v1094_v62  ;;  %v933_v0 = vpack.c.bf16 %v793_v61, %v791_v60 }
 0x147   : > { %1057 = vmatmul.bf16.gmra.mxu2 %v933_v0  ;;  %1190 = vst [vmem:[%s1959_s6 + $0x8] sm:$0xff] %v1158_v63 }
 0x149   : > { %v706_v2 = vpop.f32.mrf.mxu0 }
 0x14a   : > { %v795_v3 = vpop.f32.mrf.mxu1  ;;  %v1018_v55 = vpop.f32.mrf.mxu2 }
 0x14b   : > { %v1095_v1 = vmax.f32 %v1018_v55, 0.0  ;;  %v796_v9 = vadd.f32 %v795_v3, %v706_v2 }
 0x14d   : > { %v1159_v4 = vadd.f32 %v1127_v24, %v1095_v1 }
 0x14f   : > { %1191 = vst [vmem:[%s1959_s6 + $0x10] sm:$0xff] %v1159_v4 }
 0x151   : > { %v708_v5 = vpop.f32.mrf.mxu0 }
 0x152   : > { %v797_v7 = vpop.f32.mrf.mxu1  ;;  %v1020_v8 = vpop.f32.mrf.mxu2 }
 0x153   : > { %v798_v10 = vadd.f32 %v797_v7, %v708_v5  ;;  %v1096_v11 = vmax.f32 %v1020_v8, 0.0 }
 0x155   : > { %v1160_v12 = vadd.f32 %v1128_v25, %v1096_v11  ;;  %v934_v13 = vpack.c.bf16 %v798_v10, %v796_v9 }
 0x157   : > { %1062 = vmatmul.bf16.gmra.mxu2 %v934_v13  ;;  %1192 = vst [vmem:[%s1959_s6 + $0x18] sm:$0xff] %v1160_v12 }
 0x159   : > { %v711_v14 = vpop.f32.mrf.mxu0 }
 0x15a   : > { %v800_v6 = vpop.f32.mrf.mxu1  ;;  %v1023_v15 = vpop.f32.mrf.mxu2 }
 0x15b   : > { %v1097_v16 = vmax.f32 %v1023_v15, 0.0  ;;  %v801_v21 = vadd.f32 %v800_v6, %v711_v14 }
 0x15d   : > { %v1161_v17 = vadd.f32 %v1129_v26, %v1097_v16 }
 0x15f   : > { %1193 = vst [vmem:[%s1959_s6 + $0x20] sm:$0xff] %v1161_v17 }
 0x161   : > { %v713_v18 = vpop.f32.mrf.mxu0 }
 0x162   : > { %v802_v19 = vpop.f32.mrf.mxu1  ;;  %v1025_v20 = vpop.f32.mrf.mxu2 }
 0x163   : > { %v803_v22 = vadd.f32 %v802_v19, %v713_v18  ;;  %v1098_v23 = vmax.f32 %v1025_v20, 0.0 }
 0x165   : > { %v1162_v24 = vadd.f32 %v1884_v27, %v1098_v23  ;;  %v935_v25 = vpack.c.bf16 %v803_v22, %v801_v21 }
 0x167   : > { %1067 = vmatmul.bf16.gmra.mxu2 %v935_v25  ;;  %1194 = vst [vmem:[%s1959_s6 + $0x28] sm:$0xff] %v1162_v24 }
 0x16a   : > { %v1028_v49 = vpop.f32.mrf.mxu2 }
 0x16b   : > { %v1099_v50 = vmax.f32 %v1028_v49, 0.0 }
 0x16d   : > { %v1163_v57 = vadd.f32 %v1887_v28, %v1099_v50 }
 0x16f   : > { %1195 = vst [vmem:[%s1959_s6 + $0x30] sm:$0xff] %v1163_v57 }
 0x172   : > { %v1030_v26 = vpop.f32.mrf.mxu2 }
 0x173   : > { %v1100_v58 = vmax.f32 %v1030_v26, 0.0 }
 0x175   : > { %v1164_v59 = vadd.f32 %v1890_v29, %v1100_v58 }
 0x177   : > { %1196 = vst [vmem:[%s1959_s6 + $0x38] sm:$0xff] %v1164_v59 }
 0x17a   : > { %v1033_v60 = vpop.f32.mrf.mxu2 }
 0x17b   : > { %v1101_v61 = vmax.f32 %v1033_v60, 0.0 }
 0x17d   : > { %v1165_v27 = vadd.f32 %v1893_v30, %v1101_v61 }
 0x17f   : > { %v1073_v62 = vpop.f32.mrf.mxu3  ;;  %1197 = vst [vmem:[%s1959_s6 + $0x40] sm:$0xff] %v1165_v27 }
 0x180   : > { %v1117_v63 = vmax.f32 %v1073_v62, 0.0 }
 0x182   : > { %v1181_v0 = vadd.f32 %v1896_v31, %v1117_v63  ;;  %v1035_v2 = vpop.f32.mrf.mxu2 }
 0x183   : > { %v1102_v28 = vmax.f32 %v1035_v2, 0.0 }
 0x184   : > { %1213 = vst [vmem:[%s1959_s6 + $0xc0] sm:$0xff] %v1181_v0 }
 0x185   : > { %v1166_v3 = vadd.f32 %v1899_v32, %v1102_v28 }
 0x187   : > { %v1075_v55 = vpop.f32.mrf.mxu3  ;;  %1198 = vst [vmem:[%s1959_s6 + $0x48] sm:$0xff] %v1166_v3 }
 0x188   : > { %v1118_v29 = vmax.f32 %v1075_v55, 0.0 }
 0x18a   : > { %v1182_v1 = vadd.f32 %v1902_v33, %v1118_v29  ;;  %v1038_v4 = vpop.f32.mrf.mxu2 }
 0x18b   : > { %v1103_v30 = vmax.f32 %v1038_v4, 0.0 }
 0x18c   : > { %1214 = vst [vmem:[%s1959_s6 + $0xc8] sm:$0xff] %v1182_v1 }
 0x18d   : > { %v1167_v5 = vadd.f32 %v1905_v34, %v1103_v30 }
 0x18f   : > { %v1078_v7 = vpop.f32.mrf.mxu3  ;;  %1199 = vst [vmem:[%s1959_s6 + $0x50] sm:$0xff] %v1167_v5 }
 0x190   : > { %v1119_v31 = vmax.f32 %v1078_v7, 0.0 }
 0x192   : > { %v1183_v8 = vadd.f32 %v1908_v35, %v1119_v31  ;;  %v1040_v9 = vpop.f32.mrf.mxu2 }
 0x193   : > { %v1104_v32 = vmax.f32 %v1040_v9, 0.0 }
 0x194   : > { %1215 = vst [vmem:[%s1959_s6 + $0xd0] sm:$0xff] %v1183_v8 }
 0x195   : > { %v1168_v10 = vadd.f32 %v1911_v36, %v1104_v32 }
 0x197   : > { %v1080_v11 = vpop.f32.mrf.mxu3  ;;  %1200 = vst [vmem:[%s1959_s6 + $0x58] sm:$0xff] %v1168_v10 }
 0x198   : > { %v1120_v33 = vmax.f32 %v1080_v11, 0.0 }
 0x19a   : > { %v1184_v12 = vadd.f32 %v1914_v37, %v1120_v33  ;;  %v1043_v13 = vpop.f32.mrf.mxu2 }
 0x19b   : > { %v1105_v34 = vmax.f32 %v1043_v13, 0.0 }
 0x19c   : > { %1216 = vst [vmem:[%s1959_s6 + $0xd8] sm:$0xff] %v1184_v12 }
 0x19d   : > { %v1169_v14 = vadd.f32 %v1917_v38, %v1105_v34 }
 0x19f   : > { %v1083_v6 = vpop.f32.mrf.mxu3  ;;  %1201 = vst [vmem:[%s1959_s6 + $0x60] sm:$0xff] %v1169_v14 }
 0x1a0   : > { %v1121_v35 = vmax.f32 %v1083_v6, 0.0 }
 0x1a2   : > { %v1185_v15 = vadd.f32 %v1920_v39, %v1121_v35  ;;  %v1045_v16 = vpop.f32.mrf.mxu2 }
 0x1a3   : > { %v1106_v36 = vmax.f32 %v1045_v16, 0.0 }
 0x1a4   : > { %1217 = vst [vmem:[%s1959_s6 + $0xe0] sm:$0xff] %v1185_v15 }
 0x1a5   : > { %v1170_v17 = vadd.f32 %v1923_v41, %v1106_v36 }
 0x1a7   : > { %v1085_v18 = vpop.f32.mrf.mxu3  ;;  %1202 = vst [vmem:[%s1959_s6 + $0x68] sm:$0xff] %v1170_v17 }
 0x1a8   : > { %v1122_v37 = vmax.f32 %v1085_v18, 0.0 }
 0x1aa   : > { %v1186_v19 = vadd.f32 %v1926_v42, %v1122_v37  ;;  %v1048_v20 = vpop.f32.mrf.mxu2 }
 0x1ab   : > { %v1107_v38 = vmax.f32 %v1048_v20, 0.0 }
 0x1ac   : > { %1218 = vst [vmem:[%s1959_s6 + $0xe8] sm:$0xff] %v1186_v19 }
 0x1ad   : > { %v1171_v21 = vadd.f32 %v1929_v43, %v1107_v38 }
 0x1af   : > { %v1088_v22 = vpop.f32.mrf.mxu3  ;;  %1203 = vst [vmem:[%s1959_s6 + $0x70] sm:$0xff] %v1171_v21 }
 0x1b0   : > { %v1123_v39 = vmax.f32 %v1088_v22, 0.0 }
 0x1b2   : > { %v1187_v23 = vadd.f32 %v1932_v44, %v1123_v39  ;;  %v1050_v24 = vpop.f32.mrf.mxu2 }
 0x1b3   : > { %v1108_v41 = vmax.f32 %v1050_v24, 0.0 }
 0x1b4   : > { %1219 = vst [vmem:[%s1959_s6 + $0xf0] sm:$0xff] %v1187_v23 }
 0x1b5   : > { %v1172_v25 = vadd.f32 %v1935_v45, %v1108_v41 }
 0x1b7   : > { %v1090_v49 = vpop.f32.mrf.mxu3  ;;  %1204 = vst [vmem:[%s1959_s6 + $0x78] sm:$0xff] %v1172_v25 }
 0x1b8   : > { %v1124_v42 = vmax.f32 %v1090_v49, 0.0 }
 0x1ba   : > { %v1188_v50 = vadd.f32 %v1938_v46, %v1124_v42  ;;  %v1053_v57 = vpop.f32.mrf.mxu2 }
 0x1bb   : > { %v1109_v43 = vmax.f32 %v1053_v57, 0.0 }
 0x1bc   : > { %1220 = vst [vmem:[%s1959_s6 + $0xf8] sm:$0xff] %v1188_v50 }
 0x1bd   : > { %v1173_v26 = vadd.f32 %v1941_v47, %v1109_v43 }
 0x1bf   : > { %1205 = vst [vmem:[%s1959_s6 + $0x80] sm:$0xff] %v1173_v26 }
 0x1c2   : > { %v1055_v44 = vpop.f32.mrf.mxu2 }
 0x1c3   : > { %v1110_v58 = vmax.f32 %v1055_v44, 0.0 }
 0x1c5   : > { %v1174_v59 = vadd.f32 %v1944_v48, %v1110_v58 }
 0x1c7   : > { %1206 = vst [vmem:[%s1959_s6 + $0x88] sm:$0xff] %v1174_v59 }
 0x1ca   : > { %v1058_v45 = vpop.f32.mrf.mxu2 }
 0x1cb   : > { %v1111_v60 = vmax.f32 %v1058_v45, 0.0 }
 0x1cd   : > { %v1175_v61 = vadd.f32 %v1947_v51, %v1111_v60 }
 0x1cf   : > { %1207 = vst [vmem:[%s1959_s6 + $0x90] sm:$0xff] %v1175_v61 }
 0x1d2   : > { %v1060_v46 = vpop.f32.mrf.mxu2 }
 0x1d3   : > { %v1112_v27 = vmax.f32 %v1060_v46, 0.0 }
 0x1d5   : > { %v1176_v62 = vadd.f32 %v1950_v52, %v1112_v27 }
 0x1d7   : > { %1208 = vst [vmem:[%s1959_s6 + $0x98] sm:$0xff] %v1176_v62 }
 0x1da   : > { %v1063_v47 = vpop.f32.mrf.mxu2 }
 0x1db   : > { %v1113_v63 = vmax.f32 %v1063_v47, 0.0 }
 0x1dd   : > { %v1177_v0 = vadd.f32 %v1953_v53, %v1113_v63 }
 0x1df   : > { %1209 = vst [vmem:[%s1959_s6 + $0xa0] sm:$0xff] %v1177_v0 }
 0x1e2   : > { %v1065_v48 = vpop.f32.mrf.mxu2 }
 0x1e3   : > { %v1114_v2 = vmax.f32 %v1065_v48, 0.0 }
 0x1e5   : > { %v1178_v28 = vadd.f32 %v1962_v54, %v1114_v2 }
 0x1e7   : > { %1210 = vst [vmem:[%s1959_s6 + $0xa8] sm:$0xff] %v1178_v28 }
 0x1ea   : > { %v1068_v3 = vpop.f32.mrf.mxu2 }
 0x1eb   : > { %v1115_v51 = vmax.f32 %v1068_v3, 0.0 }
 0x1ed   : > { %v1179_v55 = vadd.f32 %v1965_v56, %v1115_v51 }
 0x1ef   : > { %1211 = vst [vmem:[%s1959_s6 + $0xb0] sm:$0xff] %v1179_v55 }
 0x1f2   : > { %v1070_v29 = vpop.f32.mrf.mxu2 }
 0x1f3   : > { %v1116_v1 = vmax.f32 %v1070_v29, 0.0 }
 0x1f5   : > { %v1180_v52 = vadd.f32 %v1968_v40, %v1116_v1 }
 0x1f7   : > { %1212 = vst [vmem:[%s1959_s6 + $0xb8] sm:$0xff] %v1180_v52 }
 0x1f8 PF: > { %s14_s17 = sadd.s32 1, %s1671_s17   ;;  %s2043_s15 = smov %s1667_s16 }
 0x1f9   : > { %p11_p5 = scmp.ge.s32.totalorder %s14_s17, 4   ;;  %s2044_s16 = smov %s2046_s18 }
 0x1fb   :  { %13 = sbr.rel (!%p11_p5) target bundleno = 2 (0x2), region = 78 }

</bundles_post_ra>
